<compile_context>
chip_gen: v5e
topology: v5e:2x2
jax: 0.10.0
libtpu: 0.0.40
codegen_flags: <defaults>
</compile_context>

<pallas_src>
import functools

import jax
import jax.numpy as jnp
from jax.experimental import pallas as pl
from jax.experimental.pallas import tpu as pltpu

WINDOW_SIZE = 11
SIGMA = 1.5
C1 = 0.01 ** 2
C2 = 0.03 ** 2


def _gaussian_1d(window_size=WINDOW_SIZE, sigma=SIGMA):
    x = jnp.arange(window_size, dtype=jnp.float32)
    g = jnp.exp(-((x - window_size // 2) ** 2) / (2.0 * sigma ** 2))
    return g / jnp.sum(g)


def _band_matrix_rows(n, g):
    # M[i, h] = g[h - i + half]  ->  (M @ x) is a 'same'-padded 1D gaussian
    # cross-correlation along the first axis of x (zero padding outside).
    half = g.shape[0] // 2
    i = jnp.arange(n)[:, None]
    h = jnp.arange(n)[None, :]
    idx = h - i + half
    valid = (idx >= 0) & (idx < g.shape[0])
    return jnp.where(valid, g[jnp.clip(idx, 0, g.shape[0] - 1)], 0.0).astype(jnp.float32)


def _band_matrix_cols(n, g):
    # (x @ M) blurs along the last axis of x (zero-padded 'same' conv).
    return _band_matrix_rows(n, g).T


def _loss_kernel(p_ref, y_ref, *refs, bt, n_channels, h, w, shared_band, hard_labels):
    if shared_band:
        band_ref, out_ref = refs
        aw = band_ref[...]          # (W, W) bf16; H == W so reused for both passes
        ah = aw
    else:
        ah_ref, aw_ref, out_ref = refs
        ah = ah_ref[...]            # (H, H) bf16: blur along H (transposed layout)
        aw = aw_ref[...]            # (W, W) bf16: blur along W

    bf = jnp.bfloat16
    p32 = p_ref[...].astype(jnp.float32)   # (Bt, C, H, W) predictions in (0, 1)
    y32 = y_ref[...].astype(jnp.float32)   # (Bt, C, H, W) labels
    p_bf = p_ref[...].astype(bf)
    y_bf = y_ref[...].astype(bf)

    # ---- Dice (per-sample ratios, summed over this block's samples) --------
    inter = jnp.sum(p32 * y32, axis=(1, 2, 3), keepdims=True)   # (Bt,1,1,1)
    psum = jnp.sum(p32, axis=(1, 2, 3), keepdims=True)
    ysum = jnp.sum(y32, axis=(1, 2, 3), keepdims=True)
    dice_sum = jnp.sum(2.0 * (inter + 1.0) / (psum + ysum + 1.0))

    # ---- BCE (PyTorch BCELoss semantics: log clamped at -100) --------------
    if hard_labels:
        # Single log per pixel (valid only for exactly-binary labels).
        bce = -jnp.maximum(jnp.log(jnp.where(y32 > 0.5, p32, 1.0 - p32)), -100.0)
    else:
        bce = -(y32 * jnp.maximum(jnp.log(p32), -100.0)
                + (1.0 - y32) * jnp.maximum(jnp.log(1.0 - p32), -100.0))
    bce_sum = jnp.sum(bce)

    # ---- SSIM: fused separable 11x11 gaussian blur of the 5 maps -----------
    # Second-moment maps built directly in bf16 (no f32 pp/yy temporaries).
    n5 = 5 * bt * n_channels
    z = jnp.stack([p_bf, y_bf, p_bf * p_bf, y_bf * y_bf, p_bf * y_bf],
                  axis=0)                                        # (5,Bt,C,H,W) bf16

    # Column blur: one big-M MXU matmul, band matrix stationary on the RHS.
    t = jnp.dot(z.reshape(n5 * h, w), aw,
                preferred_element_type=jnp.float32)              # (n5*H, W) f32

    # Per-plane transpose so the row blur is also a single big-M matmul with
    # the band matrix as stationary RHS (no (n5,H,H) broadcast, no batched
    # einsum).  XLU slot; epilogue is elementwise+sum so no transpose-back.
    tT = jnp.swapaxes(t.reshape(n5, h, w), 1, 2)                 # (n5, W, H) f32

    # Row blur (contracts H, the now-minor axis).
    r = jnp.dot(tT.astype(bf).reshape(n5 * w, h), ah,
                preferred_element_type=jnp.float32)              # (n5*W, H) f32
    r5 = r.reshape(5, bt, n_channels, w, h)                      # transposed planes

    mu1, mu2 = r5[0], r5[1]
    s11 = r5[2] - mu1 * mu1
    s22 = r5[3] - mu2 * mu2
    s12 = r5[4] - mu1 * mu2
    num = (2.0 * mu1 * mu2 + C1) * (2.0 * s12 + C2)
    den = (mu1 * mu1 + mu2 * mu2 + C1) * (s11 + s22 + C2)
    ssim_sum = jnp.sum(num * pl.reciprocal(den, approx=True))

    # ---- lane-padded partial-sum output (megacore-safe, no SMEM acc) -------
    lane = jax.lax.broadcasted_iota(jnp.int32, (1, 8, 128), 2)
    out_ref[...] = jnp.where(lane == 0, bce_sum,
                   jnp.where(lane == 1, ssim_sum,
                   jnp.where(lane == 2, dice_sum, 0.0)))


def _per_step_vmem_bytes(bt, C, H, W):
    px = bt * C * H * W
    # Conservative peak per element (bytes):
    #   16  double-buffered f32 input blocks (p, y)
    #   14  bf16 p/y copies + 5-map bf16 blur stack
    #   40  f32 column-blur output + its f32 per-plane transpose (both live
    #       during the relayout)
    #   10  bf16 transposed copy feeding the row-blur matmul
    #   20  f32 row-blur output (5 maps)
    #  ~16  elementwise temporaries (BCE map, SSIM num/den, Dice product)
    # Not all are simultaneously live; 96 B/px leaves headroom for
    # scheduler-extended live ranges.
    band = (H * H + W * W) * 2 * 2          # bf16 band matrices, double-buffered
    return px * 96 + band


def _pick_block_batch(B, C, H, W, budget_bytes, max_bt):
    for bt in range(min(B, max_bt), 0, -1):
        if B % bt == 0 and _per_step_vmem_bytes(bt, C, H, W) <= budget_bytes:
            return bt
    return 1


def _vmem_capacity_bytes(default=64 * 1024 * 1024):
    try:
        info = pltpu.get_tpu_info()
        cap = getattr(info, "vmem_capacity_bytes", None)
        return int(cap) if cap else default
    except Exception:
        return default


def dice_bce_ssim_loss(outputs, labels, *, block_batch=None, hard_labels=False,
                       labels_bf16=False):
    B, C, H, W = outputs.shape
    g = _gaussian_1d()
    band_w = _band_matrix_cols(W, g).astype(jnp.bfloat16)       # RHS: blur along W
    shared_band = (H == W)
    if not shared_band:
        band_h = _band_matrix_cols(H, g).astype(jnp.bfloat16)   # RHS: blur along H

    # Generation-aware VMEM budgeting / step-count choice.
    vmem_cap = _vmem_capacity_bytes()
    if vmem_cap <= 72 * 1024 * 1024:
        # v7x-class part (64 MiB VMEM per TC, 2 TCs): tighter budget and at
        # least 2 grid steps so the "parallel" batch axis spans both cores.
        budget, limit_cap = 24 * 1024 * 1024, 48 * 1024 * 1024
        max_bt = max(1, B // 2)
    else:
        # v5e / v6e (128 MiB VMEM): larger blocks amortize per-step overhead
        # and give the MXU a bigger M per pass.
        budget, limit_cap = 44 * 1024 * 1024, 100 * 1024 * 1024
        max_bt = B

    if block_batch is not None:
        assert B % block_batch == 0, "block_batch must divide the batch size"
        bt = block_batch
    else:
        bt = _pick_block_batch(B, C, H, W, budget, max_bt)
    n_steps = B // bt

    # TODO(synk): for very large H*W (>= ~1024^2 per sample) even bt=1 will not
    # fit; add an H-tiling grid axis with a (WINDOW_SIZE//2)-row halo, and on
    # v5e switch the blur to an 11-tap pltpu.roll-based conv around H,W >= 512.

    vmem_limit = int(min(max(2 * _per_step_vmem_bytes(bt, C, H, W),
                             32 * 1024 * 1024), limit_cap))

    # Labels can be passed as bf16 (exact for 0/1 masks) to halve their HBM
    # traffic — mainly helps the HBM-bound v5e generation.  Off by default to
    # preserve semantics for soft labels.
    labels_in = labels.astype(jnp.bfloat16) if labels_bf16 else labels

    kernel = functools.partial(_loss_kernel, bt=bt, n_channels=C, h=H, w=W,
                               shared_band=shared_band, hard_labels=hard_labels)

    in_specs = [
        pl.BlockSpec((bt, C, H, W), lambda b: (b, 0, 0, 0)),
        pl.BlockSpec((bt, C, H, W), lambda b: (b, 0, 0, 0)),
    ]
    operands = [outputs, labels_in]
    if shared_band:
        # TODO(synk): mark the static band matrix single-buffered
        # (pipeline_mode=pl.Buffered(1)) once confirmed on the toolchain.
        in_specs.append(pl.BlockSpec((W, W), lambda b: (0, 0)))
        operands.append(band_w)
    else:
        in_specs.append(pl.BlockSpec((H, H), lambda b: (0, 0)))
        in_specs.append(pl.BlockSpec((W, W), lambda b: (0, 0)))
        operands.extend([band_h, band_w])

    partials = pl.pallas_call(
        kernel,
        out_shape=jax.ShapeDtypeStruct((n_steps, 8, 128), jnp.float32),
        grid=(n_steps,),
        in_specs=in_specs,
        out_specs=pl.BlockSpec((1, 8, 128), lambda b: (b, 0, 0)),
        compiler_params=pltpu.CompilerParams(
            dimension_semantics=("parallel",),
            vmem_limit_bytes=vmem_limit),
    )(*operands)

    n_el = float(B * C * H * W)
    bce_mean = jnp.sum(partials[:, 0, 0]) / n_el
    ssim_mean = jnp.sum(partials[:, 0, 1]) / n_el
    dice_loss = 1.0 - jnp.sum(partials[:, 0, 2]) / float(B)
    return bce_mean + (1.0 - ssim_mean) + dice_loss


def _reference(outputs, labels):
    # Pure-JAX f32 reference (same band-matrix formulation of the gaussian conv).
    B, C, H, W = outputs.shape
    g = _gaussian_1d()
    ah = _band_matrix_rows(H, g)
    aw = _band_matrix_cols(W, g)

    def blur(x):
        t = jnp.einsum('bchj,jw->bchw', x, aw)
        return jnp.einsum('ih,bchw->bciw', ah, t)

    mu1 = blur(outputs)
    mu2 = blur(labels)
    s11 = blur(outputs * outputs) - mu1 * mu1
    s22 = blur(labels * labels) - mu2 * mu2
    s12 = blur(outputs * labels) - mu1 * mu2
    ssim_map = ((2 * mu1 * mu2 + C1) * (2 * s12 + C2)) / (
        (mu1 * mu1 + mu2 * mu2 + C1) * (s11 + s22 + C2))
    ssim = jnp.mean(ssim_map)

    bce = jnp.mean(-(labels * jnp.maximum(jnp.log(outputs), -100.0)
                     + (1.0 - labels) * jnp.maximum(jnp.log(1.0 - outputs), -100.0)))

    pf = outputs.reshape(B, -1)
    yf = labels.reshape(B, -1)
    dice = 2.0 * ((pf * yf).sum(1) + 1.0) / (pf.sum(1) + yf.sum(1) + 1.0)
    diceloss = 1.0 - dice.mean()

    return bce + (1.0 - ssim) + diceloss


if __name__ == "__main__":
    key = jax.random.PRNGKey(0)
    k1, k2 = jax.random.split(key)
    B, C, H, W = 2, 1, 128, 128
    # predictions in (0, 1) (post-sigmoid, as required by BCELoss)
    outputs = jax.nn.sigmoid(jax.random.normal(k1, (B, C, H, W), dtype=jnp.float32))
    labels = (jax.random.uniform(k2, (B, C, H, W)) > 0.5).astype(jnp.float32)

    loss = dice_bce_ssim_loss(outputs, labels)
    jax.block_until_ready(loss)

    ref = _reference(outputs, labels)
    # Tolerance accounts for bf16 MXU operands + approx reciprocal vs f32 ref.
    assert jnp.allclose(loss, ref, rtol=2e-2, atol=2e-2), (loss, ref)
    print("KERNEL_OK")
</pallas_src>

<mosaic_0001>
module attributes {stable_mosaic.version = 11 : i64} {
  func.func @_loss_kernel(%arg0: i32, %arg1: memref<1x1x128x128xf32, #tpu.memory_space<vmem>>, %arg2: memref<1x1x128x128xf32, #tpu.memory_space<vmem>>, %arg3: memref<128x128xbf16, #tpu.memory_space<vmem>>, %arg4: memref<1x8x128xf32, #tpu.memory_space<vmem>>) attributes {dimension_semantics = [#tpu.dimension_semantics<parallel>], iteration_bounds = array<i64: 2>, scalar_prefetch = 0 : i64, scratch_operands = 0 : i64, tpu.core_type = #tpu.core_type<tc>, window_params = [{transform_indices = @transform_0, window_bounds = array<i64: 1, 1, 128, 128>}, {transform_indices = @transform_1, window_bounds = array<i64: 1, 1, 128, 128>}, {pipeline_mode = #tpu.pipeline_mode<synchronous>, transform_indices = @transform_2, window_bounds = array<i64: 128, 128>}, {transform_indices = @transform_3, window_bounds = array<i64: 1, 8, 128>}]} {
    %c0 = arith.constant 0 : index
    %c0_0 = arith.constant 0 : index
    %0 = vector.load %arg3[%c0, %c0_0] : memref<128x128xbf16, #tpu.memory_space<vmem>>, vector<128x128xbf16>
    %c0_1 = arith.constant 0 : index
    %c0_2 = arith.constant 0 : index
    %c0_3 = arith.constant 0 : index
    %c0_4 = arith.constant 0 : index
    %1 = vector.load %arg1[%c0_1, %c0_2, %c0_3, %c0_4] : memref<1x1x128x128xf32, #tpu.memory_space<vmem>>, vector<1x1x128x128xf32>
    %c0_5 = arith.constant 0 : index
    %c0_6 = arith.constant 0 : index
    %c0_7 = arith.constant 0 : index
    %c0_8 = arith.constant 0 : index
    %2 = vector.load %arg2[%c0_5, %c0_6, %c0_7, %c0_8] : memref<1x1x128x128xf32, #tpu.memory_space<vmem>>, vector<1x1x128x128xf32>
    %c0_9 = arith.constant 0 : index
    %c0_10 = arith.constant 0 : index
    %c0_11 = arith.constant 0 : index
    %c0_12 = arith.constant 0 : index
    %3 = vector.load %arg1[%c0_9, %c0_10, %c0_11, %c0_12] : memref<1x1x128x128xf32, #tpu.memory_space<vmem>>, vector<1x1x128x128xf32>
    %4 = arith.truncf %3 : vector<1x1x128x128xf32> to vector<1x1x128x128xbf16>
    %c0_13 = arith.constant 0 : index
    %c0_14 = arith.constant 0 : index
    %c0_15 = arith.constant 0 : index
    %c0_16 = arith.constant 0 : index
    %5 = vector.load %arg2[%c0_13, %c0_14, %c0_15, %c0_16] : memref<1x1x128x128xf32, #tpu.memory_space<vmem>>, vector<1x1x128x128xf32>
    %6 = arith.truncf %5 : vector<1x1x128x128xf32> to vector<1x1x128x128xbf16>
    %7 = arith.mulf %1, %2 : vector<1x1x128x128xf32>
    %cst = arith.constant dense<0.000000e+00> : vector<1xf32>
    %8 = vector.multi_reduction <add>, %7, %cst [1, 2, 3] : vector<1x1x128x128xf32> to vector<1xf32>
    %9 = vector.shape_cast %8 : vector<1xf32> to vector<1x1x1x1xf32>
    %cst_17 = arith.constant dense<0.000000e+00> : vector<1xf32>
    %10 = vector.multi_reduction <add>, %1, %cst_17 [1, 2, 3] : vector<1x1x128x128xf32> to vector<1xf32>
    %11 = vector.shape_cast %10 : vector<1xf32> to vector<1x1x1x1xf32>
    %cst_18 = arith.constant dense<0.000000e+00> : vector<1xf32>
    %12 = vector.multi_reduction <add>, %2, %cst_18 [1, 2, 3] : vector<1x1x128x128xf32> to vector<1xf32>
    %13 = vector.shape_cast %12 : vector<1xf32> to vector<1x1x1x1xf32>
    %cst_19 = arith.constant 1.000000e+00 : f32
    %14 = vector.broadcast %cst_19 : f32 to vector<1x1x1x1xf32>
    %15 = arith.addf %9, %14 : vector<1x1x1x1xf32>
    %cst_20 = arith.constant 2.000000e+00 : f32
    %16 = vector.broadcast %cst_20 : f32 to vector<1x1x1x1xf32>
    %17 = arith.mulf %16, %15 : vector<1x1x1x1xf32>
    %18 = arith.addf %11, %13 : vector<1x1x1x1xf32>
    %cst_21 = arith.constant 1.000000e+00 : f32
    %19 = vector.broadcast %cst_21 : f32 to vector<1x1x1x1xf32>
    %20 = arith.addf %18, %19 : vector<1x1x1x1xf32>
    %21 = arith.divf %17, %20 : vector<1x1x1x1xf32>
    %22 = vector.shape_cast %21 : vector<1x1x1x1xf32> to vector<1x1x1x1x1xf32>
    %cst_22 = arith.constant dense<0.000000e+00> : vector<1xf32>
    %23 = vector.multi_reduction <add>, %22, %cst_22 [1, 2, 3, 4] : vector<1x1x1x1x1xf32> to vector<1xf32>
    %24 = vector.shape_cast %23 : vector<1xf32> to vector<1x1x1x1x1xf32>
    %25 = vector.extract %24[0, 0, 0, 0, 0] : f32 from vector<1x1x1x1x1xf32>
    %26 = math.log %1 : vector<1x1x128x128xf32>
    %cst_23 = arith.constant -1.000000e+02 : f32
    %27 = vector.broadcast %cst_23 : f32 to vector<1x1x128x128xf32>
    %28 = arith.maximumf %26, %27 : vector<1x1x128x128xf32>
    %29 = arith.mulf %2, %28 : vector<1x1x128x128xf32>
    %cst_24 = arith.constant 1.000000e+00 : f32
    %30 = vector.broadcast %cst_24 : f32 to vector<1x1x128x128xf32>
    %31 = arith.subf %30, %2 : vector<1x1x128x128xf32>
    %cst_25 = arith.constant 1.000000e+00 : f32
    %32 = vector.broadcast %cst_25 : f32 to vector<1x1x128x128xf32>
    %33 = arith.subf %32, %1 : vector<1x1x128x128xf32>
    %34 = math.log %33 : vector<1x1x128x128xf32>
    %cst_26 = arith.constant -1.000000e+02 : f32
    %35 = vector.broadcast %cst_26 : f32 to vector<1x1x128x128xf32>
    %36 = arith.maximumf %34, %35 : vector<1x1x128x128xf32>
    %37 = arith.mulf %31, %36 : vector<1x1x128x128xf32>
    %38 = arith.addf %29, %37 : vector<1x1x128x128xf32>
    %cst_27 = arith.constant 0.000000e+00 : f32
    %39 = vector.broadcast %cst_27 : f32 to vector<1x1x128x128xf32>
    %40 = arith.subf %39, %38 : vector<1x1x128x128xf32>
    %41 = vector.shape_cast %40 : vector<1x1x128x128xf32> to vector<1x1x1x128x128xf32>
    %cst_28 = arith.constant dense<0.000000e+00> : vector<1xf32>
    %42 = vector.multi_reduction <add>, %41, %cst_28 [1, 2, 3, 4] : vector<1x1x1x128x128xf32> to vector<1xf32>
    %43 = vector.shape_cast %42 : vector<1xf32> to vector<1x1x1x1x1xf32>
    %44 = vector.extract %43[0, 0, 0, 0, 0] : f32 from vector<1x1x1x1x1xf32>
    %45 = arith.mulf %4, %4 : vector<1x1x128x128xbf16>
    %46 = arith.mulf %6, %6 : vector<1x1x128x128xbf16>
    %47 = arith.mulf %4, %6 : vector<1x1x128x128xbf16>
    %48 = vector.shape_cast %4 : vector<1x1x128x128xbf16> to vector<1x1x1x128x128xbf16>
    %49 = vector.shape_cast %6 : vector<1x1x128x128xbf16> to vector<1x1x1x128x128xbf16>
    %50 = vector.shape_cast %45 : vector<1x1x128x128xbf16> to vector<1x1x1x128x128xbf16>
    %51 = vector.shape_cast %46 : vector<1x1x128x128xbf16> to vector<1x1x1x128x128xbf16>
    %52 = vector.shape_cast %47 : vector<1x1x128x128xbf16> to vector<1x1x1x128x128xbf16>
    %53 = tpu.concatenate %48, %49, %50, %51, %52 in 0 : vector<1x1x1x128x128xbf16>, vector<1x1x1x128x128xbf16>, vector<1x1x1x128x128xbf16>, vector<1x1x1x128x128xbf16>, vector<1x1x1x128x128xbf16> -> vector<5x1x1x128x128xbf16>
    %54 = vector.shape_cast %53 : vector<5x1x1x128x128xbf16> to vector<640x128xbf16>
    %cst_29 = arith.constant dense<0.000000e+00> : vector<640x128xf32>
    %55 = tpu.matmul %54, %0, %cst_29 {dimension_numbers = #tpu.dot_dimension_numbers<[1], [0], [0], [1], [0, 0, 1, 1], [], []>} : vector<640x128xbf16>, vector<128x128xbf16>, vector<640x128xf32> -> vector<640x128xf32>
    %56 = vector.shape_cast %55 : vector<640x128xf32> to vector<5x128x128xf32>
    %57 = tpu.transpose %56, [0, 2, 1] : vector<5x128x128xf32> -> vector<5x128x128xf32>
    %58 = arith.truncf %57 : vector<5x128x128xf32> to vector<5x128x128xbf16>
    %59 = vector.shape_cast %58 : vector<5x128x128xbf16> to vector<640x128xbf16>
    %cst_30 = arith.constant dense<0.000000e+00> : vector<640x128xf32>
    %60 = tpu.matmul %59, %0, %cst_30 {dimension_numbers = #tpu.dot_dimension_numbers<[1], [0], [0], [1], [0, 0, 1, 1], [], []>} : vector<640x128xbf16>, vector<128x128xbf16>, vector<640x128xf32> -> vector<640x128xf32>
    %61 = vector.shape_cast %60 : vector<640x128xf32> to vector<5x1x1x128x128xf32>
    %62 = vector.extract_strided_slice %61 {offsets = [0, 0, 0, 0, 0], sizes = [1, 1, 1, 128, 128], strides = [1, 1, 1, 1, 1]} : vector<5x1x1x128x128xf32> to vector<1x1x1x128x128xf32>
    %63 = vector.shape_cast %62 : vector<1x1x1x128x128xf32> to vector<1x1x128x128xf32>
    %64 = vector.extract_strided_slice %61 {offsets = [1, 0, 0, 0, 0], sizes = [1, 1, 1, 128, 128], strides = [1, 1, 1, 1, 1]} : vector<5x1x1x128x128xf32> to vector<1x1x1x128x128xf32>
    %65 = vector.shape_cast %64 : vector<1x1x1x128x128xf32> to vector<1x1x128x128xf32>
    %66 = vector.extract_strided_slice %61 {offsets = [2, 0, 0, 0, 0], sizes = [1, 1, 1, 128, 128], strides = [1, 1, 1, 1, 1]} : vector<5x1x1x128x128xf32> to vector<1x1x1x128x128xf32>
    %67 = vector.shape_cast %66 : vector<1x1x1x128x128xf32> to vector<1x1x128x128xf32>
    %68 = arith.mulf %63, %63 : vector<1x1x128x128xf32>
    %69 = arith.subf %67, %68 : vector<1x1x128x128xf32>
    %70 = vector.extract_strided_slice %61 {offsets = [3, 0, 0, 0, 0], sizes = [1, 1, 1, 128, 128], strides = [1, 1, 1, 1, 1]} : vector<5x1x1x128x128xf32> to vector<1x1x1x128x128xf32>
    %71 = vector.shape_cast %70 : vector<1x1x1x128x128xf32> to vector<1x1x128x128xf32>
    %72 = arith.mulf %65, %65 : vector<1x1x128x128xf32>
    %73 = arith.subf %71, %72 : vector<1x1x128x128xf32>
    %74 = vector.extract_strided_slice %61 {offsets = [4, 0, 0, 0, 0], sizes = [1, 1, 1, 128, 128], strides = [1, 1, 1, 1, 1]} : vector<5x1x1x128x128xf32> to vector<1x1x1x128x128xf32>
    %75 = vector.shape_cast %74 : vector<1x1x1x128x128xf32> to vector<1x1x128x128xf32>
    %76 = arith.mulf %63, %65 : vector<1x1x128x128xf32>
    %77 = arith.subf %75, %76 : vector<1x1x128x128xf32>
    %cst_31 = arith.constant 2.000000e+00 : f32
    %78 = vector.broadcast %cst_31 : f32 to vector<1x1x128x128xf32>
    %79 = arith.mulf %78, %63 : vector<1x1x128x128xf32>
    %80 = arith.mulf %79, %65 : vector<1x1x128x128xf32>
    %cst_32 = arith.constant 9.99999974E-5 : f32
    %81 = vector.broadcast %cst_32 : f32 to vector<1x1x128x128xf32>
    %82 = arith.addf %80, %81 : vector<1x1x128x128xf32>
    %cst_33 = arith.constant 2.000000e+00 : f32
    %83 = vector.broadcast %cst_33 : f32 to vector<1x1x128x128xf32>
    %84 = arith.mulf %83, %77 : vector<1x1x128x128xf32>
    %cst_34 = arith.constant 8.99999984E-4 : f32
    %85 = vector.broadcast %cst_34 : f32 to vector<1x1x128x128xf32>
    %86 = arith.addf %84, %85 : vector<1x1x128x128xf32>
    %87 = arith.mulf %82, %86 : vector<1x1x128x128xf32>
    %88 = arith.mulf %63, %63 : vector<1x1x128x128xf32>
    %89 = arith.mulf %65, %65 : vector<1x1x128x128xf32>
    %90 = arith.addf %88, %89 : vector<1x1x128x128xf32>
    %cst_35 = arith.constant 9.99999974E-5 : f32
    %91 = vector.broadcast %cst_35 : f32 to vector<1x1x128x128xf32>
    %92 = arith.addf %90, %91 : vector<1x1x128x128xf32>
    %93 = arith.addf %69, %73 : vector<1x1x128x128xf32>
    %cst_36 = arith.constant 8.99999984E-4 : f32
    %94 = vector.broadcast %cst_36 : f32 to vector<1x1x128x128xf32>
    %95 = arith.addf %93, %94 : vector<1x1x128x128xf32>
    %96 = arith.mulf %92, %95 : vector<1x1x128x128xf32>
    %97 = tpu.reciprocal %96 {approx = true} : vector<1x1x128x128xf32> -> vector<1x1x128x128xf32>
    %98 = arith.mulf %87, %97 : vector<1x1x128x128xf32>
    %99 = vector.shape_cast %98 : vector<1x1x128x128xf32> to vector<1x1x1x128x128xf32>
    %cst_37 = arith.constant dense<0.000000e+00> : vector<1xf32>
    %100 = vector.multi_reduction <add>, %99, %cst_37 [1, 2, 3, 4] : vector<1x1x1x128x128xf32> to vector<1xf32>
    %101 = vector.shape_cast %100 : vector<1xf32> to vector<1x1x1x1x1xf32>
    %102 = vector.extract %101[0, 0, 0, 0, 0] : f32 from vector<1x1x1x1x1xf32>
    %103 = tpu.iota {dimensions = array<i32: 2>} : vector<1x8x128xi32>
    %c0_i32 = arith.constant 0 : i32
    %104 = vector.broadcast %c0_i32 : i32 to vector<1x8x128xi32>
    %105 = arith.cmpi eq, %103, %104 : vector<1x8x128xi32>
    %c1_i32 = arith.constant 1 : i32
    %106 = vector.broadcast %c1_i32 : i32 to vector<1x8x128xi32>
    %107 = arith.cmpi eq, %103, %106 : vector<1x8x128xi32>
    %c2_i32 = arith.constant 2 : i32
    %108 = vector.broadcast %c2_i32 : i32 to vector<1x8x128xi32>
    %109 = arith.cmpi eq, %103, %108 : vector<1x8x128xi32>
    %cst_38 = arith.constant 0.000000e+00 : f32
    %110 = vector.broadcast %25 : f32 to vector<1x8x128xf32>
    %111 = vector.broadcast %cst_38 : f32 to vector<1x8x128xf32>
    %112 = arith.select %109, %110, %111 : vector<1x8x128xi1>, vector<1x8x128xf32>
    %113 = vector.broadcast %102 : f32 to vector<1x8x128xf32>
    %114 = arith.select %107, %113, %112 : vector<1x8x128xi1>, vector<1x8x128xf32>
    %115 = vector.broadcast %44 : f32 to vector<1x8x128xf32>
    %116 = arith.select %105, %115, %114 : vector<1x8x128xi1>, vector<1x8x128xf32>
    %c0_39 = arith.constant 0 : index
    %c0_40 = arith.constant 0 : index
    %c0_41 = arith.constant 0 : index
    %117 = vector.load %arg4[%c0_39, %c0_40, %c0_41] : memref<1x8x128xf32, #tpu.memory_space<vmem>>, vector<1x8x128xf32>
    tpu.vector_store %arg4[%c0_39, %c0_40, %c0_41], %116 {strides = array<i32>} : memref<1x8x128xf32, #tpu.memory_space<vmem>>, vector<1x8x128xf32>,
    return
  }
  func.func @transform_0(%arg0: i32) -> (i32, i32, i32, i32) {
    %c0_i32 = arith.constant 0 : i32
    %c0_i32_0 = arith.constant 0 : i32
    %c0_i32_1 = arith.constant 0 : i32
    %c0_i32_2 = arith.constant 0 : i32
    return %arg0, %c0_i32, %c0_i32_0, %c0_i32_1 : i32, i32, i32, i32
  }
  func.func @transform_1(%arg0: i32) -> (i32, i32, i32, i32) {
    %c0_i32 = arith.constant 0 : i32
    %c0_i32_0 = arith.constant 0 : i32
    %c0_i32_1 = arith.constant 0 : i32
    %c0_i32_2 = arith.constant 0 : i32
    return %arg0, %c0_i32, %c0_i32_0, %c0_i32_1 : i32, i32, i32, i32
  }
  func.func @transform_2(%arg0: i32) -> (i32, i32) {
    %c0_i32 = arith.constant 0 : i32
    %c0_i32_0 = arith.constant 0 : i32
    %c0_i32_1 = arith.constant 0 : i32
    return %c0_i32, %c0_i32_0 : i32, i32
  }
  func.func @transform_3(%arg0: i32) -> (i32, i32, i32) {
    %c0_i32 = arith.constant 0 : i32
    %c0_i32_0 = arith.constant 0 : i32
    %c0_i32_1 = arith.constant 0 : i32
    return %arg0, %c0_i32, %c0_i32_0 : i32, i32, i32
  }
}

</mosaic_0001>

<bundles_post_ra>
// kernel: tpu_custom_call.1
= control target key start
LH: loop header
LB: loop body
LE: loop exit
PB: predicated region body
PF: predicated region fallthrough
CT: control target
= control target key end

     0   :  { %s4329_s0 = inlined_call_operand.hbm [shape: f32[2,1,128,128], index: 0, kind: input, shape index: {}]   ;;  %s4330_s1 = inlined_call_operand.hbm [shape: f32[2,1,128,128], index: 1, kind: input, shape index: {}]   ;;  %s4331_s2 = inlined_call_operand.hbm [shape: bf16[128,128], index: 2, kind: input, shape index: {}]   ;;  %s4332_s3 = inlined_call_operand.hbm [shape: f32[2,8,128], index: 3, kind: output, shape index: {}]  }
   0x1   :  { %4374 = sst [smem:[#allocation36_spill]] %s4329_s0 }
   0x2   :  { %4375 = sst [smem:[#allocation37_spill]] %s4331_s2 }
   0x3   :  { %8 = vsyncpa [#allocation3], 0 }
   0x4   :  { %10 = vsyncpa [#allocation3 + $0x1], 0 }
   0x5   :  { %11 = vsyncpa [#allocation6], 0 }
   0x6   :  { %13 = vsyncpa [#allocation6 + $0x1], 0 }
   0x7   :  { %14 = vsyncpa [#allocation4], 0 }
   0x8   :  { %16 = vsyncpa [#allocation4 + $0x1], 0  ;;  %s3114_s12 = smov 0   ;;  %s3116_s13 = smov 0  }
   0x9   :  { %s3118_s14 = smov 0   ;;  %s3120_s15 = smov 0  }
   0xa LB: > { %s3135_s16 = sadd.s32 4294967295, %s3087_s15   ;;  %s2423_s17 = sadd.s32 4294967294, %s3087_s15   ;;  %s3087_s15 = sphi %s3120_s15, %s4480_s15   ;;  %s3083_s14 = sphi %s3118_s14, %s4479_s14   ;;  %s3079_s13 = sphi %s3116_s13, %s4478_s13   ;;  %s3075_s12 = sphi %s3114_s12, %s4477_s12  }
   0xb   : > { %p42_p0 = scmp.ne.s32.totalorder %s3079_s13, %s3075_s12  ;;  %p43_p1 = scmp.eq.s32.totalorder %s3135_s16, 0 }
   0xc   : > { %p113_p2 = scmp.eq.s32.totalorder %s3135_s16, 1  ;;  %p119_p3 = scmp.eq.s32.totalorder %s2423_s17, 1 }
   0xd   : > { %p3144_p4 = por %p43_p1, %p42_p0  ;;  %p2424_p5 = scmp.ge.s32.totalorder %s3087_s15, 1 }
   0xe   : > { %p3149_p6 = por %p119_p3, %p42_p0  ;;  %p126_p7 = scmp.lt.s32.totalorder %s3087_s15, 3 }
   0xf   : > { %s4378_s2 = sld [smem:[#allocation37_spill]]  ;;  %s3089_s24 = smov [#allocation7]  }
  0x10   : > { %p3157_p8 = pnand %p2424_p5, %p126_p7  ;;  %s139_s25 = sshll.u32 %s3089_s24, 4  ;;  %s140_s25 = int_to_ptr.vmem [resolvable:$true] %s139_s25 }
  0x11   : > { %s3167_s26 = sadd.s32 1, %s3087_s15   ;;  %s3090_s27 = smov 64  }
  0x12   : > { %p2516_p9 = pneg %p3157_p8  ;;  %s3091_s28 = smov 4  }
  0x13   : > { %s26_s29 = ssub.s32 %s3087_s15, %s3167_s26  ;;  %s29_s30 = sadd.s32 1, %s3083_s14 }
  0x14   : > { %p2517_p10 = pnand %p2516_p9, %p43_p1  ;;  %p27_p12 = scmp.eq.s32.totalorder %s26_s29, 0 }
  0x15   : > { %s137_s22 = sshll.u32 %s4378_s2, 4  ;;  %p36_p13 = scmp.ne.s32.totalorder %s3083_s14, %s3079_s13  ;;  %s138_s22 = int_to_ptr.hbm [resolvable:$true] %s137_s22 }
  0x16   : > { %2519 = dma.hbm_to_vmem [thread:$0]  (!%p2517_p10), %s138_s22, 1024, %s140_s25, [#allocation6], %s3090_s27, %s3090_s27, %s3091_s28  }
  0x17   : > { %p37_p0 = scmp.eq.s32.totalorder %s3087_s15, 0  ;;  %p2532_p3 = scmp.lt.s32.totalorder %s3087_s15, 2 }
  0x18   : > { %s3177_s4 = scalar_select %p27_p12, %s3083_s14, %s29_s30  }
  0x19   : > { %p38_p5 = por %p37_p0, %p36_p13  ;;  %p3181_p7 = por %p113_p2, %p36_p13 }
  0x1a   : > { %s153_s6 = sand.u32 1, %s3083_s14   ;;  %s2474_s7 = sshll.u32 %s3087_s15, 7 }
  0x1b   : > { %s3187_s8 = sshll.u32 %s153_s6, 7  ;;  %s4381_s0 = sld [smem:[#allocation36_spill]] }
  0x1c   : > { %s157_s20 = scalar_lea.vmem [#allocation2], %s3187_s8  ;;  %p3195_p9 = pnand %p2532_p3, %p38_p5 }
  0x1d   : > { %s165_s21 = sshll.u32 %s157_s20, 4  ;;  %s184_s27 = scalar_lea.hbm %s4330_s1, %s2474_s7  ;;  %s166_s21 = int_to_ptr.vmem [resolvable:$true] %s165_s21 }
  0x1e   : > { %s154_s28 = scalar_lea.sflag [#allocation3], %s153_s6  ;;  %p2957_p10 = pneg %p3195_p9 }
  0x21   : > { %s162_s11 = scalar_lea.hbm %s4381_s0, %s2474_s7 }
  0x22   : > { %s163_s17 = sshll.u32 %s162_s11, 4  ;;  %s2960_s11 = scalar_lea.hbm %s4381_s0, 256  ;;  %s164_s17 = int_to_ptr.hbm [resolvable:$true] %s163_s17 }
  0x23   : > { %s2953_s29 = sshra.s32 %s164_s17, 4  ;;  %s2954_s29 = int_to_ptr.hbm [resolvable:$true] %s2953_s29 }
  0x24   : > { %s2955_s30 = scalar_lea.hbm %s2954_s29, 128  ;;  %p2961_p0 = scmp.lt.s32.totalorder %s2954_s29, %s4381_s0 }
  0x25   : > { %p2956_p2 = scmp.ne.s32.totalorder %s2954_s29, %s2955_s30  ;;  %p2962_p3 = scmp.lt.s32.totalorder %s2960_s11, %s2955_s30 }
  0x27   : > { %p2958_p12 = pnand %p2957_p10, %p2956_p2  ;;  %p2963_p5 = por %p2962_p3, %p2961_p0 }
  0x29   : > { %p2959_p13 = pneg %p2958_p12 }
  0x2b   : > { %p2964_p11 = pnand %p2963_p5, %p2959_p13 }
  0x2d   : > { %2967 = shalt.err (!%p2964_p11)
}
  0x2e   : > { %s3092_s6 = smov 128   ;;  %s3093_s7 = smov 8  }
  0x2f   : > { %2523 = dma.hbm_to_vmem [thread:$0]  (!%p3195_p9), %s164_s17, 2048, %s166_s21, %s154_s28, %s3092_s6, %s3092_s6, %s3093_s7  }
  0x30   : > { %s185_s25 = sshll.u32 %s184_s27, 4  ;;  %s179_s2 = scalar_lea.vmem [#allocation5], %s3187_s8  ;;  %s186_s25 = int_to_ptr.hbm [resolvable:$true] %s185_s25 }
  0x31   : > { %s187_s9 = sshll.u32 %s179_s2, 4  ;;  %s175_s10 = sand.u32 1, %s3087_s15   ;;  %s188_s9 = int_to_ptr.vmem [resolvable:$true] %s187_s9 }
  0x32   : > { %s176_s20 = scalar_lea.sflag [#allocation6], %s175_s10  ;;  %s2983_s29 = sshra.s32 %s186_s25, 4  ;;  %s2984_s29 = int_to_ptr.hbm [resolvable:$true] %s2983_s29 }
  0x33   : > { %s2985_s30 = scalar_lea.hbm %s2984_s29, 128  ;;  %s2990_s0 = scalar_lea.hbm %s4330_s1, 256 }
  0x34   : > { %p2986_p2 = scmp.ne.s32.totalorder %s2984_s29, %s2985_s30  ;;  %p2991_p13 = scmp.lt.s32.totalorder %s2984_s29, %s4330_s1 }
  0x35   : > { %p2992_p0 = scmp.lt.s32.totalorder %s2990_s0, %s2985_s30 }
  0x36   : > { %p2988_p11 = pnand %p2986_p2, %p2957_p10 }
  0x37   : > { %p2993_p3 = por %p2992_p0, %p2991_p13 }
  0x38   : > { %p2989_p12 = pneg %p2988_p11 }
  0x3a   : > { %p2994_p5 = pnand %p2993_p3, %p2989_p12 }
  0x3c   : > { %2997 = shalt.err (!%p2994_p5)
}
  0x3d   : > { %2526 = dma.hbm_to_vmem [thread:$0]  (!%p3195_p9), %s186_s25, 2048, %s188_s9, %s176_s20, %s3092_s6, %s3092_s6, %s3093_s7  }
  0x3e   : > { %199 = sbr.rel (%p3157_p8) target bundleno = 1377 (0x561), region = 32 }
  0x43   : > { %s3231_s2 = sand.u32 1, %s3079_s13  }
  0x44   : > { %s2434_s8 = sshll.u32 %s3231_s2, 7  ;;  %s202_s27 = scalar_lea.sflag [#allocation3], %s3231_s2 }
  0x45   : > { %s3235_s28 = scalar_lea.vmem [#allocation2], %s2434_s8 }
  0x46   : > { %3058 = dma.done.wait (%p3144_p4), %s202_s27, 2048  }
  0x47   : > { %3060 = vsyncadd (%p3144_p4), %s202_s27, 4294965248  ;;  %s211_s0 = sand.u32 1, %s3135_s16   ;;  %s3242_s22 = scalar_lea.vmem [#allocation5], %s2434_s8 }
  0x48   : > { %s212_s23 = scalar_lea.sflag [#allocation6], %s211_s0 }
  0x49   : > { %3062 = dma.done.wait (%p3144_p4), %s212_s23, 2048  }
  0x4a   : > { %3064 = vsyncadd (%p3144_p4), %s212_s23, 4294965248 }
  0x4b   : > { %3066 = dma.done.wait (%p43_p1), [#allocation6], 1024  }
  0x4c   : > { %3068 = vsyncadd (%p43_p1), [#allocation6], 4294966272  ;;  %v2483_v0 = vld [vmem:[#allocation7 + $0x38] sm:$0xff]  ;;  %v2482_v1 = vld [vmem:[#allocation7 + $0x30] sm:$0xff]  ;;  %s2437_s18 = sshll.u32 %s3231_s2, 3  ;;  %s2471_s6 = sshll.u32 %s3135_s16, 3 }
  0x4d   : > { %1067 = vmatpush.bf16.msra.mxu0 %v2483_v0  ;;  %2484 = vmatpush.bf16.msra.mxu2 %v2483_v0  ;;  %v2481_v2 = vld [vmem:[#allocation7 + $0x28] sm:$0xff]  ;;  %v2480_v3 = vld [vmem:[#allocation7 + $0x20] sm:$0xff]  ;;  %v2479_v4 = vld [vmem:[#allocation7 + $0x18] sm:$0xff]  ;;  %s2316_s10 = scalar_lea.hbm %s4332_s3, %s2471_s6  ;;  %s248_s20 = scalar_lea.vmem [#allocation8], %s2437_s18 }
  0x4e   : > { %1756 = vmatpush.bf16.msra.mxu1 %v2483_v0  ;;  %2492 = vmatpush.bf16.msra.mxu3 %v2483_v0  ;;  %v2478_v5 = vld [vmem:[#allocation7 + $0x10] sm:$0xff]  ;;  %v3253_v6 = vld [vmem:[%s3235_s28] sm:$0xff]  ;;  %v3256_v7 = vld [vmem:[%s3235_s28 + $0x8] sm:$0xff]  ;;  %s2318_s29 = sshll.u32 %s248_s20, 4  ;;  %s2320_s11 = sshll.u32 %s2316_s10, 4  ;;  %s2319_s29 = int_to_ptr.vmem [resolvable:$true] %s2318_s29  ;;  %s2321_s11 = int_to_ptr.hbm [resolvable:$true] %s2320_s11 }
  0x4f   : > { %v3260_v8 = vpack.c.bf16 %v3253_v6, %v3253_v6  ;;  %v3264_v9 = vpack.c.bf16 %v3256_v7, %v3256_v7  ;;  %v2477_v10 = vld [vmem:[#allocation7 + $0x8] sm:$0xff]  ;;  %v2476_v13 = vld [vmem:[#allocation7] sm:$0xff]  ;;  %v3269_v15 = vld [vmem:[%s3235_s28 + $0x10] sm:$0xff]  ;;  %2796 = vlog2.f32 %v3253_v6  ;;  %s2306_s16 = scalar_lea.sflag [#allocation4], %s3231_s2  ;;  %s3027_s17 = sshra.s32 %s2321_s11, 4  ;;  %s3028_s17 = int_to_ptr.hbm [resolvable:$true] %s3027_s17 }
  0x50   : > { %v3272_v16 = vld [vmem:[%s3235_s28 + $0x18] sm:$0xff]  ;;  %v3276_v17 = vpack.c.bf16 %v3269_v15, %v3269_v15  ;;  %v273_v22 = vld [vmem:[%s3235_s28 + $0x40] sm:$0xff]  ;;  %v274_v23 = vld [vmem:[%s3235_s28 + $0x48] sm:$0xff]  ;;  %2798 = vlog2.f32 %v3256_v7  ;;  %s3029_s21 = scalar_lea.hbm %s3028_s17, 8  ;;  %p3034_p9 = scmp.lt.s32.totalorder %s3028_s17, %s4332_s3 }
  0x51   : > { %1068 = vmatpush.bf16.msra.mxu0 %v2482_v1  ;;  %2485 = vmatpush.bf16.msra.mxu2 %v2482_v1  ;;  %v859_v11 = vunpack.c.l.b16 %v3260_v8  ;;  %v860_v12 = vunpack.c.l.b16 %v3264_v9  ;;  %v3280_v18 = vpack.c.bf16 %v3272_v16, %v3272_v16  ;;  %v305_v24 = vpack.c.bf16 %v273_v22, %v273_v22  ;;  %v3289_v27 = vld [vmem:[%s3235_s28 + $0x20] sm:$0xff]  ;;  %v270_v28 = vld [vmem:[%s3235_s28 + $0x28] sm:$0xff]  ;;  %v275_v42 = vld [vmem:[%s3235_s28 + $0x50] sm:$0xff]  ;;  %p3030_p1 = scmp.ne.s32.totalorder %s3028_s17, %s3029_s21 }
  0x52   : > { %1757 = vmatpush.bf16.msra.mxu1 %v2482_v1  ;;  %2493 = vmatpush.bf16.msra.mxu3 %v2482_v1  ;;  %v861_v19 = vunpack.c.l.b16 %v3276_v17  ;;  %v306_v25 = vpack.c.bf16 %v274_v23, %v274_v23  ;;  %v3300_v32 = vpack.c.bf16 %v3289_v27, %v3289_v27  ;;  %v3302_v33 = vpack.c.bf16 %v270_v28, %v270_v28  ;;  %v276_v43 = vld [vmem:[%s3235_s28 + $0x58] sm:$0xff]  ;;  %v271_v48 = vld [vmem:[%s3235_s28 + $0x30] sm:$0xff]  ;;  %v277_v62 = vld [vmem:[%s3235_s28 + $0x60] sm:$0xff] }
  0x53   : > { %v939_v14 = vpack.c.b16 %v860_v12, %v859_v11  ;;  %v862_v20 = vunpack.c.l.b16 %v3280_v18  ;;  %v3286_v26 = vunpack.c.l.bf16 %v305_v24  ;;  %v3308_v44 = vpack.c.bf16 %v275_v42, %v275_v42  ;;  %v272_v49 = vld [vmem:[%s3235_s28 + $0x38] sm:$0xff]  ;;  %v278_v63 = vld [vmem:[%s3235_s28 + $0x68] sm:$0xff]  ;;  %v279_v23 = vld [vmem:[%s3235_s28 + $0x70] sm:$0xff]  ;;  %p3031_p4 = pnand %p3030_p1, %p3181_p7 }
  0x54   : > { %v3292_v29 = vunpack.c.l.bf16 %v306_v25  ;;  %v863_v38 = vunpack.c.l.b16 %v3300_v32  ;;  %v864_v39 = vunpack.c.l.b16 %v3302_v33  ;;  %v3310_v45 = vpack.c.bf16 %v276_v43, %v276_v43  ;;  %v280_v28 = vld [vmem:[%s3235_s28 + $0x78] sm:$0xff] }
  0x55   : > { %1069 = vmatpush.bf16.msra.mxu0 %v2481_v2  ;;  %2486 = vmatpush.bf16.msra.mxu2 %v2481_v2  ;;  %v940_v21 = vpack.c.b16 %v862_v20, %v861_v19  ;;  %v675_v30 = vmul.f32 %v3286_v26, %v3286_v26  ;;  %v3313_v46 = vunpack.c.l.bf16 %v3308_v44  ;;  %v3324_v52 = vpack.c.bf16 %v271_v48, %v271_v48  ;;  %p3032_p8 = pneg %p3031_p4 }
  0x56   : > { %1758 = vmatpush.bf16.msra.mxu1 %v2481_v2  ;;  %2494 = vmatpush.bf16.msra.mxu3 %v2481_v2  ;;  %v676_v31 = vmul.f32 %v3292_v29, %v3292_v29  ;;  %v941_v41 = vpack.c.b16 %v864_v39, %v863_v38  ;;  %v3316_v47 = vunpack.c.l.bf16 %v3310_v45  ;;  %v3326_v53 = vpack.c.bf16 %v272_v49, %v272_v49  ;;  %v2797_v39 = vpop.eup %2796 }
  0x57   : > { %v691_v34 = vpack.c.bf16 %v675_v30, %v675_v30  ;;  %4383 = vst [vmem:[#allocation13_spill] sm:$0xff] %v3313_v46  ;;  %v677_v50 = vmul.f32 %v3313_v46, %v3313_v46  ;;  %v865_v58 = vunpack.c.l.b16 %v3324_v52  ;;  %v3332_v0 = vpack.c.bf16 %v277_v62, %v277_v62  ;;  %v282_v62 = vld [vmem:[%s3242_s22 + $0x8] sm:$0xff] }
  0x58   : > { %v692_v35 = vpack.c.bf16 %v676_v31, %v676_v31  ;;  %4384 = vst [vmem:[#allocation14_spill] sm:$0xff] %v3316_v47  ;;  %v678_v51 = vmul.f32 %v3316_v47, %v3316_v47  ;;  %v866_v59 = vunpack.c.l.b16 %v3326_v53  ;;  %v3334_v1 = vpack.c.bf16 %v278_v63, %v278_v63 }
  0x59   : > { %1070 = vmatpush.bf16.msra.mxu0 %v2480_v3  ;;  %2487 = vmatpush.bf16.msra.mxu2 %v2480_v3  ;;  %v899_v36 = vunpack.c.l.b16 %v691_v34  ;;  %v693_v54 = vpack.c.bf16 %v677_v50, %v677_v50  ;;  %v3337_v2 = vunpack.c.l.bf16 %v3332_v0  ;;  %v868_v19 = vunpack.c.l.b16 %v306_v25 }
  0x5a   : > { %1759 = vmatpush.bf16.msra.mxu1 %v2480_v3  ;;  %2495 = vmatpush.bf16.msra.mxu3 %v2480_v3  ;;  %v900_v37 = vunpack.c.l.b16 %v692_v35  ;;  %v694_v55 = vpack.c.bf16 %v678_v51, %v678_v51  ;;  %v942_v61 = vpack.c.b16 %v866_v59, %v865_v58  ;;  %v3340_v3 = vunpack.c.l.bf16 %v3334_v1 }
  0x5b   : > { %v901_v56 = vunpack.c.l.b16 %v693_v54  ;;  %4385 = vst [vmem:[#allocation15_spill] sm:$0xff] %v3337_v2  ;;  %v515_v22 = vsub.f32 1.0, %v3253_v6  ;;  %v516_v30 = vsub.f32 1.0, %v3256_v7  ;;  %v3350_v31 = vpack.c.bf16 %v279_v23, %v279_v23 }
  0x5c   : > { %v959_v40 = vpack.c.b16 %v900_v37, %v899_v36  ;;  %v902_v57 = vunpack.c.l.b16 %v694_v55  ;;  %4386 = vst [vmem:[#allocation16_spill] sm:$0xff] %v3340_v3  ;;  %v3352_v34 = vpack.c.bf16 %v280_v28, %v280_v28  ;;  %v436_v49 = vmul.f32 0.6931472, %v2797_v39 }
  0x5d   : > { %1071 = vmatpush.bf16.msra.mxu0 %v2479_v4  ;;  %2488 = vmatpush.bf16.msra.mxu2 %v2479_v4  ;;  %2800 = vlog2.f32 %v515_v22  ;;  %v869_v50 = vunpack.c.l.b16 %v3308_v44  ;;  %v870_v51 = vunpack.c.l.b16 %v3310_v45  ;;  %v330_v45 = vmul.f32 %v282_v62, %v3256_v7 }
  0x5e   : > { %1760 = vmatpush.bf16.msra.mxu1 %v2479_v4  ;;  %2496 = vmatpush.bf16.msra.mxu3 %v2479_v4  ;;  %v960_v60 = vpack.c.b16 %v902_v57, %v901_v56  ;;  %v679_v4 = vmul.f32 %v3337_v2, %v3337_v2  ;;  %v3360_v25 = vunpack.c.l.bf16 %v3352_v34  ;;  %2802 = vlog2.f32 %v516_v30 }
  0x5f   : > { %v467_v58 = vmax.f32 %v436_v49, -100.0  ;;  %v944_v59 = vpack.c.b16 %v870_v51, %v869_v50  ;;  %v517_v23 = vsub.f32 1.0, %v3269_v15  ;;  %2804 = vlog2.f32 %v3269_v15 }
  0x60   : > { %4388 = vst [vmem:[#allocation18_spill] sm:$0xff] %v3360_v25  ;;  %v682_v36 = vmul.f32 %v3360_v25, %v3360_v25 }
  0x61   : > { %1072 = vmatpush.bf16.msra.mxu0 %v2478_v5  ;;  %2489 = vmatpush.bf16.msra.mxu2 %v2478_v5  ;;  %2806 = vlog2.f32 %v517_v23 }
  0x62   : > { %1761 = vmatpush.bf16.msra.mxu1 %v2478_v5  ;;  %2497 = vmatpush.bf16.msra.mxu3 %v2478_v5  ;;  %v680_v5 = vmul.f32 %v3340_v3, %v3340_v3  ;;  %v698_v38 = vpack.c.bf16 %v682_v36, %v682_v36 }
  0x64   : > { %v696_v11 = vpack.c.bf16 %v680_v5, %v680_v5  ;;  %v906_v42 = vunpack.c.l.b16 %v698_v38 }
  0x65   : > { %1073 = vmatpush.bf16.msra.mxu0 %v2477_v10  ;;  %2490 = vmatpush.bf16.msra.mxu2 %v2477_v10 }
  0x66   : > { %1762 = vmatpush.bf16.msra.mxu1 %v2477_v10  ;;  %2498 = vmatpush.bf16.msra.mxu3 %v2477_v10  ;;  %v695_v10 = vpack.c.bf16 %v679_v4, %v679_v4  ;;  %v3372_v4 = vpack.c.bf16 %v282_v62, %v282_v62 }
  0x68   : > { %v903_v12 = vunpack.c.l.b16 %v695_v10  ;;  %v3380_v22 = vunpack.c.l.bf16 %v3372_v4 }
  0x69   : > { %1074 = vmatpush.bf16.msra.mxu0 %v2476_v13  ;;  %2491 = vmatpush.bf16.msra.mxu2 %v2476_v13 }
  0x6a   : > { %1763 = vmatpush.bf16.msra.mxu1 %v2476_v13  ;;  %2499 = vmatpush.bf16.msra.mxu3 %v2476_v13  ;;  %v904_v13 = vunpack.c.l.b16 %v696_v11  ;;  %v716_v7 = vmul.f32 %v3380_v22, %v3380_v22 }
  0x6c   : > { %1075 = vmatmul.bf16.vlgmr.msra.gmra.mxu0 %v939_v14  ;;  %1175 = vmatmul.bf16.vlgmr.msra.gmra.mxu2 %v959_v40  ;;  %v867_v14 = vunpack.c.l.b16 %v305_v24  ;;  %v961_v20 = vpack.c.b16 %v904_v13, %v903_v12  ;;  %v3357_v24 = vunpack.c.l.bf16 %v3350_v31  ;;  %v2799_v40 = vpop.eup %2798  ;;  %v732_v38 = vpack.c.bf16 %v716_v7, %v716_v7 }
  0x6d   : > { %v2801_v43 = vpop.eup %2800  ;;  %v438_v55 = vmul.f32 0.6931472, %v2799_v40 }
  0x6e   : > { %4387 = vst [vmem:[#allocation17_spill] sm:$0xff] %v3357_v24  ;;  %v681_v35 = vmul.f32 %v3357_v24, %v3357_v24  ;;  %v2803_v48 = vpop.eup %2802  ;;  %v532_v56 = vmul.f32 0.6931472, %v2801_v43  ;;  %v872_v43 = vunpack.c.l.b16 %v3334_v1 }
  0x6f   : > { %v534_v57 = vmul.f32 0.6931472, %v2803_v48  ;;  %v908_v48 = vunpack.c.l.b16 %v732_v38  ;;  %v2805_v51 = vpop.eup %2804 }
  0x70   : > { %v697_v37 = vpack.c.bf16 %v681_v35, %v681_v35  ;;  %v563_v5 = vmax.f32 %v532_v56, -100.0  ;;  %v283_v56 = vld [vmem:[%s3242_s22 + $0x10] sm:$0xff] }
  0x71   : > { %v564_v10 = vmax.f32 %v534_v57, -100.0  ;;  %v284_v57 = vld [vmem:[%s3242_s22 + $0x18] sm:$0xff] }
  0x7c   : > { %1080 = vmatmul.bf16.gmra.mxu0 %v940_v21  ;;  %1180 = vmatmul.bf16.gmra.mxu2 %v960_v60  ;;  %v943_v21 = vpack.c.b16 %v868_v19, %v867_v14  ;;  %v468_v60 = vmax.f32 %v438_v55, -100.0  ;;  %v500_v19 = vsub.f32 1.0, %v282_v62  ;;  %v2807_v55 = vpop.eup %2806 }
  0x7e   : > { %v484_v13 = vmul.f32 %v468_v60, %v282_v62  ;;  %v580_v30 = vmul.f32 %v564_v10, %v500_v19  ;;  %v3394_v60 = vpack.c.bf16 %v284_v57, %v284_v57 }
  0x80   : > { %v596_v36 = vadd.f32 %v580_v30, %v484_v13  ;;  %v3400_v1 = vunpack.c.l.bf16 %v3394_v60  ;;  %v331_v13 = vmul.f32 %v283_v56, %v3269_v15 }
  0x82   : > { %v612_v40 = vsub.f32 0.0, %v596_v36  ;;  %v718_v10 = vmul.f32 %v3400_v1, %v3400_v1  ;;  %v873_v36 = vunpack.c.l.b16 %v3350_v31 }
  0x8c   : > { %1085 = vmatmul.bf16.gmra.mxu0 %v941_v41  ;;  %1185 = vmatmul.bf16.gmra.mxu2 %v961_v20  ;;  %v905_v41 = vunpack.c.l.b16 %v697_v37 }
  0x8e   : > { %v962_v54 = vpack.c.b16 %v906_v42, %v905_v41  ;;  %v871_v42 = vunpack.c.l.b16 %v3332_v0 }
  0x9c   : > { %1090 = vmatmul.bf16.gmra.mxu0 %v942_v61  ;;  %1190 = vmatmul.bf16.gmra.mxu2 %v962_v54  ;;  %v281_v61 = vld [vmem:[%s3242_s22] sm:$0xff]  ;;  %v945_v54 = vpack.c.b16 %v872_v43, %v871_v42 }
  0x9d   : > { %v3370_v63 = vpack.c.bf16 %v281_v61, %v281_v61  ;;  %v329_v44 = vmul.f32 %v281_v61, %v3253_v6  ;;  %v391_v11 = vadd.f32 %v282_v62, %v281_v61  ;;  %v483_v12 = vmul.f32 %v467_v58, %v281_v61 }
  0x9e   : > { %v499_v14 = vsub.f32 1.0, %v281_v61  ;;  %v440_v58 = vmul.f32 0.6931472, %v2805_v51  ;;  %v536_v61 = vmul.f32 0.6931472, %v2807_v55 }
  0x9f   : > { %v3377_v20 = vunpack.c.l.bf16 %v3370_v63  ;;  %v392_v19 = vadd.f32 %v391_v11, %v283_v56  ;;  %v286_v11 = vld [vmem:[%s3242_s22 + $0x28] sm:$0xff] }
  0xa0   : > { %v579_v28 = vmul.f32 %v563_v5, %v499_v14  ;;  %v469_v62 = vmax.f32 %v440_v58, -100.0  ;;  %v332_v14 = vmul.f32 %v284_v57, %v3272_v16  ;;  %v285_v16 = vld [vmem:[%s3242_s22 + $0x20] sm:$0xff] }
  0xa1   : > { %v715_v6 = vmul.f32 %v3377_v20, %v3377_v20  ;;  %v393_v7 = vadd.f32 %v392_v19, %v284_v57 }
  0xa2   : > { %v595_v35 = vadd.f32 %v579_v28, %v483_v12  ;;  %v734_v12 = vpack.c.bf16 %v718_v10, %v718_v10  ;;  %v485_v23 = vmul.f32 %v469_v62, %v283_v56  ;;  %v501_v28 = vsub.f32 1.0, %v283_v56 }
  0xa3   : > { %v731_v37 = vpack.c.bf16 %v715_v6, %v715_v6  ;;  %v876_v10 = vunpack.c.l.b16 %v3372_v4 }
  0xa4   : > { %v611_v39 = vsub.f32 0.0, %v595_v35  ;;  %v910_v35 = vunpack.c.l.b16 %v734_v12 }
  0xa5   : > { %v907_v41 = vunpack.c.l.b16 %v731_v37  ;;  %v874_v37 = vunpack.c.l.b16 %v3352_v34 }
  0xa6   : > { %v627_v49 = vadd.f32 %v612_v40, %v611_v39 }
  0xa7   : > { %v963_v50 = vpack.c.b16 %v908_v48, %v907_v41  ;;  %v946_v15 = vpack.c.b16 %v874_v37, %v873_v36  ;;  %v317_v48 = vpack.c.bf16 %v285_v16, %v285_v16 }
  0xac   : > { %1095 = vmatmul.bf16.gmra.mxu0 %v943_v21  ;;  %v345_v21 = vadd.f32 %v330_v45, %v329_v44  ;;  %1195 = vmatmul.bf16.gmra.mxu2 %v963_v50  ;;  %v565_v44 = vmax.f32 %v536_v61, -100.0  ;;  %v318_v50 = vpack.c.bf16 %v286_v11, %v286_v11 }
  0xae   : > { %v346_v6 = vadd.f32 %v345_v21, %v331_v13  ;;  %v581_v38 = vmul.f32 %v565_v44, %v501_v28  ;;  %v3414_v21 = vunpack.c.l.bf16 %v317_v48  ;;  %v3416_v51 = vunpack.c.l.bf16 %v318_v50  ;;  %v287_v13 = vld [vmem:[%s3242_s22 + $0x30] sm:$0xff] }
  0xaf   : > { %v319_v19 = vpack.c.bf16 %v287_v13, %v287_v13  ;;  %v291_v13 = vld [vmem:[%s3242_s22 + $0x50] sm:$0xff] }
  0xb0   : > { %v347_v39 = vadd.f32 %v346_v6, %v332_v14  ;;  %v597_v41 = vadd.f32 %v581_v38, %v485_v23  ;;  %v719_v31 = vmul.f32 %v3414_v21, %v3414_v21  ;;  %v720_v34 = vmul.f32 %v3416_v51, %v3416_v51  ;;  %v288_v14 = vld [vmem:[%s3242_s22 + $0x38] sm:$0xff] }
  0xb1   : > { %v3433_v23 = vunpack.c.l.bf16 %v319_v19  ;;  %v878_v38 = vunpack.c.l.b16 %v3394_v60 }
  0xb2   : > { %v613_v42 = vsub.f32 0.0, %v597_v41  ;;  %v736_v55 = vpack.c.bf16 %v720_v34, %v720_v34 }
  0xb4   : > { %v3412_v43 = vadd.f32 %v627_v49, %v613_v42  ;;  %v333_v49 = vmul.f32 %v285_v16, %v3289_v27  ;;  %v912_v62 = vunpack.c.l.b16 %v736_v55  ;;  %v320_v27 = vpack.c.bf16 %v288_v14, %v288_v14  ;;  %v290_v42 = vld [vmem:[%s3242_s22 + $0x48] sm:$0xff]  ;;  %v292_v14 = vld [vmem:[%s3242_s22 + $0x58] sm:$0xff] }
  0xb6   : > { %4389 = vst [vmem:[#allocation19_spill] sm:$0xff] %v3412_v43  ;;  %v3423_v58 = vadd.f32 %v347_v39, %v333_v49  ;;  %v3435_v28 = vunpack.c.l.bf16 %v320_v27 }
  0xb8   : > { %4390 = vst [vmem:[#allocation20_spill] sm:$0xff] %v3423_v58  ;;  %v722_v4 = vmul.f32 %v3435_v28, %v3435_v28 }
  0xba   : > { %v738_v6 = vpack.c.bf16 %v722_v4, %v722_v4  ;;  %v323_v4 = vpack.c.bf16 %v291_v13, %v291_v13 }
  0xbc   : > { %1100 = vmatmul.bf16.gmra.mxu0 %v944_v59  ;;  %v3392_v59 = vpack.c.bf16 %v283_v56, %v283_v56  ;;  %v394_v56 = vadd.f32 %v393_v7, %v285_v16  ;;  %v914_v36 = vunpack.c.l.b16 %v738_v6  ;;  %v3465_v6 = vunpack.c.l.bf16 %v323_v4 }
  0xbe   : > { %v3397_v0 = vunpack.c.l.bf16 %v3392_v59  ;;  %v3425_v61 = vadd.f32 %v394_v56, %v286_v11  ;;  %v877_v37 = vunpack.c.l.b16 %v3392_v59  ;;  %v322_v11 = vpack.c.bf16 %v290_v42, %v290_v42  ;;  %4393 = vst [vmem:[#allocation23_spill] sm:$0xff] %v3465_v6 }
  0xbf   : > { %v881_v42 = vunpack.c.l.b16 %v319_v19 }
  0xc0   : > { %v717_v5 = vmul.f32 %v3397_v0, %v3397_v0  ;;  %4391 = vst [vmem:[#allocation21_spill] sm:$0xff] %v3425_v61  ;;  %v3451_v34 = vunpack.c.l.bf16 %v322_v11 }
  0xc2   : > { %v733_v45 = vpack.c.bf16 %v717_v5, %v717_v5  ;;  %v875_v5 = vunpack.c.l.b16 %v3370_v63  ;;  %v721_v63 = vmul.f32 %v3433_v23, %v3433_v23  ;;  %4392 = vst [vmem:[#allocation22_spill] sm:$0xff] %v3451_v34  ;;  %v724_v60 = vmul.f32 %v3451_v34, %v3451_v34 }
  0xc4   : > { %v909_v30 = vunpack.c.l.b16 %v733_v45  ;;  %v947_v45 = vpack.c.b16 %v876_v10, %v875_v5  ;;  %v740_v55 = vpack.c.bf16 %v724_v60, %v724_v60  ;;  %v880_v5 = vunpack.c.l.b16 %v318_v50 }
  0xc6   : > { %v964_v40 = vpack.c.b16 %v910_v35, %v909_v30  ;;  %v737_v30 = vpack.c.bf16 %v721_v63, %v721_v63 }
  0xc8   : > { %1200 = vmatmul.bf16.gmra.mxu2 %v964_v40  ;;  %v913_v35 = vunpack.c.l.b16 %v737_v30  ;;  %v948_v40 = vpack.c.b16 %v878_v38, %v877_v37  ;;  %v324_v30 = vpack.c.bf16 %v292_v14, %v292_v14 }
  0xca   : > { %v966_v39 = vpack.c.b16 %v914_v36, %v913_v35  ;;  %v3467_v35 = vunpack.c.l.bf16 %v324_v30 }
  0xcc   : > { %1105 = vmatmul.bf16.gmra.mxu0 %v945_v54  ;;  %v735_v54 = vpack.c.bf16 %v719_v31, %v719_v31  ;;  %4394 = vst [vmem:[#allocation24_spill] sm:$0xff] %v3467_v35  ;;  %v726_v50 = vmul.f32 %v3467_v35, %v3467_v35 }
  0xce   : > { %v911_v57 = vunpack.c.l.b16 %v735_v54  ;;  %v742_v37 = vpack.c.bf16 %v726_v50, %v726_v50 }
  0xd0   : > { %v965_v44 = vpack.c.b16 %v912_v62, %v911_v57  ;;  %v916_v57 = vunpack.c.l.b16 %v740_v55  ;;  %v879_v62 = vunpack.c.l.b16 %v317_v48  ;;  %v725_v48 = vmul.f32 %v3465_v6, %v3465_v6 }
  0xd2   : > { %v741_v36 = vpack.c.bf16 %v725_v48, %v725_v48 }
  0xd8   : > { %1205 = vmatmul.bf16.gmra.mxu2 %v965_v44  ;;  %v949_v44 = vpack.c.b16 %v880_v5, %v879_v62 }
  0xdc   : > { %1110 = vmatmul.bf16.gmra.mxu0 %v946_v15  ;;  %v289_v15 = vld [vmem:[%s3242_s22 + $0x40] sm:$0xff] }
  0xdd   : > { %v321_v16 = vpack.c.bf16 %v289_v15, %v289_v15  ;;  %v918_v15 = vunpack.c.l.b16 %v742_v37 }
  0xdf   : > { %v3449_v31 = vunpack.c.l.bf16 %v321_v16 }
  0xe1   : > { %v723_v59 = vmul.f32 %v3449_v31, %v3449_v31 }
  0xe3   : > { %v739_v54 = vpack.c.bf16 %v723_v59, %v723_v59  ;;  %v882_v59 = vunpack.c.l.b16 %v320_v27 }
  0xe5   : > { %v915_v56 = vunpack.c.l.b16 %v739_v54  ;;  %v950_v54 = vpack.c.b16 %v882_v59, %v881_v42  ;;  %v884_v42 = vunpack.c.l.b16 %v322_v11 }
  0xe7   : > { %v967_v10 = vpack.c.b16 %v916_v57, %v915_v56  ;;  %v293_v56 = vld [vmem:[%s3242_s22 + $0x60] sm:$0xff]  ;;  %v294_v57 = vld [vmem:[%s3242_s22 + $0x68] sm:$0xff] }
  0xe8   : > { %1210 = vmatmul.bf16.gmra.mxu2 %v966_v39  ;;  %v325_v5 = vpack.c.bf16 %v293_v56, %v293_v56  ;;  %v295_v56 = vld [vmem:[%s3242_s22 + $0x70] sm:$0xff] }
  0xe9   : > { %v3429_v12 = vpop.f32.mrf.mxu0 }
  0xec   : > { %1115 = vmatmul.bf16.gmra.mxu0 %v947_v45 }
  0xef   : > { %v3463_v63 = vpop.f32.mrf.mxu2 }
  0xf1   : > { %v3441_v7 = vpop.f32.mrf.mxu0 }
  0xf7   : > { %v3475_v39 = vpop.f32.mrf.mxu2 }
  0xf8   : > { %1215 = vmatmul.bf16.gmra.mxu2 %v967_v10  ;;  %v326_v10 = vpack.c.bf16 %v294_v57, %v294_v57  ;;  %v296_v57 = vld [vmem:[%s3242_s22 + $0x78] sm:$0xff] }
  0xf9   : > { %v3445_v41 = vpop.f32.mrf.mxu0  ;;  %v328_v58 = vpack.c.bf16 %v296_v57, %v296_v57 }
  0xfa   : > { %v3485_v13 = vunpack.c.l.bf16 %v326_v10 }
  0xfc   : > { %1120 = vmatmul.bf16.gmra.mxu0 %v948_v40  ;;  %v917_v40 = vunpack.c.l.b16 %v741_v36  ;;  %4396 = vst [vmem:[#allocation26_spill] sm:$0xff] %v3485_v13  ;;  %v728_v27 = vmul.f32 %v3485_v13, %v3485_v13 }
  0xfe   : > { %v968_v60 = vpack.c.b16 %v918_v15, %v917_v40  ;;  %v744_v48 = vpack.c.bf16 %v728_v27, %v728_v27  ;;  %v883_v15 = vunpack.c.l.b16 %v321_v16  ;;  %v327_v27 = vpack.c.bf16 %v295_v56, %v295_v56 }
  0xff   : > { %v3481_v62 = vpop.f32.mrf.mxu2  ;;  %v885_v56 = vunpack.c.l.b16 %v323_v4 }
 0x100   : > { %v920_v40 = vunpack.c.l.b16 %v744_v48  ;;  %v3503_v61 = vunpack.c.l.bf16 %v327_v27 }
 0x101   : > { %v3457_v49 = vpop.f32.mrf.mxu0 }
 0x102   : > { %4397 = vst [vmem:[#allocation27_spill] sm:$0xff] %v3503_v61  ;;  %v729_v16 = vmul.f32 %v3503_v61, %v3503_v61  ;;  %v3535_v61 = vunpack.c.l.bf16 %v3264_v9 }
 0x104   : > { %v745_v48 = vpack.c.bf16 %v729_v16, %v729_v16 }
 0x107   : > { %v3493_v36 = vpop.f32.mrf.mxu2 }
 0x108   : > { %1220 = vmatmul.bf16.gmra.mxu2 %v968_v60  ;;  %v951_v60 = vpack.c.b16 %v884_v42, %v883_v15  ;;  %v921_v42 = vunpack.c.l.b16 %v745_v48  ;;  %v888_v48 = vunpack.c.l.b16 %v326_v10 }
 0x109   : > { %v3459_v45 = vpop.f32.mrf.mxu0 }
 0x10c   : > { %1125 = vmatmul.bf16.gmra.mxu0 %v949_v44  ;;  %v3483_v44 = vunpack.c.l.bf16 %v325_v5 }
 0x10e   : > { %4395 = vst [vmem:[#allocation25_spill] sm:$0xff] %v3483_v44  ;;  %v727_v19 = vmul.f32 %v3483_v44, %v3483_v44 }
 0x110   : > { %v743_v14 = vpack.c.bf16 %v727_v19, %v727_v19  ;;  %v3501_v19 = vpop.f32.mrf.mxu2 }
 0x111   : > { %v3473_v38 = vpop.f32.mrf.mxu0 }
 0x112   : > { %v919_v37 = vunpack.c.l.b16 %v743_v14  ;;  %v3505_v14 = vunpack.c.l.bf16 %v328_v58 }
 0x114   : > { %v969_v59 = vpack.c.b16 %v920_v40, %v919_v37  ;;  %4398 = vst [vmem:[#allocation28_spill] sm:$0xff] %v3505_v14  ;;  %v730_v11 = vmul.f32 %v3505_v14, %v3505_v14  ;;  %v887_v14 = vunpack.c.l.b16 %v325_v5 }
 0x116   : > { %v746_v37 = vpack.c.bf16 %v730_v11, %v730_v11 }
 0x118   : > { %1225 = vmatmul.bf16.gmra.mxu2 %v969_v59  ;;  %v3513_v15 = vpop.f32.mrf.mxu2  ;;  %v922_v59 = vunpack.c.l.b16 %v746_v37  ;;  %v953_v37 = vpack.c.b16 %v888_v48, %v887_v14  ;;  %v3551_v14 = vunpack.c.l.bf16 %v3280_v18 }
 0x119   : > { %v3477_v55 = vpop.f32.mrf.mxu0 }
 0x11a   : > { %v970_v57 = vpack.c.b16 %v922_v59, %v921_v42 }
 0x11c   : > { %1130 = vmatmul.bf16.gmra.mxu0 %v950_v54 }
 0x120   : > { %v3519_v24 = vpop.f32.mrf.mxu2 }
 0x121   : > { %v3491_v50 = vpop.f32.mrf.mxu0 }
 0x128   : > { %1230 = vmatmul.bf16.gmra.mxu2 %v970_v57  ;;  %v3523_v11 = vpop.f32.mrf.mxu2  ;;  %v890_v57 = vunpack.c.l.b16 %v328_v58 }
 0x129   : > { %v3495_v54 = vpop.f32.mrf.mxu0 }
 0x12c   : > { %1135 = vmatmul.bf16.gmra.mxu0 %v951_v60  ;;  %v886_v60 = vunpack.c.l.b16 %v324_v30 }
 0x12e   : > { %v952_v43 = vpack.c.b16 %v886_v60, %v885_v56  ;;  %v889_v60 = vunpack.c.l.b16 %v327_v27  ;;  %v668_v27 = vmul.f32 %v3535_v61, %v3535_v61 }
 0x130   : > { %v1196_v42 = vpop.f32.mrf.mxu2  ;;  %v954_v5 = vpack.c.b16 %v890_v57, %v889_v60  ;;  %v3548_v57 = vunpack.c.l.bf16 %v3276_v17 }
 0x131   : > { %v3511_v40 = vpop.f32.mrf.mxu0 }
 0x138   : > { %v1198_v56 = vpop.f32.mrf.mxu2 }
 0x139   : > { %v3515_v25 = vpop.f32.mrf.mxu0 }
 0x13c   : > { %1140 = vmatmul.bf16.gmra.mxu0 %v952_v43  ;;  %v3532_v43 = vunpack.c.l.bf16 %v3260_v8  ;;  %v684_v8 = vpack.c.bf16 %v668_v27, %v668_v27  ;;  %v670_v27 = vmul.f32 %v3551_v14, %v3551_v14 }
 0x13e   : > { %v667_v48 = vmul.f32 %v3532_v43, %v3532_v43  ;;  %v892_v13 = vunpack.c.l.b16 %v684_v8  ;;  %v686_v8 = vpack.c.bf16 %v670_v27, %v670_v27 }
 0x140   : > { %v894_v18 = vunpack.c.l.b16 %v686_v8 }
 0x141   : > { %v3521_v16 = vpop.f32.mrf.mxu0 }
 0x149   : > { %v3525_v4 = vpop.f32.mrf.mxu0 }
 0x14b   : > { %v1201_v58 = vpop.f32.mrf.mxu2 }
 0x14c   : > { %1145 = vmatmul.bf16.gmra.mxu0 %v953_v37  ;;  %v683_v37 = vpack.c.bf16 %v667_v48, %v667_v48  ;;  %v669_v48 = vmul.f32 %v3548_v57, %v3548_v57 }
 0x14e   : > { %v891_v9 = vunpack.c.l.b16 %v683_v37  ;;  %v685_v37 = vpack.c.bf16 %v669_v48, %v669_v48 }
 0x150   : > { %v893_v47 = vunpack.c.l.b16 %v685_v37 }
 0x151   : > { %v3529_v59 = vpop.f32.mrf.mxu0 }
 0x153   : > { %v1203_v60 = vpop.f32.mrf.mxu2 }
 0x159   : > { %v3537_v10 = vpop.f32.mrf.mxu0 }
 0x15b   : > { %v1206_v35 = vpop.f32.mrf.mxu2 }
 0x15c   : > { %1150 = vmatmul.bf16.gmra.mxu0 %v954_v5  ;;  %v955_v5 = vpack.c.b16 %v892_v13, %v891_v9  ;;  %v3558_v13 = vunpack.c.l.bf16 %v3300_v32 }
 0x15e   : > { %v671_v48 = vmul.f32 %v3558_v13, %v3558_v13 }
 0x161   : > { %v3545_v30 = vpop.f32.mrf.mxu0 }
 0x169   : > { %v1116_v3 = vpop.f32.mrf.mxu0 }
 0x16a   : > { %v2684_v44 = vpack.i.bf16 %v1116_v3, %v1196_v42  ;;  %v3561_v3 = vunpack.c.l.bf16 %v3302_v33 }
 0x16c   : > { %1155 = vmatmul.bf16.gmra.mxu0 %v955_v5  ;;  %2685 = vxpose.xlu1.b32.start [1/16] %v2684_v44, 128  ;;  %v956_v44 = vpack.c.b16 %v894_v18, %v893_v47  ;;  %v1208_v5 = vpop.f32.mrf.mxu2  ;;  %v3568_v47 = vunpack.c.l.bf16 %v3324_v52 }
 0x171   : > { %v1118_v2 = vpop.f32.mrf.mxu0 }
 0x172   : > { %v2686_v17 = vpack.i.bf16 %v1118_v2, %v1198_v56  ;;  %v672_v2 = vmul.f32 %v3561_v3, %v3561_v3  ;;  %v687_v56 = vpack.c.bf16 %v671_v48, %v671_v48 }
 0x174   : > { %2687 = vxpose.xlu1.b32.cont [2/16] %v2686_v17, 128  ;;  %v688_v27 = vpack.c.bf16 %v672_v2, %v672_v2  ;;  %v895_v8 = vunpack.c.l.b16 %v687_v56  ;;  %v1211_v17 = vpop.f32.mrf.mxu2 }
 0x176   : > { %v896_v33 = vunpack.c.l.b16 %v688_v27 }
 0x178   : > { %v957_v18 = vpack.c.b16 %v896_v33, %v895_v8 }
 0x179   : > { %v1121_v42 = vpop.f32.mrf.mxu0 }
 0x17a   : > { %v2688_v9 = vpack.i.bf16 %v1121_v42, %v1201_v58  ;;  %v3571_v58 = vunpack.c.l.bf16 %v3326_v53 }
 0x17c   : > { %1160 = vmatmul.bf16.gmra.mxu0 %v956_v44  ;;  %2689 = vxpose.xlu1.b32.cont [3/16] %v2688_v9, 128  ;;  %v673_v9 = vmul.f32 %v3568_v47, %v3568_v47  ;;  %v1213_v48 = vpop.f32.mrf.mxu2 }
 0x17e   : > { %v689_v2 = vpack.c.bf16 %v673_v9, %v673_v9 }
 0x181   : > { %v1123_v37 = vpop.f32.mrf.mxu0 }
 0x182   : > { %v2690_v32 = vpack.i.bf16 %v1123_v37, %v1203_v60  ;;  %v674_v60 = vmul.f32 %v3571_v58, %v3571_v58  ;;  %v897_v37 = vunpack.c.l.b16 %v689_v2 }
 0x184   : > { %2691 = vxpose.xlu1.b32.cont [4/16] %v2690_v32, 128  ;;  %v690_v56 = vpack.c.bf16 %v674_v60, %v674_v60  ;;  %v1216_v33 = vpop.f32.mrf.mxu2 }
 0x186   : > { %v898_v53 = vunpack.c.l.b16 %v690_v56 }
 0x188   : > { %v958_v32 = vpack.c.b16 %v898_v53, %v897_v37 }
 0x189   : > { %v1126_v44 = vpop.f32.mrf.mxu0 }
 0x18a   : > { %v2692_v42 = vpack.i.bf16 %v1126_v44, %v1206_v35 }
 0x18c   : > { %1165 = vmatmul.bf16.gmra.mxu0 %v957_v18  ;;  %2693 = vxpose.xlu1.b32.cont [5/16] %v2692_v42, 128  ;;  %v1218_v42 = vpop.f32.mrf.mxu2 }
 0x191   : > { %v1128_v27 = vpop.f32.mrf.mxu0 }
 0x192   : > { %v2694_v52 = vpack.i.bf16 %v1128_v27, %v1208_v5 }
 0x194   : > { %2695 = vxpose.xlu1.b32.cont [6/16] %v2694_v52, 128  ;;  %v1221_v9 = vpop.f32.mrf.mxu2 }
 0x199   : > { %v1131_v8 = vpop.f32.mrf.mxu0 }
 0x19a   : > { %v2696_v35 = vpack.i.bf16 %v1131_v8, %v1211_v17 }
 0x19c   : > { %1170 = vmatmul.bf16.gmra.mxu0 %v958_v32  ;;  %2697 = vxpose.xlu1.b32.cont [7/16] %v2696_v35, 128  ;;  %v1223_v5 = vpop.f32.mrf.mxu2 }
 0x1a1   : > { %v1133_v18 = vpop.f32.mrf.mxu0 }
 0x1a2   : > { %v2698_v44 = vpack.i.bf16 %v1133_v18, %v1213_v48 }
 0x1a4   : > { %2699 = vxpose.xlu1.b32.cont [8/16] %v2698_v44, 128  ;;  %v1226_v52 = vpop.f32.mrf.mxu2 }
 0x1a9   : > { %v1136_v6 = vpop.f32.mrf.mxu0 }
 0x1aa   : > { %v2700_v46 = vpack.i.bf16 %v1136_v6, %v1216_v33 }
 0x1ac   : > { %2701 = vxpose.xlu1.b32.cont [9/16] %v2700_v46, 128  ;;  %v1228_v48 = vpop.f32.mrf.mxu2 }
 0x1b1   : > { %v1138_v60 = vpop.f32.mrf.mxu0 }
 0x1b2   : > { %v2702_v34 = vpack.i.bf16 %v1138_v60, %v1218_v42 }
 0x1b4   : > { %2703 = vxpose.xlu1.b32.cont [10/16] %v2702_v34, 128  ;;  %v1231_v46 = vpop.f32.mrf.mxu2 }
 0x1b9   : > { %v1141_v2 = vpop.f32.mrf.mxu0 }
 0x1ba   : > { %v2704_v56 = vpack.i.bf16 %v1141_v2, %v1221_v9 }
 0x1bc   : > { %2705 = vxpose.xlu1.b32.cont [11/16] %v2704_v56, 128  ;;  %v1233_v34 = vpop.f32.mrf.mxu2 }
 0x1c1   : > { %v1143_v27 = vpop.f32.mrf.mxu0 }
 0x1c2   : > { %v2706_v17 = vpack.i.bf16 %v1143_v27, %v1223_v5 }
 0x1c4   : > { %2707 = vxpose.xlu1.b32.cont [12/16] %v2706_v17, 128 }
 0x1c9   : > { %v1146_v37 = vpop.f32.mrf.mxu0 }
 0x1ca   : > { %v2708_v53 = vpack.i.bf16 %v1146_v37, %v1226_v52 }
 0x1cc   : > { %2709 = vxpose.xlu1.b32.cont [13/16] %v2708_v53, 128 }
 0x1d1   : > { %v1148_v32 = vpop.f32.mrf.mxu0 }
 0x1d2   : > { %v2710_v8 = vpack.i.bf16 %v1148_v32, %v1228_v48  ;;  %v748_v32 = vmul.f32 %v3380_v22, %v3535_v61  ;;  %v2598_v22 = vpack.i.bf16 %v3529_v59, %v3513_v15  ;;  %v2602_v15 = vpack.i.bf16 %v3545_v30, %v3523_v11  ;;  %v4403_v30 = vld [vmem:[#allocation22_spill] sm:$0xff] }
 0x1d3   : > { %v755_v11 = vmul.f32 %v3449_v31, %v3286_v26 }
 0x1d4   : > { %2711 = vxpose.xlu1.b32.cont [14/16] %v2710_v8, 128 }
 0x1d9   : > { %v1151_v6 = vpop.f32.mrf.mxu0 }
 0x1da   : > { %v2712_v33 = vpack.i.bf16 %v1151_v6, %v1231_v46 }
 0x1dc   : > { %2713 = vxpose.xlu1.b32.cont [15/16] %v2712_v33, 128 }
 0x1e1   : > { %v1153_v35 = vpop.f32.mrf.mxu0 }
 0x1e2   : > { %v2714_v18 = vpack.i.bf16 %v1153_v35, %v1233_v34  ;;  %v756_v34 = vmul.f32 %v4403_v30, %v3292_v29  ;;  %v771_v35 = vpack.c.bf16 %v755_v11, %v755_v11  ;;  %v4412_v30 = vld [vmem:[#allocation17_spill] sm:$0xff] }
 0x1e4   : > { %2715 = vxpose.xlu1.b32.end [16/16] %v2714_v18, 128  ;;  %v772_v18 = vpack.c.bf16 %v756_v34, %v756_v34  ;;  %v4413_v34 = vld [vmem:[#allocation27_spill] sm:$0xff] }
 0x1e9   : > { %v1156_v44 = vpop.f32.mrf.mxu0 }
 0x1ea   : > { %v2572_v42 = vpack.i.bf16 %v3429_v12, %v1156_v44  ;;  %v931_v44 = vunpack.c.l.b16 %v771_v35  ;;  %v761_v35 = vmul.f32 %v4413_v34, %v4412_v30 }
 0x1ec   : > { %2573 = vxpose.xlu0.b32.start [1/16] %v2572_v42, 128  ;;  %v932_v42 = vunpack.c.l.b16 %v772_v18  ;;  %v4414_v18 = vld [vmem:[#allocation18_spill] sm:$0xff] }
 0x1f1   : > { %v1158_v9 = vpop.f32.mrf.mxu0 }
 0x1f2   : > { %v2574_v60 = vpack.i.bf16 %v3441_v7, %v1158_v9  ;;  %v4404_v9 = vld [vmem:[#allocation13_spill] sm:$0xff] }
 0x1f4   : > { %2575 = vxpose.xlu0.b32.cont [2/16] %v2574_v60, 128  ;;  %v4405_v60 = vld [vmem:[#allocation23_spill] sm:$0xff] }
 0x1f9   : > { %v1161_v5 = vpop.f32.mrf.mxu0 }
 0x1fa   : > { %v2576_v2 = vpack.i.bf16 %v3445_v41, %v1161_v5  ;;  %v757_v5 = vmul.f32 %v4405_v60, %v4404_v9 }
 0x1fc   : > { %2577 = vxpose.xlu0.b32.cont [3/16] %v2576_v2, 128  ;;  %v4406_v2 = vld [vmem:[#allocation14_spill] sm:$0xff] }
 0x201   : > { %v1163_v56 = vpop.f32.mrf.mxu0 }
 0x202   : > { %v2578_v27 = vpack.i.bf16 %v3457_v49, %v1163_v56  ;;  %v4399_v49 = vpack.i.bf16 %v3495_v54, %v3463_v63  ;;  %v764_v54 = vpack.c.bf16 %v748_v32, %v748_v32  ;;  %v4407_v56 = vld [vmem:[#allocation24_spill] sm:$0xff] }
 0x204   : > { %2579 = vxpose.xlu0.b32.cont [4/16] %v2578_v27, 128  ;;  %v924_v46 = vunpack.c.l.b16 %v764_v54  ;;  %v758_v27 = vmul.f32 %v4407_v56, %v4406_v2 }
 0x206   : > { %v774_v26 = vpack.c.bf16 %v758_v27, %v758_v27 }
 0x209   : > { %v1166_v52 = vpop.f32.mrf.mxu0 }
 0x20a   : > { %v2580_v17 = vpack.i.bf16 %v3459_v45, %v1166_v52  ;;  %v2590_v45 = vpack.i.bf16 %v3511_v40, %v3475_v39  ;;  %v4401_v40 = vpack.i.bf16 %v3525_v4, %v3501_v19  ;;  %v4402_v19 = vpack.i.bf16 %v3537_v10, %v3519_v24 }
 0x20b   : > { %v753_v24 = vmul.f32 %v3433_v23, %v3568_v47  ;;  %v754_v10 = vmul.f32 %v3435_v28, %v3571_v58  ;;  %v975_v23 = vpack.c.b16 %v932_v42, %v931_v44  ;;  %v773_v52 = vpack.c.bf16 %v757_v5, %v757_v5  ;;  %v4415_v44 = vld [vmem:[#allocation28_spill] sm:$0xff] }
 0x20c   : > { %2581 = vxpose.xlu0.b32.cont [5/16] %v2580_v17, 128  ;;  %v762_v42 = vmul.f32 %v4415_v44, %v4414_v18 }
 0x211   : > { %v1168_v37 = vpop.f32.mrf.mxu0 }
 0x212   : > { %v2582_v12 = vpack.i.bf16 %v3473_v38, %v1168_v37  ;;  %v4400_v38 = vpack.i.bf16 %v3515_v25, %v3481_v62  ;;  %v749_v25 = vmul.f32 %v3397_v0, %v3548_v57  ;;  %v750_v62 = vmul.f32 %v3400_v1, %v3551_v14 }
 0x213   : > { %v751_v0 = vmul.f32 %v3414_v21, %v3558_v13  ;;  %v752_v1 = vmul.f32 %v3416_v51, %v3561_v3  ;;  %v769_v21 = vpack.c.bf16 %v753_v24, %v753_v24  ;;  %v770_v13 = vpack.c.bf16 %v754_v10, %v754_v10 }
 0x214   : > { %2583 = vxpose.xlu0.b32.cont [6/16] %v2582_v12, 128 }
 0x215   : > { %v767_v4 = vpack.c.bf16 %v751_v0, %v751_v0  ;;  %v768_v14 = vpack.c.bf16 %v752_v1, %v752_v1  ;;  %v929_v33 = vunpack.c.l.b16 %v769_v21  ;;  %v930_v51 = vunpack.c.l.b16 %v770_v13 }
 0x217   : > { %v927_v59 = vunpack.c.l.b16 %v767_v4  ;;  %v928_v57 = vunpack.c.l.b16 %v768_v14  ;;  %v974_v3 = vpack.c.b16 %v930_v51, %v929_v33 }
 0x219   : > { %v1171_v53 = vpop.f32.mrf.mxu0  ;;  %v973_v6 = vpack.c.b16 %v928_v57, %v927_v59 }
 0x21a   : > { %v2584_v7 = vpack.i.bf16 %v3477_v55, %v1171_v53  ;;  %v2594_v55 = vpack.i.bf16 %v3521_v16, %v3493_v36  ;;  %v766_v36 = vpack.c.bf16 %v750_v62, %v750_v62  ;;  %v933_v53 = vunpack.c.l.b16 %v773_v52  ;;  %v4410_v62 = vld [vmem:[#allocation16_spill] sm:$0xff] }
 0x21c   : > { %2585 = vxpose.xlu0.b32.cont [7/16] %v2584_v7, 128  ;;  %v926_v16 = vunpack.c.l.b16 %v766_v36  ;;  %v934_v7 = vunpack.c.l.b16 %v774_v26 }
 0x221   : > { %v1173_v48 = vpop.f32.mrf.mxu0 }
 0x222   : > { %v2586_v41 = vpack.i.bf16 %v3491_v50, %v1173_v48  ;;  %v747_v50 = vmul.f32 %v3377_v20, %v3532_v43  ;;  %v765_v20 = vpack.c.bf16 %v749_v25, %v749_v25 }
 0x224   : > { %2587 = vxpose.xlu0.b32.cont [8/16] %v2586_v41, 128  ;;  %v763_v63 = vpack.c.bf16 %v747_v50, %v747_v50  ;;  %v925_v61 = vunpack.c.l.b16 %v765_v20  ;;  %v4411_v20 = vld [vmem:[#allocation26_spill] sm:$0xff] }
 0x225   : > { %v760_v36 = vmul.f32 %v4411_v20, %v4410_v62 }
 0x226   : > { %v923_v8 = vunpack.c.l.b16 %v763_v63  ;;  %v972_v43 = vpack.c.b16 %v926_v16, %v925_v61 }
 0x227   : > { %v776_v61 = vpack.c.bf16 %v760_v36, %v760_v36 }
 0x228   : > { %v971_v39 = vpack.c.b16 %v924_v46, %v923_v8 }
 0x229   : > { %v936_v14 = vunpack.c.l.b16 %v776_v61 }
 0x22a   : > { %1235 = vmatmul.bf16.gmra.mxu2 %v971_v39  ;;  %v4408_v39 = vld [vmem:[#allocation15_spill] sm:$0xff] }
 0x22c   : > { %2589 = vxpose.xlu0.b32.cont [9/16] %v4399_v49, 128  ;;  %v976_v49 = vpack.c.b16 %v934_v7, %v933_v53 }
 0x234   : > { %2591 = vxpose.xlu0.b32.cont [10/16] %v2590_v45, 128 }
 0x23a   : > { %1240 = vmatmul.bf16.gmra.mxu2 %v972_v43 }
 0x23c   : > { %2593 = vxpose.xlu0.b32.cont [11/16] %v4400_v38, 128 }
 0x244   : > { %2595 = vxpose.xlu0.b32.cont [12/16] %v2594_v55, 128 }
 0x24a   : > { %1245 = vmatmul.bf16.gmra.mxu2 %v973_v6 }
 0x24c   : > { %2597 = vxpose.xlu0.b32.cont [13/16] %v4401_v40, 128  ;;  %v4409_v40 = vld [vmem:[#allocation25_spill] sm:$0xff] }
 0x24d   : > { %v759_v25 = vmul.f32 %v4409_v40, %v4408_v39 }
 0x254   : > { %2599 = vxpose.xlu0.b32.cont [14/16] %v2598_v22, 128  ;;  %v775_v22 = vpack.c.bf16 %v759_v25, %v759_v25 }
 0x256   : > { %v935_v4 = vunpack.c.l.b16 %v775_v22 }
 0x258   : > { %v977_v57 = vpack.c.b16 %v936_v14, %v935_v4 }
 0x25a   : > { %1250 = vmatmul.bf16.gmra.mxu2 %v974_v3 }
 0x25c   : > { %2601 = vxpose.xlu0.b32.cont [15/16] %v4402_v19, 128 }
 0x264   : > { %2603 = vxpose.xlu0.b32.end [16/16] %v2602_v15, 128 }
 0x26a   : > { %1255 = vmatmul.bf16.gmra.mxu2 %v975_v23  ;;  %v777_v23 = vpack.c.bf16 %v761_v35, %v761_v35 }
 0x26c   : > { %v937_v2 = vunpack.c.l.b16 %v777_v23 }
 0x27a   : > { %1260 = vmatmul.bf16.gmra.mxu2 %v976_v49 }
 0x28a   : > { %1265 = vmatmul.bf16.gmra.mxu2 %v977_v57 }
 0x290   : > { %v2604_v47 = vpop.trf.xlu0 }
 0x291   : > { %v2605_v28 = vunpack.i.l.bf16 %v2604_v47  ;;  %v2608_v58 = vunpack.i.h.bf16 %v2604_v47  ;;  %v778_v47 = vpack.c.bf16 %v762_v42, %v762_v42 }
 0x293   : > { %v1468_v31 = vpack.c.bf16 %v2605_v28, %v2605_v28  ;;  %v1436_v29 = vpack.c.bf16 %v2608_v58, %v2608_v58  ;;  %v938_v56 = vunpack.c.l.b16 %v778_v47 }
 0x295   : > { %v1596_v38 = vunpack.c.l.b16 %v1436_v29  ;;  %v1628_v55 = vunpack.c.l.b16 %v1468_v31  ;;  %v978_v26 = vpack.c.b16 %v938_v56, %v937_v2 }
 0x298   : > { %v2609_v17 = vpop.trf.xlu0 }
 0x299   : > { %v2610_v37 = vunpack.i.l.bf16 %v2609_v17  ;;  %v2613_v12 = vunpack.i.h.bf16 %v2609_v17 }
 0x29a   : > { %1270 = vmatmul.bf16.gmra.mxu2 %v978_v26 }
 0x29b   : > { %v1469_v48 = vpack.c.bf16 %v2610_v37, %v2610_v37  ;;  %v1437_v41 = vpack.c.bf16 %v2613_v12, %v2613_v12 }
 0x29d   : > { %v1597_v45 = vunpack.c.l.b16 %v1437_v41  ;;  %v1629_v50 = vunpack.c.l.b16 %v1469_v48 }
 0x29f   : > { %v1676_v32 = vpack.c.b16 %v1597_v45, %v1596_v38  ;;  %v3629_v63 = vpack.c.b16 %v1629_v50, %v1628_v55 }
 0x2a0   : > { %v2614_v54 = vpop.trf.xlu0 }
 0x2a1   : > { %1764 = vmatmul.bf16.vlgmr.msra.gmra.mxu1 %v1676_v32  ;;  %v2615_v8 = vunpack.i.l.bf16 %v2614_v54  ;;  %v2618_v46 = vunpack.i.h.bf16 %v2614_v54 }
 0x2a3   : > { %v1470_v16 = vpack.c.bf16 %v2615_v8, %v2615_v8  ;;  %v1438_v19 = vpack.c.bf16 %v2618_v46, %v2618_v46 }
 0x2a5   : > { %v1598_v24 = vunpack.c.l.b16 %v1438_v19  ;;  %v1630_v10 = vunpack.c.l.b16 %v1470_v16 }
 0x2a8   : > { %v2619_v43 = vpop.trf.xlu0 }
 0x2a9   : > { %v2620_v0 = vunpack.i.l.bf16 %v2619_v43  ;;  %v2623_v1 = vunpack.i.h.bf16 %v2619_v43 }
 0x2ab   : > { %v1471_v15 = vpack.c.bf16 %v2620_v0, %v2620_v0  ;;  %v1439_v59 = vpack.c.bf16 %v2623_v1, %v2623_v1 }
 0x2ad   : > { %v1599_v6 = vunpack.c.l.b16 %v1439_v59  ;;  %v1631_v21 = vunpack.c.l.b16 %v1471_v15  ;;  %v1236_v62 = vpop.f32.mrf.mxu2 }
 0x2ae   : > { %1404 = vxpose.xlu2.b32.start [1/16] %v1236_v62, 128 }
 0x2af   : > { %v1677_v13 = vpack.c.b16 %v1599_v6, %v1598_v24  ;;  %v3635_v33 = vpack.c.b16 %v1631_v21, %v1630_v10 }
 0x2b0   : > { %v2624_v51 = vpop.trf.xlu0 }
 0x2b1   : > { %1769 = vmatmul.bf16.gmra.mxu1 %v1677_v13  ;;  %v2625_v3 = vunpack.i.l.bf16 %v2624_v51  ;;  %v2628_v11 = vunpack.i.h.bf16 %v2624_v51 }
 0x2b3   : > { %v1472_v28 = vpack.c.bf16 %v2625_v3, %v2625_v3  ;;  %v1440_v9 = vpack.c.bf16 %v2628_v11, %v2628_v11  ;;  %v3645_v3 = vpop.trf.xlu1 }
 0x2b5   : > { %v1600_v17 = vunpack.c.l.b16 %v1440_v9  ;;  %v1632_v29 = vunpack.c.l.b16 %v1472_v28  ;;  %v1238_v16 = vpop.f32.mrf.mxu2 }
 0x2b6   : > { %1405 = vxpose.xlu2.b32.cont [2/16] %v1238_v16, 128 }
 0x2b8   : > { %v2629_v58 = vpop.trf.xlu0 }
 0x2b9   : > { %v2630_v60 = vunpack.i.l.bf16 %v2629_v58  ;;  %v2633_v5 = vunpack.i.h.bf16 %v2629_v58 }
 0x2bb   : > { %v1473_v27 = vpack.c.bf16 %v2630_v60, %v2630_v60  ;;  %v1441_v52 = vpack.c.bf16 %v2633_v5, %v2633_v5  ;;  %v3647_v47 = vpop.trf.xlu1 }
 0x2bd   : > { %v1601_v31 = vunpack.c.l.b16 %v1441_v52  ;;  %v1633_v37 = vunpack.c.l.b16 %v1473_v27  ;;  %v1241_v13 = vpop.f32.mrf.mxu2 }
 0x2be   : > { %1406 = vxpose.xlu2.b32.cont [3/16] %v1241_v13, 128 }
 0x2bf   : > { %v1678_v12 = vpack.c.b16 %v1601_v31, %v1600_v17  ;;  %v3641_v53 = vpack.c.b16 %v1633_v37, %v1632_v29 }
 0x2c0   : > { %v2634_v7 = vpop.trf.xlu0 }
 0x2c1   : > { %1774 = vmatmul.bf16.gmra.mxu1 %v1678_v12  ;;  %v2635_v48 = vunpack.i.l.bf16 %v2634_v7  ;;  %v2638_v41 = vunpack.i.h.bf16 %v2634_v7 }
 0x2c3   : > { %v1474_v49 = vpack.c.bf16 %v2635_v48, %v2635_v48  ;;  %v1442_v38 = vpack.c.bf16 %v2638_v41, %v2638_v41  ;;  %v3649_v31 = vpop.trf.xlu1 }
 0x2c5   : > { %v1602_v46 = vunpack.c.l.b16 %v1442_v38  ;;  %v1634_v39 = vunpack.c.l.b16 %v1474_v49  ;;  %v1243_v34 = vpop.f32.mrf.mxu2 }
 0x2c6   : > { %1407 = vxpose.xlu2.b32.cont [4/16] %v1243_v34, 128  ;;  %v2717_v34 = vunpack.i.l.bf16 %v3645_v3 }
 0x2c8   : > { %v2639_v45 = vpop.trf.xlu0 }
 0x2c9   : > { %v2640_v55 = vunpack.i.l.bf16 %v2639_v45  ;;  %v2643_v50 = vunpack.i.h.bf16 %v2639_v45 }
 0x2cb   : > { %v1475_v32 = vpack.c.bf16 %v2640_v55, %v2640_v55  ;;  %v1443_v54 = vpack.c.bf16 %v2643_v50, %v2643_v50 }
 0x2cd   : > { %v1603_v8 = vunpack.c.l.b16 %v1443_v54  ;;  %v1635_v40 = vunpack.c.l.b16 %v1475_v32  ;;  %v1246_v52 = vpop.f32.mrf.mxu2 }
 0x2ce   : > { %1408 = vxpose.xlu2.b32.cont [5/16] %v1246_v52, 128 }
 0x2cf   : > { %v1679_v25 = vpack.c.b16 %v1603_v8, %v1602_v46  ;;  %v3643_v20 = vpack.c.b16 %v1635_v40, %v1634_v39  ;;  %v2731_v39 = vpop.trf.xlu1 }
 0x2d0   : > { %v2644_v36 = vpop.trf.xlu0 }
 0x2d1   : > { %1779 = vmatmul.bf16.gmra.mxu1 %v1679_v25  ;;  %v2648_v22 = vunpack.i.h.bf16 %v2644_v36  ;;  %v2645_v61 = vunpack.i.l.bf16 %v2644_v36 }
 0x2d3   : > { %v1444_v19 = vpack.c.bf16 %v2648_v22, %v2648_v22  ;;  %v1476_v0 = vpack.c.bf16 %v2645_v61, %v2645_v61 }
 0x2d5   : > { %v1604_v57 = vunpack.c.l.b16 %v1444_v19  ;;  %v1636_v24 = vunpack.c.l.b16 %v1476_v0  ;;  %v1248_v37 = vpop.f32.mrf.mxu2 }
 0x2d6   : > { %1409 = vxpose.xlu2.b32.cont [6/16] %v1248_v37, 128 }
 0x2d7   : > { %v3651_v22 = vpop.trf.xlu1 }
 0x2d8   : > { %v2649_v43 = vpop.trf.xlu0 }
 0x2d9   : > { %v2653_v1 = vunpack.i.h.bf16 %v2649_v43  ;;  %v2650_v4 = vunpack.i.l.bf16 %v2649_v43 }
 0x2db   : > { %v1445_v14 = vpack.c.bf16 %v2653_v1, %v2653_v1  ;;  %v1477_v15 = vpack.c.bf16 %v2650_v4, %v2650_v4 }
 0x2dd   : > { %v1605_v59 = vunpack.c.l.b16 %v1445_v14  ;;  %v1637_v6 = vunpack.c.l.b16 %v1477_v15  ;;  %v1251_v25 = vpop.f32.mrf.mxu2 }
 0x2de   : > { %1410 = vxpose.xlu2.b32.cont [7/16] %v1251_v25, 128  ;;  %v2740_v25 = vunpack.i.h.bf16 %v3651_v22 }
 0x2df   : > { %v1680_v10 = vpack.c.b16 %v1605_v59, %v1604_v57  ;;  %v1696_v21 = vpack.c.b16 %v1637_v6, %v1636_v24 }
 0x2e0   : > { %v2654_v51 = vpop.trf.xlu0 }
 0x2e1   : > { %1784 = vmatmul.bf16.gmra.mxu1 %v1680_v10  ;;  %1864 = vmatmul.bf16.vlgmr.msra.gmra.mxu3 %v1696_v21  ;;  %v2658_v11 = vunpack.i.h.bf16 %v2654_v51  ;;  %v2655_v30 = vunpack.i.l.bf16 %v2654_v51  ;;  %v2741_v21 = vpop.trf.xlu1  ;;  %v2725_v51 = vunpack.i.h.bf16 %v3647_v47 }
 0x2e3   : > { %v1446_v18 = vpack.c.bf16 %v2658_v11, %v2658_v11  ;;  %v1478_v44 = vpack.c.bf16 %v2655_v30, %v2655_v30  ;;  %v2720_v11 = vunpack.i.h.bf16 %v3645_v3  ;;  %v2722_v30 = vunpack.i.l.bf16 %v3647_v47 }
 0x2e4   : > { %v2735_v47 = vunpack.i.h.bf16 %v2731_v39 }
 0x2e5   : > { %v1606_v60 = vunpack.c.l.b16 %v1446_v18  ;;  %v1638_v2 = vunpack.c.l.b16 %v1478_v44  ;;  %v1253_v19 = vpop.f32.mrf.mxu2  ;;  %v1452_v18 = vpack.c.bf16 %v2720_v11, %v2720_v11  ;;  %v1485_v44 = vpack.c.bf16 %v2722_v30, %v2722_v30 }
 0x2e6   : > { %1411 = vxpose.xlu2.b32.cont [8/16] %v1253_v19, 128 }
 0x2e8   : > { %v2659_v35 = vpop.trf.xlu0 }
 0x2e9   : > { %v2663_v42 = vunpack.i.h.bf16 %v2659_v35  ;;  %v2660_v23 = vunpack.i.l.bf16 %v2659_v35  ;;  %v1453_v35 = vpack.c.bf16 %v2725_v51, %v2725_v51 }
 0x2eb   : > { %v1447_v28 = vpack.c.bf16 %v2663_v42, %v2663_v42  ;;  %v1479_v58 = vpack.c.bf16 %v2660_v23, %v2660_v23  ;;  %v1484_v42 = vpack.c.bf16 %v2717_v34, %v2717_v34  ;;  %v3657_v23 = vpop.trf.xlu1 }
 0x2ec   : > { %v2750_v51 = vunpack.i.h.bf16 %v3657_v23  ;;  %v2747_v30 = vunpack.i.l.bf16 %v3657_v23 }
 0x2ed   : > { %v1607_v9 = vunpack.c.l.b16 %v1447_v28  ;;  %v1639_v5 = vunpack.c.l.b16 %v1479_v58  ;;  %v1256_v13 = vpop.f32.mrf.mxu2  ;;  %v1613_v58 = vunpack.c.l.b16 %v1453_v35 }
 0x2ee   : > { %1412 = vxpose.xlu2.b32.cont [9/16] %v1256_v13, 128 }
 0x2ef   : > { %v1681_v56 = vpack.c.b16 %v1607_v9, %v1606_v60  ;;  %v1697_v27 = vpack.c.b16 %v1639_v5, %v1638_v2  ;;  %v1612_v9 = vunpack.c.l.b16 %v1452_v18  ;;  %v1645_v60 = vunpack.c.l.b16 %v1485_v44 }
 0x2f0   : > { %v2664_v26 = vpop.trf.xlu0  ;;  %v1644_v5 = vunpack.c.l.b16 %v1484_v42  ;;  %v1458_v18 = vpack.c.bf16 %v2750_v51, %v2750_v51  ;;  %v1490_v42 = vpack.c.bf16 %v2747_v30, %v2747_v30 }
 0x2f1   : > { %1789 = vmatmul.bf16.gmra.mxu1 %v1681_v56  ;;  %1869 = vmatmul.bf16.gmra.mxu3 %v1697_v27  ;;  %v2668_v17 = vunpack.i.h.bf16 %v2664_v26  ;;  %v2665_v29 = vunpack.i.l.bf16 %v2664_v26  ;;  %v1684_v56 = vpack.c.b16 %v1613_v58, %v1612_v9  ;;  %v2730_v26 = vunpack.i.h.bf16 %v3649_v31 }
 0x2f2   : > { %v1700_v27 = vpack.c.b16 %v1645_v60, %v1644_v5  ;;  %v1618_v60 = vunpack.c.l.b16 %v1458_v18 }
 0x2f3   : > { %v1448_v7 = vpack.c.bf16 %v2668_v17, %v2668_v17  ;;  %v1480_v48 = vpack.c.bf16 %v2665_v29, %v2665_v29  ;;  %v2751_v52 = vpop.trf.xlu1  ;;  %v2732_v17 = vunpack.i.l.bf16 %v2731_v39  ;;  %v2727_v29 = vunpack.i.l.bf16 %v3649_v31 }
 0x2f4   : > { %v2755_v13 = vunpack.i.h.bf16 %v2751_v52  ;;  %v2752_v11 = vunpack.i.l.bf16 %v2751_v52 }
 0x2f5   : > { %v1608_v50 = vunpack.c.l.b16 %v1448_v7  ;;  %v1640_v54 = vunpack.c.l.b16 %v1480_v48  ;;  %v1258_v28 = vpop.f32.mrf.mxu2  ;;  %v1454_v7 = vpack.c.bf16 %v2730_v26, %v2730_v26  ;;  %v1487_v48 = vpack.c.bf16 %v2732_v17, %v2732_v17 }
 0x2f6   : > { %1413 = vxpose.xlu2.b32.cont [10/16] %v1258_v28, 128  ;;  %v1459_v35 = vpack.c.bf16 %v2755_v13, %v2755_v13  ;;  %v1491_v44 = vpack.c.bf16 %v2752_v11, %v2752_v11 }
 0x2f8   : > { %v2669_v12 = vpop.trf.xlu0  ;;  %v1619_v9 = vunpack.c.l.b16 %v1459_v35  ;;  %v1651_v5 = vunpack.c.l.b16 %v1491_v44 }
 0x2f9   : > { %v2673_v41 = vunpack.i.h.bf16 %v2669_v12  ;;  %v2670_v49 = vunpack.i.l.bf16 %v2669_v12  ;;  %v1455_v12 = vpack.c.bf16 %v2735_v47, %v2735_v47 }
 0x2fb   : > { %v1449_v45 = vpack.c.bf16 %v2673_v41, %v2673_v41  ;;  %v1481_v38 = vpack.c.bf16 %v2670_v49, %v2670_v49  ;;  %v1486_v41 = vpack.c.bf16 %v2727_v29, %v2727_v29  ;;  %v3665_v49 = vpop.trf.xlu1 }
 0x2fc   : > { %v2760_v23 = vunpack.i.h.bf16 %v3665_v49  ;;  %v2757_v29 = vunpack.i.l.bf16 %v3665_v49 }
 0x2fd   : > { %v1609_v55 = vunpack.c.l.b16 %v1449_v45  ;;  %v1641_v32 = vunpack.c.l.b16 %v1481_v38  ;;  %v1261_v3 = vpop.f32.mrf.mxu2  ;;  %v1615_v38 = vunpack.c.l.b16 %v1455_v12 }
 0x2fe   : > { %1414 = vxpose.xlu2.b32.cont [11/16] %v1261_v3, 128  ;;  %v1687_v3 = vpack.c.b16 %v1619_v9, %v1618_v60 }
 0x2ff   : > { %v1682_v8 = vpack.c.b16 %v1609_v55, %v1608_v50  ;;  %v1698_v46 = vpack.c.b16 %v1641_v32, %v1640_v54  ;;  %v1614_v55 = vunpack.c.l.b16 %v1454_v7  ;;  %v1647_v50 = vunpack.c.l.b16 %v1487_v48 }
 0x300   : > { %v2674_v40 = vpop.trf.xlu0  ;;  %v1646_v32 = vunpack.c.l.b16 %v1486_v41  ;;  %v1460_v7 = vpack.c.bf16 %v2760_v23, %v2760_v23 }
 0x301   : > { %1794 = vmatmul.bf16.gmra.mxu1 %v1682_v8  ;;  %1874 = vmatmul.bf16.gmra.mxu3 %v1698_v46  ;;  %v2678_v62 = vunpack.i.h.bf16 %v2674_v40  ;;  %v2675_v36 = vunpack.i.l.bf16 %v2674_v40  ;;  %v1685_v8 = vpack.c.b16 %v1615_v38, %v1614_v55  ;;  %v2745_v40 = vunpack.i.h.bf16 %v2741_v21 }
 0x302   : > { %v1701_v46 = vpack.c.b16 %v1647_v50, %v1646_v32  ;;  %v1620_v55 = vunpack.c.l.b16 %v1460_v7 }
 0x303   : > { %v1450_v16 = vpack.c.bf16 %v2678_v62, %v2678_v62  ;;  %v1482_v43 = vpack.c.bf16 %v2675_v36, %v2675_v36  ;;  %v2761_v39 = vpop.trf.xlu1  ;;  %v2742_v62 = vunpack.i.l.bf16 %v2741_v21  ;;  %v2737_v36 = vunpack.i.l.bf16 %v3651_v22 }
 0x304   : > { %v2765_v26 = vunpack.i.h.bf16 %v2761_v39  ;;  %v2762_v17 = vunpack.i.l.bf16 %v2761_v39 }
 0x305   : > { %v1610_v59 = vunpack.c.l.b16 %v1450_v16  ;;  %v1642_v6 = vunpack.c.l.b16 %v1482_v43  ;;  %v1263_v45 = vpop.f32.mrf.mxu2  ;;  %v1457_v16 = vpack.c.bf16 %v2745_v40, %v2745_v40  ;;  %v1456_v43 = vpack.c.bf16 %v2740_v25, %v2740_v25 }
 0x306   : > { %1415 = vxpose.xlu2.b32.cont [12/16] %v1263_v45, 128  ;;  %v1489_v19 = vpack.c.bf16 %v2742_v62, %v2742_v62  ;;  %v1461_v48 = vpack.c.bf16 %v2765_v26, %v2765_v26  ;;  %v1493_v41 = vpack.c.bf16 %v2762_v17, %v2762_v17  ;;  %v1492_v45 = vpack.c.bf16 %v2757_v29, %v2757_v29 }
 0x308   : > { %v2679_v61 = vpop.trf.xlu0  ;;  %v1621_v50 = vunpack.c.l.b16 %v1461_v48  ;;  %v1653_v32 = vunpack.c.l.b16 %v1493_v41 }
 0x309   : > { %v2683_v0 = vunpack.i.h.bf16 %v2679_v61  ;;  %v2680_v1 = vunpack.i.l.bf16 %v2679_v61 }
 0x30b   : > { %v1451_v4 = vpack.c.bf16 %v2683_v0, %v2683_v0  ;;  %v1483_v14 = vpack.c.bf16 %v2680_v1, %v2680_v1  ;;  %v1488_v0 = vpack.c.bf16 %v2737_v36, %v2737_v36  ;;  %v3673_v1 = vpop.trf.xlu1 }
 0x30c   : > { %v2770_v49 = vunpack.i.h.bf16 %v3673_v1  ;;  %v2767_v36 = vunpack.i.l.bf16 %v3673_v1 }
 0x30d   : > { %v1611_v15 = vunpack.c.l.b16 %v1451_v4  ;;  %v1643_v57 = vunpack.c.l.b16 %v1483_v14  ;;  %v1266_v31 = vpop.f32.mrf.mxu2  ;;  %v1617_v14 = vunpack.c.l.b16 %v1457_v16 }
 0x30e   : > { %1416 = vxpose.xlu2.b32.cont [13/16] %v1266_v31, 128  ;;  %v1688_v31 = vpack.c.b16 %v1621_v50, %v1620_v55 }
 0x30f   : > { %v1683_v24 = vpack.c.b16 %v1611_v15, %v1610_v59  ;;  %v1699_v10 = vpack.c.b16 %v1643_v57, %v1642_v6  ;;  %v1616_v15 = vunpack.c.l.b16 %v1456_v43  ;;  %v1649_v59 = vunpack.c.l.b16 %v1489_v19 }
 0x310   : > { %v1648_v57 = vunpack.c.l.b16 %v1488_v0  ;;  %v1462_v19 = vpack.c.bf16 %v2770_v49, %v2770_v49 }
 0x311   : > { %1799 = vmatmul.bf16.gmra.mxu1 %v1683_v24  ;;  %1879 = vmatmul.bf16.gmra.mxu3 %v1699_v10  ;;  %v1686_v24 = vpack.c.b16 %v1617_v14, %v1616_v15  ;;  %v1494_v14 = vpack.c.bf16 %v2767_v36, %v2767_v36 }
 0x312   : > { %v1702_v10 = vpack.c.b16 %v1649_v59, %v1648_v57  ;;  %v1622_v15 = vunpack.c.l.b16 %v1462_v19 }
 0x313   : > { %v2771_v21 = vpop.trf.xlu1 }
 0x314   : > { %v2775_v39 = vunpack.i.h.bf16 %v2771_v21  ;;  %v2772_v62 = vunpack.i.l.bf16 %v2771_v21 }
 0x315   : > { %v1268_v4 = vpop.f32.mrf.mxu2 }
 0x316   : > { %1417 = vxpose.xlu2.b32.cont [14/16] %v1268_v4, 128  ;;  %v1463_v0 = vpack.c.bf16 %v2775_v39, %v2775_v39  ;;  %v1495_v4 = vpack.c.bf16 %v2772_v62, %v2772_v62 }
 0x318   : > { %v1623_v59 = vunpack.c.l.b16 %v1463_v0  ;;  %v1655_v57 = vunpack.c.l.b16 %v1495_v4 }
 0x31a   : > { %v1689_v21 = vpack.c.b16 %v1623_v59, %v1622_v15 }
 0x31b   : > { %v3681_v28 = vpop.trf.xlu1 }
 0x31c   : > { %v2780_v1 = vunpack.i.h.bf16 %v3681_v28  ;;  %v2777_v35 = vunpack.i.l.bf16 %v3681_v28 }
 0x31d   : > { %v1271_v22 = vpop.f32.mrf.mxu2 }
 0x31e   : > { %v3659_v2 = vpop.f32.mrf.mxu1  ;;  %1418 = vxpose.xlu2.b32.cont [15/16] %v1271_v22, 128  ;;  %v1496_v60 = vpack.c.bf16 %v2777_v35, %v2777_v35 }
 0x320   : > { %v1656_v23 = vunpack.c.l.b16 %v1496_v60 }
 0x321   : > { %1804 = vmatmul.bf16.gmra.mxu1 %v1684_v56  ;;  %1884 = vmatmul.bf16.gmra.mxu3 %v1700_v27  ;;  %v1650_v56 = vunpack.c.l.b16 %v1490_v42  ;;  %v1464_v42 = vpack.c.bf16 %v2780_v1, %v2780_v1 }
 0x323   : > { %v1703_v52 = vpack.c.b16 %v1651_v5, %v1650_v56  ;;  %v2781_v47 = vpop.trf.xlu1  ;;  %v1624_v56 = vunpack.c.l.b16 %v1464_v42 }
 0x324   : > { %v2785_v11 = vunpack.i.h.bf16 %v2781_v47  ;;  %v2782_v30 = vunpack.i.l.bf16 %v2781_v47 }
 0x325   : > { %v1273_v58 = vpop.f32.mrf.mxu2 }
 0x326   : > { %v3663_v37 = vpop.f32.mrf.mxu1  ;;  %1419 = vxpose.xlu2.b32.end [16/16] %v1273_v58, 128  ;;  %v1465_v58 = vpack.c.bf16 %v2785_v11, %v2785_v11  ;;  %v1497_v9 = vpack.c.bf16 %v2782_v30, %v2782_v30 }
 0x32b   : > { %v3689_v38 = vpop.trf.xlu1 }
 0x32c   : > { %v2790_v7 = vunpack.i.h.bf16 %v3689_v38 }
 0x32e   : > { %v3667_v54 = vpop.f32.mrf.mxu1 }
 0x331   : > { %1809 = vmatmul.bf16.gmra.mxu1 %v1685_v8  ;;  %1889 = vmatmul.bf16.gmra.mxu3 %v1701_v46  ;;  %v1652_v8 = vunpack.c.l.b16 %v1492_v45  ;;  %v2787_v45 = vunpack.i.l.bf16 %v3689_v38 }
 0x333   : > { %v1704_v40 = vpack.c.b16 %v1653_v32, %v1652_v8  ;;  %v2791_v25 = vpop.trf.xlu1  ;;  %v1466_v32 = vpack.c.bf16 %v2790_v7, %v2790_v7 }
 0x334   : > { %v2795_v48 = vunpack.i.h.bf16 %v2791_v25  ;;  %v2792_v41 = vunpack.i.l.bf16 %v2791_v25 }
 0x335   : > { %v1626_v49 = vunpack.c.l.b16 %v1466_v32 }
 0x336   : > { %v3671_v61 = vpop.f32.mrf.mxu1  ;;  %v1467_v8 = vpack.c.bf16 %v2795_v48, %v2795_v48 }
 0x338   : > { %v1627_v39 = vunpack.c.l.b16 %v1467_v8 }
 0x33a   : > { %v1691_v25 = vpack.c.b16 %v1627_v39, %v1626_v49 }
 0x33e   : > { %v3675_v6 = vpop.f32.mrf.mxu1 }
 0x341   : > { %1814 = vmatmul.bf16.gmra.mxu1 %v1686_v24  ;;  %1894 = vmatmul.bf16.gmra.mxu3 %v1702_v10  ;;  %v1654_v24 = vunpack.c.l.b16 %v1494_v14 }
 0x343   : > { %v1705_v51 = vpack.c.b16 %v1655_v57, %v1654_v24 }
 0x346   : > { %v3679_v34 = vpop.f32.mrf.mxu1 }
 0x347   : > { %v1420_v13 = vpop.trf.xlu2 }
 0x348   : > { %v1500_v57 = vpack.c.bf16 %v1420_v13, %v1420_v13 }
 0x34e   : > { %v3683_v27 = vpop.f32.mrf.mxu1 }
 0x34f   : > { %v1421_v5 = vpop.trf.xlu2 }
 0x350   : > { %v1501_v24 = vpack.c.bf16 %v1421_v5, %v1421_v5 }
 0x351   : > { %1819 = vmatmul.bf16.gmra.mxu1 %v1687_v3  ;;  %1899 = vmatmul.bf16.gmra.mxu3 %v1703_v52  ;;  %v1625_v3 = vunpack.c.l.b16 %v1465_v58  ;;  %v1657_v52 = vunpack.c.l.b16 %v1497_v9 }
 0x353   : > { %v1690_v47 = vpack.c.b16 %v1625_v3, %v1624_v56  ;;  %v1706_v29 = vpack.c.b16 %v1657_v52, %v1656_v23 }
 0x356   : > { %v3687_v12 = vpop.f32.mrf.mxu1 }
 0x357   : > { %v1422_v28 = vpop.trf.xlu2 }
 0x358   : > { %v1502_v60 = vpack.c.bf16 %v1422_v28, %v1422_v28 }
 0x35a   : > { %v1662_v3 = vunpack.c.l.b16 %v1502_v60 }
 0x35e   : > { %v3691_v46 = vpop.f32.mrf.mxu1 }
 0x35f   : > { %4416 = vst [vmem:[#allocation22_spill] sm:$0xff] %v3691_v46  ;;  %v1423_v0 = vpop.trf.xlu2 }
 0x360   : > { %v1503_v5 = vpack.c.bf16 %v1423_v0, %v1423_v0 }
 0x361   : > { %1824 = vmatmul.bf16.gmra.mxu1 %v1688_v31  ;;  %1904 = vmatmul.bf16.gmra.mxu3 %v1704_v40  ;;  %v1499_v31 = vpack.c.bf16 %v2792_v41, %v2792_v41  ;;  %v1498_v40 = vpack.c.bf16 %v2787_v45, %v2787_v45 }
 0x362   : > { %v1663_v52 = vunpack.c.l.b16 %v1503_v5 }
 0x363   : > { %v1659_v62 = vunpack.c.l.b16 %v1499_v31  ;;  %v1658_v36 = vunpack.c.l.b16 %v1498_v40 }
 0x364   : > { %v3695_v16 = vpop.f32.mrf.mxu3  ;;  %v1709_v7 = vpack.c.b16 %v1663_v52, %v1662_v3 }
 0x365   : > { %v1707_v14 = vpack.c.b16 %v1659_v62, %v1658_v36 }
 0x366   : > { %v3697_v43 = vpop.f32.mrf.mxu1 }
 0x367   : > { %v1424_v59 = vpop.trf.xlu2 }
 0x368   : > { %v1504_v8 = vpack.c.bf16 %v1424_v59, %v1424_v59 }
 0x36a   : > { %v1664_v40 = vunpack.c.l.b16 %v1504_v8 }
 0x36c   : > { %v3699_v10 = vpop.f32.mrf.mxu3 }
 0x36e   : > { %v3701_v22 = vpop.f32.mrf.mxu1 }
 0x36f   : > { %v1425_v35 = vpop.trf.xlu2 }
 0x370   : > { %v1505_v31 = vpack.c.bf16 %v1425_v35, %v1425_v35 }
 0x371   : > { %1829 = vmatmul.bf16.gmra.mxu1 %v1689_v21  ;;  %1909 = vmatmul.bf16.gmra.mxu3 %v1705_v51  ;;  %v1660_v21 = vunpack.c.l.b16 %v1500_v57  ;;  %v1661_v51 = vunpack.c.l.b16 %v1501_v24 }
 0x372   : > { %v1665_v49 = vunpack.c.l.b16 %v1505_v31 }
 0x373   : > { %v1708_v30 = vpack.c.b16 %v1661_v51, %v1660_v21 }
 0x374   : > { %v3705_v18 = vpop.f32.mrf.mxu3 }
 0x376   : > { %v3707_v44 = vpop.f32.mrf.mxu1 }
 0x377   : > { %v1426_v56 = vpop.trf.xlu2 }
 0x378   : > { %v1506_v21 = vpack.c.bf16 %v1426_v56, %v1426_v56 }
 0x37a   : > { %v1666_v35 = vunpack.c.l.b16 %v1506_v21 }
 0x37c   : > { %v3709_v26 = vpop.f32.mrf.mxu3 }
 0x37e   : > { %v3711_v17 = vpop.f32.mrf.mxu1 }
 0x37f   : > { %4417 = vst [vmem:[#allocation13_spill] sm:$0xff] %v3711_v17  ;;  %v1427_v41 = vpop.trf.xlu2 }
 0x380   : > { %v1507_v51 = vpack.c.bf16 %v1427_v41, %v1427_v41 }
 0x381   : > { %1834 = vmatmul.bf16.gmra.mxu1 %v1690_v47  ;;  %1914 = vmatmul.bf16.gmra.mxu3 %v1706_v29 }
 0x382   : > { %v1667_v60 = vunpack.c.l.b16 %v1507_v51 }
 0x384   : > { %v3715_v55 = vpop.f32.mrf.mxu3 }
 0x386   : > { %v3717_v50 = vpop.f32.mrf.mxu1 }
 0x387   : > { %4418 = vst [vmem:[#allocation23_spill] sm:$0xff] %v3717_v50  ;;  %v1428_v0 = vpop.trf.xlu2 }
 0x38c   : > { %v3719_v19 = vpop.f32.mrf.mxu3 }
 0x38e   : > { %v3721_v4 = vpop.f32.mrf.mxu1 }
 0x38f   : > { %4419 = vst [vmem:[#allocation14_spill] sm:$0xff] %v3721_v4 }
 0x391   : > { %1839 = vmatmul.bf16.gmra.mxu1 %v1691_v25  ;;  %1919 = vmatmul.bf16.gmra.mxu3 %v1707_v14  ;;  %v1710_v25 = vpack.c.b16 %v1665_v49, %v1664_v40  ;;  %v1508_v49 = vpack.c.bf16 %v1428_v0, %v1428_v0 }
 0x393   : > { %v1668_v21 = vunpack.c.l.b16 %v1508_v49 }
 0x394   : > { %v3723_v38 = vpop.f32.mrf.mxu3 }
 0x396   : > { %v3725_v15 = vpop.f32.mrf.mxu1 }
 0x397   : > { %4420 = vst [vmem:[#allocation24_spill] sm:$0xff] %v3725_v15 }
 0x39c   : > { %v3727_v1 = vpop.f32.mrf.mxu3 }
 0x39e   : > { %v3729_v11 = vpop.f32.mrf.mxu1 }
 0x39f   : > { %v3734_v42 = vmul.f32 %v3729_v11, %v3729_v11 }
 0x3a1   : > { %1844 = vmatmul.bf16.gmra.mxu1 %v3629_v63  ;;  %1924 = vmatmul.bf16.gmra.mxu3 %v1708_v30  ;;  %v1429_v30 = vpop.trf.xlu2 }
 0x3a4   : > { %v3736_v58 = vpop.f32.mrf.mxu3 }
 0x3a6   : > { %v3740_v9 = vpop.f32.mrf.mxu1 }
 0x3a7   : > { %v3744_v63 = vmul.f32 %v3740_v9, %v3740_v9 }
 0x3a9   : > { %v1430_v56 = vpop.trf.xlu2 }
 0x3aa   : > { %v1510_v13 = vpack.c.bf16 %v1430_v56, %v1430_v56 }
 0x3ac   : > { %v3746_v23 = vpop.f32.mrf.mxu3 }
 0x3ae   : > { %v3750_v29 = vpop.f32.mrf.mxu1 }
 0x3af   : > { %v3755_v28 = vmul.f32 %v3750_v29, %v3750_v29 }
 0x3b1   : > { %1849 = vmatmul.bf16.gmra.mxu1 %v3635_v33  ;;  %1929 = vmatmul.bf16.gmra.mxu3 %v1709_v7  ;;  %v1711_v7 = vpack.c.b16 %v1667_v60, %v1666_v35  ;;  %v1431_v60 = vpop.trf.xlu2 }
 0x3b4   : > { %v3757_v48 = vpop.f32.mrf.mxu3 }
 0x3b6   : > { %v3761_v32 = vpop.f32.mrf.mxu1 }
 0x3b7   : > { %v3765_v33 = vmul.f32 %v3761_v32, %v3761_v32 }
 0x3b9   : > { %v1432_v47 = vpop.trf.xlu2 }
 0x3bc   : > { %v3767_v39 = vpop.f32.mrf.mxu3 }
 0x3be   : > { %v3771_v36 = vpop.f32.mrf.mxu1 }
 0x3bf   : > { %v3776_v14 = vmul.f32 %v3771_v36, %v3771_v36 }
 0x3c1   : > { %1854 = vmatmul.bf16.gmra.mxu1 %v3641_v53  ;;  %1934 = vmatmul.bf16.gmra.mxu3 %v1710_v25  ;;  %v1509_v25 = vpack.c.bf16 %v1429_v30, %v1429_v30  ;;  %v1973_v30 = vmul.f32 %v3691_v46, %v3691_v46 }
 0x3c3   : > { %v1669_v51 = vunpack.c.l.b16 %v1509_v25  ;;  %v1989_v25 = vsub.f32 %v3695_v16, %v1973_v30 }
 0x3c4   : > { %v3778_v59 = vpop.f32.mrf.mxu3 }
 0x3c5   : > { %v1712_v57 = vpack.c.b16 %v1669_v51, %v1668_v21  ;;  %v1974_v51 = vmul.f32 %v3697_v43, %v3697_v43 }
 0x3c6   : > { %v3782_v24 = vpop.f32.mrf.mxu1 }
 0x3c7   : > { %v3786_v53 = vmul.f32 %v3782_v24, %v3782_v24 }
 0x3cc   : > { %v3788_v5 = vpop.f32.mrf.mxu3 }
 0x3ce   : > { %v3792_v52 = vpop.f32.mrf.mxu1 }
 0x3cf   : > { %v3797_v41 = vmul.f32 %v3792_v52, %v3792_v52 }
 0x3d1   : > { %1859 = vmatmul.bf16.gmra.mxu1 %v3643_v20  ;;  %1939 = vmatmul.bf16.gmra.mxu3 %v1711_v7  ;;  %v1511_v7 = vpack.c.bf16 %v1431_v60, %v1431_v60 }
 0x3d4   : > { %v3799_v8 = vpop.f32.mrf.mxu3 }
 0x3d6   : > { %v3803_v40 = vpop.f32.mrf.mxu1 }
 0x3d7   : > { %4421 = vst [vmem:[#allocation15_spill] sm:$0xff] %v3803_v40  ;;  %v3807_v20 = vmul.f32 %v3803_v40, %v3803_v40 }
 0x3d9   : > { %4422 = vst [vmem:[#allocation25_spill] sm:$0xff] %v3807_v20  ;;  %v1671_v20 = vunpack.c.l.b16 %v1511_v7 }
 0x3dc   : > { %v3809_v35 = vpop.f32.mrf.mxu3 }
 0x3dd   : > { %4423 = vst [vmem:[#allocation16_spill] sm:$0xff] %v3809_v35 }
 0x3de   : > { %v3813_v3 = vpop.f32.mrf.mxu1 }
 0x3df   : > { %4424 = vst [vmem:[#allocation26_spill] sm:$0xff] %v3813_v3  ;;  %v2005_v0 = vmul.f32 %v3813_v3, %v3813_v3  ;;  %v1670_v3 = vunpack.c.l.b16 %v1510_v13  ;;  %v1975_v13 = vmul.f32 %v3701_v22, %v3701_v22 }
 0x3e1   : > { %1944 = vmatmul.bf16.gmra.mxu3 %v1712_v57  ;;  %v2165_v62 = vadd.f32 %v2005_v0, %v1973_v30 }
 0x3e3   : > { %v2181_v40 = vadd.f32 0.0001, %v2165_v62 }
 0x3e4   : > { %v1905_v49 = vpop.f32.mrf.mxu3 }
 0x3e5   : > { %v2021_v31 = vsub.f32 %v1905_v49, %v2005_v0  ;;  %v1990_v0 = vsub.f32 %v3699_v10, %v1974_v51  ;;  %v1991_v10 = vsub.f32 %v3705_v18, %v1975_v13 }
 0x3e6   : > { %v3820_v45 = vpop.f32.mrf.mxu1 }
 0x3e7   : > { %4425 = vst [vmem:[#allocation17_spill] sm:$0xff] %v3820_v45  ;;  %v2197_v35 = vadd.f32 %v2021_v31, %v1989_v25  ;;  %v2006_v57 = vmul.f32 %v3820_v45, %v3820_v45  ;;  %v1713_v31 = vpack.c.b16 %v1671_v20, %v1670_v3  ;;  %v1512_v3 = vpack.c.bf16 %v1432_v47, %v1432_v47 }
 0x3e9   : > { %v2213_v21 = vadd.f32 0.0009, %v2197_v35  ;;  %v2166_v49 = vadd.f32 %v2006_v57, %v1974_v51  ;;  %v1433_v35 = vpop.trf.xlu2 }
 0x3ea   : > { %v1513_v20 = vpack.c.bf16 %v1433_v35, %v1433_v35 }
 0x3eb   : > { %v3826_v46 = vmul.f32 %v2213_v21, %v2181_v40  ;;  %v2182_v60 = vadd.f32 0.0001, %v2166_v49 }
 0x3ec   : > { %v1907_v16 = vpop.f32.mrf.mxu3 }
 0x3ed   : > { %v2022_v30 = vsub.f32 %v1907_v16, %v2006_v57 }
 0x3ee   : > { %v3829_v56 = vpop.f32.mrf.mxu1 }
 0x3ef   : > { %v2198_v62 = vadd.f32 %v2022_v30, %v1990_v0  ;;  %v2007_v45 = vmul.f32 %v3829_v56, %v3829_v56 }
 0x3f1   : > { %v2214_v25 = vadd.f32 0.0009, %v2198_v62  ;;  %1949 = vmatmul.bf16.gmra.mxu3 %v1713_v31  ;;  %v2167_v57 = vadd.f32 %v2007_v45, %v1975_v13  ;;  %v1434_v31 = vpop.trf.xlu2  ;;  %v1976_v62 = vmul.f32 %v3707_v44, %v3707_v44 }
 0x3f3   : > { %v3835_v40 = vmul.f32 %v2214_v25, %v2182_v60  ;;  %v2183_v0 = vadd.f32 0.0001, %v2167_v57  ;;  %v1672_v60 = vunpack.c.l.b16 %v1512_v3  ;;  %v1673_v25 = vunpack.c.l.b16 %v1513_v20 }
 0x3f4   : > { %v1910_v7 = vpop.f32.mrf.mxu3  ;;  %v1977_v3 = vmul.f32 %v3711_v17, %v3711_v17  ;;  %v4451_v17 = vld [vmem:[#allocation16_spill] sm:$0xff] }
 0x3f5   : > { %4426 = vst [vmem:[#allocation27_spill] sm:$0xff] %v3835_v40  ;;  %v2023_v21 = vsub.f32 %v1910_v7, %v2007_v45  ;;  %v1992_v45 = vsub.f32 %v3709_v26, %v1976_v62  ;;  %v1714_v7 = vpack.c.b16 %v1673_v25, %v1672_v60  ;;  %v1514_v60 = vpack.c.bf16 %v1434_v31, %v1434_v31 }
 0x3f6   : > { %v3838_v51 = vpop.f32.mrf.mxu1  ;;  %v1993_v26 = vsub.f32 %v3715_v55, %v1977_v3 }
 0x3f7   : > { %v2199_v16 = vadd.f32 %v2023_v21, %v1991_v10  ;;  %v2008_v49 = vmul.f32 %v3838_v51, %v3838_v51 }
 0x3f9   : > { %v2215_v30 = vadd.f32 0.0009, %v2199_v16  ;;  %v2168_v47 = vadd.f32 %v2008_v49, %v1976_v62 }
 0x3fb   : > { %v3844_v40 = vmul.f32 %v2215_v30, %v2183_v0  ;;  %v2184_v21 = vadd.f32 0.0001, %v2168_v47  ;;  %v1435_v0 = vpop.trf.xlu2 }
 0x3fc   : > { %v1912_v18 = vpop.f32.mrf.mxu3  ;;  %v1515_v25 = vpack.c.bf16 %v1435_v0, %v1435_v0 }
 0x3fd   : > { %v2024_v13 = vsub.f32 %v1912_v18, %v2008_v49 }
 0x3fe   : > { %v3847_v35 = vpop.f32.mrf.mxu1 }
 0x3ff   : > { %4427 = vst [vmem:[#allocation18_spill] sm:$0xff] %v3847_v35  ;;  %v2200_v10 = vadd.f32 %v2024_v13, %v1992_v45  ;;  %v2009_v16 = vmul.f32 %v3847_v35, %v3847_v35 }
 0x401   : > { %v2216_v57 = vadd.f32 0.0009, %v2200_v10  ;;  %1954 = vmatmul.bf16.gmra.mxu3 %v1714_v7  ;;  %v2169_v62 = vadd.f32 %v2009_v16, %v1977_v3  ;;  %v1978_v10 = vmul.f32 %v3717_v50, %v3717_v50 }
 0x403   : > { %v3853_v20 = vmul.f32 %v2216_v57, %v2184_v21  ;;  %v2185_v13 = vadd.f32 0.0001, %v2169_v62  ;;  %v1674_v21 = vunpack.c.l.b16 %v1514_v60  ;;  %v1675_v57 = vunpack.c.l.b16 %v1515_v25 }
 0x404   : > { %v1915_v30 = vpop.f32.mrf.mxu3  ;;  %v1979_v60 = vmul.f32 %v3721_v4, %v3721_v4 }
 0x405   : > { %v2025_v49 = vsub.f32 %v1915_v30, %v2009_v16  ;;  %v1994_v16 = vsub.f32 %v3719_v19, %v1978_v10  ;;  %v1715_v0 = vpack.c.b16 %v1675_v57, %v1674_v21 }
 0x406   : > { %v3856_v18 = vpop.f32.mrf.mxu1  ;;  %v1995_v19 = vsub.f32 %v3723_v38, %v1979_v60 }
 0x407   : > { %4428 = vst [vmem:[#allocation28_spill] sm:$0xff] %v3856_v18  ;;  %v2201_v45 = vadd.f32 %v2025_v49, %v1993_v26  ;;  %v2010_v7 = vmul.f32 %v3856_v18, %v3856_v18 }
 0x409   : > { %v2217_v47 = vadd.f32 0.0009, %v2201_v45  ;;  %v2170_v30 = vadd.f32 %v2010_v7, %v1978_v10 }
 0x40b   : > { %v3862_v35 = vmul.f32 %v2217_v47, %v2185_v13  ;;  %v2186_v49 = vadd.f32 0.0001, %v2170_v30 }
 0x40c   : > { %v1917_v55 = vpop.f32.mrf.mxu3 }
 0x40d   : > { %4429 = vst [vmem:[#allocation29_spill] sm:$0xff] %v3862_v35  ;;  %v2026_v3 = vsub.f32 %v1917_v55, %v2010_v7 }
 0x40e   : > { %v3865_v31 = vpop.f32.mrf.mxu1 }
 0x40f   : > { %4430 = vst [vmem:[#allocation30_spill] sm:$0xff] %v3865_v31  ;;  %v2202_v26 = vadd.f32 %v2026_v3, %v1994_v16  ;;  %v2011_v45 = vmul.f32 %v3865_v31, %v3865_v31  ;;  %v1980_v3 = vmul.f32 %v3725_v15, %v3725_v15 }
 0x411   : > { %v2218_v62 = vadd.f32 0.0009, %v2202_v26  ;;  %1959 = vmatmul.bf16.gmra.mxu3 %v1715_v0  ;;  %v2171_v7 = vadd.f32 %v2011_v45, %v1979_v60  ;;  %v3883_v0 = vld [vmem:[%s3235_s28 + $0x18] sm:$0xff]  ;;  %v1965_v60 = vmul.f32 %v3659_v2, %v3659_v2 }
 0x412   : > { %v518_v38 = vsub.f32 1.0, %v3883_v0  ;;  %2808 = vlog2.f32 %v3883_v0 }
 0x413   : > { %v3871_v25 = vmul.f32 %v2218_v62, %v2186_v49  ;;  %v2187_v57 = vadd.f32 0.0001, %v2171_v7  ;;  %v1996_v49 = vsub.f32 %v3727_v1, %v1980_v3  ;;  %v2157_v7 = vadd.f32 %v3734_v42, %v1965_v60 }
 0x414   : > { %v1920_v13 = vpop.f32.mrf.mxu3  ;;  %2810 = vlog2.f32 %v518_v38  ;;  %v4434_v1 = vsub.f32 %v3736_v58, %v3734_v42  ;;  %v2029_v38 = vmul.f32 %v3729_v11, %v3659_v2  ;;  %v3907_v42 = vld [vmem:[%s3235_s28 + $0x28] sm:$0xff] }
 0x415   : > { %4431 = vst [vmem:[#allocation31_spill] sm:$0xff] %v3871_v25  ;;  %v2027_v47 = vsub.f32 %v1920_v13, %v2011_v45  ;;  %v520_v58 = vsub.f32 1.0, %v3907_v42  ;;  %v1967_v25 = vmul.f32 %v3667_v54, %v3667_v54 }
 0x416   : > { %v3874_v10 = vpop.f32.mrf.mxu1 }
 0x417   : > { %4432 = vst [vmem:[#allocation32_spill] sm:$0xff] %v3874_v10  ;;  %v2203_v21 = vadd.f32 %v2027_v47, %v1995_v19  ;;  %v2012_v16 = vmul.f32 %v3874_v10, %v3874_v10 }
 0x419   : > { %v2219_v55 = vadd.f32 0.0009, %v2203_v21  ;;  %v2172_v45 = vadd.f32 %v2012_v16, %v1980_v3 }
 0x41b   : > { %v3880_v30 = vmul.f32 %v2219_v55, %v2187_v57  ;;  %v2188_v21 = vadd.f32 0.0001, %v2172_v45  ;;  %v2896_v45 = vld [vmem:[%s3235_s28] sm:$0xff] }
 0x41c   : > { %v1922_v26 = vpop.f32.mrf.mxu3 }
 0x41d   : > { %4433 = vst [vmem:[#allocation33_spill] sm:$0xff] %v3880_v30  ;;  %v2028_v62 = vsub.f32 %v1922_v26, %v2012_v16  ;;  %v3895_v16 = vld [vmem:[%s3235_s28 + $0x20] sm:$0xff]  ;;  %v2061_v26 = vmul.f32 2.0, %v3659_v2  ;;  %v2809_v2 = vpop.eup %2808  ;;  %v2899_v30 = vld [vmem:[%s3235_s28 + $0x10] sm:$0xff] }
 0x41e   : > { %v1845_v13 = vpop.f32.mrf.mxu1  ;;  %2812 = vlog2.f32 %v3895_v16  ;;  %v519_v3 = vsub.f32 1.0, %v3895_v16 }
 0x41f   : > { %v2204_v19 = vadd.f32 %v2028_v62, %v1996_v49  ;;  %v1981_v47 = vsub.f32 %v1845_v13, %v1965_v60  ;;  %v2173_v62 = vadd.f32 0.0001, %v2157_v7  ;;  %v2897_v13 = vld [vmem:[%s3235_s28 + $0x8] sm:$0xff]  ;;  %2814 = vlog2.f32 %v3907_v42 }
 0x420   : > { %2816 = vlog2.f32 %v519_v3 }
 0x421   : > { %v2220_v57 = vadd.f32 0.0009, %v2204_v19  ;;  %v2189_v55 = vadd.f32 %v4434_v1, %v1981_v47  ;;  %v368_v19 = vadd.f32 %v2897_v13, %v2896_v45  ;;  %v2077_v1 = vmul.f32 %v2061_v26, %v3729_v11  ;;  %v2811_v45 = vpop.eup %2810  ;;  %v3917_v11 = vld [vmem:[%s3235_s28 + $0x30] sm:$0xff] }
 0x422   : > { %v521_v26 = vsub.f32 1.0, %v3917_v11  ;;  %v3939_v50 = vmul.f32 0.6931472, %v2811_v45 }
 0x423   : > { %v3900_v49 = vmul.f32 %v2220_v57, %v2188_v21  ;;  %v2205_v60 = vadd.f32 0.0009, %v2189_v55  ;;  %v1966_v57 = vmul.f32 %v3663_v37, %v3663_v37  ;;  %v369_v31 = vadd.f32 %v2899_v30, %v368_v19 }
 0x424   : > { %v1925_v47 = vpop.f32.mrf.mxu3  ;;  %v2813_v15 = vpop.eup %2812  ;;  %v2062_v19 = vmul.f32 2.0, %v3663_v37 }
 0x425   : > { %4435 = vst [vmem:[#allocation34_spill] sm:$0xff] %v3900_v49  ;;  %v2221_v21 = vmul.f32 %v2205_v60, %v2173_v62  ;;  %v2045_v7 = vsub.f32 %v1925_v47, %v2029_v38  ;;  %v2158_v10 = vadd.f32 %v3744_v63, %v1966_v57  ;;  %v2093_v62 = vadd.f32 0.0001, %v2077_v1  ;;  %v2815_v47 = vpop.eup %2814 }
 0x426   : > { %v1847_v55 = vpop.f32.mrf.mxu1  ;;  %v4436_v60 = vsub.f32 %v3746_v23, %v3744_v63  ;;  %v2030_v1 = vmul.f32 %v3740_v9, %v3663_v37 }
 0x427   : > { %2818 = vrcp.f32 %v2221_v21  ;;  %v2109_v13 = vmul.f32 2.0, %v2045_v7  ;;  %v1982_v49 = vsub.f32 %v1847_v55, %v1966_v57  ;;  %v3925_v21 = vld [vmem:[%s3235_s28 + $0x38] sm:$0xff]  ;;  %v2174_v7 = vadd.f32 0.0001, %v2158_v10  ;;  %v2817_v55 = vpop.eup %2816 }
 0x428   : > { %2820 = vlog2.f32 %v520_v58  ;;  %v522_v30 = vsub.f32 1.0, %v3925_v21 }
 0x429   : > { %2822 = vlog2.f32 %v3917_v11  ;;  %v2125_v3 = vadd.f32 0.0009, %v2109_v13  ;;  %v2190_v38 = vadd.f32 %v4436_v60, %v1982_v49  ;;  %v370_v13 = vadd.f32 %v3883_v0, %v369_v31 }
 0x42a   : > { %2824 = vlog2.f32 %v3925_v21  ;;  %v2078_v49 = vmul.f32 %v2062_v19, %v3740_v9  ;;  %v2159_v0 = vadd.f32 %v3755_v28, %v1967_v25  ;;  %v3942_v19 = vmul.f32 0.6931472, %v2813_v15 }
 0x42b   : > { %v2141_v58 = vmul.f32 %v2125_v3, %v2093_v62  ;;  %v2206_v57 = vadd.f32 0.0009, %v2190_v38  ;;  %2826 = vlog2.f32 %v521_v26  ;;  %v3936_v62 = vmul.f32 0.6931472, %v2809_v2 }
 0x42c   : > { %v1927_v63 = vpop.f32.mrf.mxu3  ;;  %2828 = vlog2.f32 %v522_v30  ;;  %v371_v9 = vadd.f32 %v3895_v16, %v370_v13  ;;  %v4437_v2 = vsub.f32 %v3757_v48, %v3755_v28  ;;  %v2031_v15 = vmul.f32 %v3750_v29, %v3667_v54 }
 0x42d   : > { %v2819_v23 = vpop.eup %2818  ;;  %v2222_v60 = vmul.f32 %v2206_v57, %v2174_v7  ;;  %v2046_v4 = vsub.f32 %v1927_v63, %v2030_v1  ;;  %v2094_v7 = vadd.f32 0.0001, %v2078_v49  ;;  %v470_v1 = vmax.f32 %v3936_v62, -100.0 }
 0x42e   : > { %v2821_v18 = vpop.eup %2820  ;;  %v2253_v10 = vmul.f32 %v2819_v23, %v2141_v58  ;;  %v1850_v3 = vpop.f32.mrf.mxu1  ;;  %v3950_v63 = vmul.f32 0.6931472, %v2817_v55  ;;  %v2175_v23 = vadd.f32 0.0001, %v2159_v0  ;;  %v566_v49 = vmax.f32 %v3939_v50, -100.0 }
 0x42f   : > { %v2823_v37 = vpop.eup %2822  ;;  %2830 = vrcp.f32 %v2222_v60  ;;  %v2110_v38 = vmul.f32 2.0, %v2046_v4  ;;  %v1983_v31 = vsub.f32 %v1850_v3, %v1967_v25  ;;  %v3948_v4 = vmul.f32 0.6931472, %v2815_v47 }
 0x430   : > { %v2825_v26 = vpop.eup %2824  ;;  %v2063_v25 = vmul.f32 2.0, %v3667_v54  ;;  %v372_v28 = vadd.f32 %v3907_v42, %v371_v9  ;;  %v471_v48 = vmax.f32 %v3942_v19, -100.0  ;;  %v3958_v60 = vmul.f32 0.6931472, %v2821_v18 }
 0x431   : > { %v2126_v57 = vadd.f32 0.0009, %v2110_v38  ;;  %v2191_v30 = vadd.f32 %v4437_v2, %v1983_v31  ;;  %v2827_v58 = vpop.eup %2826  ;;  %v1968_v31 = vmul.f32 %v3671_v61, %v3671_v61  ;;  %v567_v0 = vmax.f32 %v3950_v63, -100.0 }
 0x432   : > { %v2829_v13 = vpop.eup %2828  ;;  %v2079_v62 = vmul.f32 %v2063_v25, %v3750_v29  ;;  %v3965_v50 = vmul.f32 0.6931472, %v2823_v37  ;;  %v3968_v29 = vmul.f32 0.6931472, %v2825_v26  ;;  %v3970_v2 = vmul.f32 0.6931472, %v2827_v58 }
 0x433   : > { %v2142_v45 = vmul.f32 %v2126_v57, %v2094_v7  ;;  %v2207_v16 = vadd.f32 0.0009, %v2191_v30  ;;  %v2160_v57 = vadd.f32 %v3765_v33, %v1968_v31  ;;  %v3972_v30 = vmul.f32 0.6931472, %v2829_v13 }
 0x434   : > { %v1930_v47 = vpop.f32.mrf.mxu3  ;;  %v2095_v37 = vadd.f32 0.0001, %v2079_v62  ;;  %v2064_v13 = vmul.f32 2.0, %v3671_v61  ;;  %v2032_v62 = vmul.f32 %v3761_v32, %v3671_v61 }
 0x435   : > { %v2831_v55 = vpop.eup %2830  ;;  %v2223_v3 = vmul.f32 %v2207_v16, %v2175_v23  ;;  %v2047_v38 = vsub.f32 %v1930_v47, %v2031_v15  ;;  %v568_v23 = vmax.f32 %v3958_v60, -100.0  ;;  %v3979_v15 = vadd.f32 %v3917_v11, %v372_v28  ;;  %v2902_v47 = vld [vmem:[%s3242_s22 + $0x18] sm:$0xff]  ;;  %v2903_v28 = vld [vmem:[%s3242_s22 + $0x20] sm:$0xff] }
 0x436   : > { %v2254_v9 = vmul.f32 %v2831_v55, %v2142_v45  ;;  %v1852_v19 = vpop.f32.mrf.mxu1  ;;  %v4438_v45 = vsub.f32 %v3767_v39, %v3765_v33  ;;  %v502_v58 = vsub.f32 1.0, %v2902_v47  ;;  %v2176_v55 = vadd.f32 0.0001, %v2160_v57 }
 0x437   : > { %2832 = vrcp.f32 %v2223_v3  ;;  %v2111_v18 = vmul.f32 2.0, %v2047_v38  ;;  %v1984_v7 = vsub.f32 %v1852_v19, %v1968_v31  ;;  %v503_v38 = vsub.f32 1.0, %v2903_v28 }
 0x438   : > { %v2269_v25 = vadd.f32 %v2254_v9, %v2253_v10  ;;  %v2080_v19 = vmul.f32 %v2064_v13, %v3761_v32  ;;  %v1969_v57 = vmul.f32 %v3675_v6, %v3675_v6  ;;  %v487_v32 = vmul.f32 %v2903_v28, %v471_v48  ;;  %v2905_v13 = vld [vmem:[%s3242_s22 + $0x28] sm:$0xff] }
 0x439   : > { %v2127_v63 = vadd.f32 0.0009, %v2111_v18  ;;  %v2192_v16 = vadd.f32 %v4438_v45, %v1984_v7  ;;  %v582_v45 = vmul.f32 %v566_v49, %v502_v58  ;;  %v2065_v48 = vmul.f32 2.0, %v3675_v6 }
 0x43a   : > { %v2161_v26 = vadd.f32 %v3776_v14, %v1969_v57 }
 0x43b   : > { %v2143_v10 = vmul.f32 %v2127_v63, %v2095_v37  ;;  %v2208_v60 = vadd.f32 0.0009, %v2192_v16  ;;  %v3994_v37 = vld [vmem:[%s3235_s28 + $0x40] sm:$0xff]  ;;  %v486_v63 = vmul.f32 %v2902_v47, %v470_v1  ;;  %v4439_v1 = vsub.f32 %v3778_v59, %v3776_v14  ;;  %v4004_v47 = vld [vmem:[%s3235_s28 + $0x48] sm:$0xff] }
 0x43c   : > { %v1932_v31 = vpop.f32.mrf.mxu3  ;;  %v523_v61 = vsub.f32 1.0, %v3994_v37  ;;  %v524_v58 = vsub.f32 1.0, %v4004_v47  ;;  %v4440_v14 = vmax.f32 %v3948_v4, -100.0 }
 0x43d   : > { %v2833_v9 = vpop.eup %2832  ;;  %v2224_v18 = vmul.f32 %v2208_v60, %v2176_v55  ;;  %v2048_v7 = vsub.f32 %v1932_v31, %v2032_v62  ;;  %v504_v55 = vsub.f32 1.0, %v2905_v13  ;;  %v583_v60 = vmul.f32 %v567_v0, %v503_v38 }
 0x43e   : > { %v2255_v16 = vmul.f32 %v2833_v9, %v2143_v10  ;;  %v1855_v39 = vpop.f32.mrf.mxu1  ;;  %v2096_v31 = vadd.f32 0.0001, %v2080_v19  ;;  %v4008_v10 = vadd.f32 %v582_v45, %v486_v63  ;;  %v488_v59 = vmul.f32 %v2905_v13, %v4440_v14  ;;  %v4445_v14 = vld [vmem:[#allocation21_spill] sm:$0xff] }
 0x43f   : > { %2834 = vrcp.f32 %v2224_v18  ;;  %v2112_v33 = vmul.f32 2.0, %v2048_v7  ;;  %v1985_v3 = vsub.f32 %v1855_v39, %v1969_v57  ;;  %v4015_v28 = vadd.f32 %v583_v60, %v487_v32  ;;  %v4118_v32 = vld [vmem:[%s3235_s28 + $0x60] sm:$0xff] }
 0x440   : > { %v2270_v62 = vadd.f32 %v2269_v25, %v2255_v16  ;;  %2836 = vlog2.f32 %v3994_v37  ;;  %v2177_v25 = vadd.f32 0.0001, %v2161_v26  ;;  %v2081_v19 = vmul.f32 %v2065_v48, %v3771_v36 }
 0x441   : > { %v2128_v54 = vadd.f32 0.0009, %v2112_v33  ;;  %v2193_v49 = vadd.f32 %v4439_v1, %v1985_v3  ;;  %2838 = vlog2.f32 %v4004_v47  ;;  %v2033_v33 = vmul.f32 %v3771_v36, %v3675_v6  ;;  %4441 = vst [vmem:[#allocation35_spill] sm:$0xff] %v4015_v28  ;;  %v4127_v6 = vld [vmem:[%s3235_s28 + $0x68] sm:$0xff] }
 0x442   : > { %2840 = vlog2.f32 %v523_v61  ;;  %v584_v3 = vmul.f32 %v568_v23, %v504_v55  ;;  %v4022_v26 = vmul.f32 %v2905_v13, %v3907_v42  ;;  %v2907_v55 = vld [vmem:[%s3242_s22 + $0x30] sm:$0xff] }
 0x443   : > { %v2144_v0 = vmul.f32 %v2128_v54, %v2096_v31  ;;  %v2209_v39 = vadd.f32 0.0009, %v2193_v49  ;;  %v1970_v54 = vmul.f32 %v3679_v34, %v3679_v34  ;;  %2842 = vlog2.f32 %v524_v58 }
 0x444   : > { %v1935_v38 = vpop.f32.mrf.mxu3  ;;  %v4029_v16 = vadd.f32 %v584_v3, %v488_v59  ;;  %v505_v60 = vsub.f32 1.0, %v2907_v55  ;;  %v4034_v13 = vmul.f32 %v2907_v55, %v3917_v11  ;;  %v2097_v31 = vadd.f32 0.0001, %v2081_v19 }
 0x445   : > { %v2835_v9 = vpop.eup %2834  ;;  %v2225_v18 = vmul.f32 %v2209_v39, %v2177_v25  ;;  %v2049_v7 = vsub.f32 %v1935_v38, %v2033_v33  ;;  %v2162_v63 = vadd.f32 %v3786_v53, %v1970_v54  ;;  %v4442_v49 = vsub.f32 %v3788_v5, %v3786_v53  ;;  %v4046_v39 = vld [vmem:[%s3242_s22 + $0x38] sm:$0xff] }
 0x446   : > { %v2256_v4 = vmul.f32 %v2835_v9, %v2144_v0  ;;  %v1857_v23 = vpop.f32.mrf.mxu1  ;;  %v4024_v57 = vpop.eup %2836  ;;  %v4443_v0 = vmax.f32 %v3965_v50, -100.0  ;;  %v4444_v33 = vmax.f32 %v3968_v29, -100.0  ;;  %v2066_v11 = vmul.f32 2.0, %v3679_v34 }
 0x447   : > { %2844 = vrcp.f32 %v2225_v18  ;;  %v2113_v61 = vmul.f32 2.0, %v2049_v7  ;;  %v1986_v36 = vsub.f32 %v1857_v23, %v1970_v54  ;;  %v4027_v45 = vpop.eup %2838  ;;  %v396_v59 = vadd.f32 %v2907_v55, %v4445_v14 }
 0x448   : > { %v2271_v42 = vadd.f32 %v2270_v62, %v2256_v4  ;;  %v4039_v48 = vpop.eup %2840  ;;  %v4043_v25 = vmul.f32 %v2907_v55, %v4443_v0  ;;  %v4051_v62 = vmul.f32 %v4046_v39, %v4444_v33  ;;  %v2178_v5 = vadd.f32 0.0001, %v2162_v63  ;;  %v4071_v63 = vld [vmem:[%s3242_s22 + $0x40] sm:$0xff]  ;;  %v4079_v33 = vld [vmem:[%s3242_s22 + $0x48] sm:$0xff] }
 0x449   : > { %v2129_v1 = vadd.f32 0.0009, %v2113_v61  ;;  %v2194_v58 = vadd.f32 %v4442_v49, %v1986_v36  ;;  %v2034_v50 = vmul.f32 %v3782_v24, %v3679_v34  ;;  %v4057_v38 = vpop.eup %2842  ;;  %v4446_v29 = vmax.f32 %v3970_v2, -100.0 }
 0x44a   : > { %v397_v7 = vadd.f32 %v4046_v39, %v396_v59  ;;  %v374_v54 = vadd.f32 %v3925_v21, %v3979_v15  ;;  %v2082_v23 = vmul.f32 %v2066_v11, %v3782_v24  ;;  %v1971_v36 = vmul.f32 %v3683_v27, %v3683_v27 }
 0x44b   : > { %v2145_v53 = vmul.f32 %v2129_v1, %v2097_v31  ;;  %v2210_v3 = vadd.f32 0.0009, %v2194_v58  ;;  %v4062_v19 = vmul.f32 %v4446_v29, %v505_v60  ;;  %v2067_v58 = vmul.f32 2.0, %v3683_v27 }
 0x44c   : > { %v1937_v18 = vpop.f32.mrf.mxu3  ;;  %v398_v31 = vadd.f32 %v4071_v63, %v397_v7  ;;  %v375_v1 = vadd.f32 %v3994_v37, %v374_v54  ;;  %v2163_v49 = vadd.f32 %v3797_v41, %v1971_v36  ;;  %v2098_v59 = vadd.f32 0.0001, %v2082_v23  ;;  %v4095_v54 = vld [vmem:[%s3235_s28 + $0x50] sm:$0xff] }
 0x44d   : > { %v2845_v4 = vpop.eup %2844  ;;  %v2226_v61 = vmul.f32 %v2210_v3, %v2178_v5  ;;  %v2050_v34 = vsub.f32 %v1937_v18, %v2034_v50  ;;  %v4447_v3 = vsub.f32 %v3799_v8, %v3797_v41  ;;  %v2083_v29 = vmul.f32 %v2067_v58, %v3792_v52  ;;  %v4091_v18 = vld [vmem:[%s3242_s22 + $0x50] sm:$0xff]  ;;  %v4448_v8 = vld [vmem:[#allocation22_spill] sm:$0xff] }
 0x44e   : > { %v2257_v55 = vmul.f32 %v2845_v4, %v2145_v53  ;;  %v1860_v60 = vpop.f32.mrf.mxu1  ;;  %v399_v11 = vadd.f32 %v4079_v33, %v398_v31  ;;  %v376_v14 = vadd.f32 %v4004_v47, %v375_v1  ;;  %v2068_v53 = vmul.f32 2.0, %v3687_v12  ;;  %v4103_v31 = vld [vmem:[%s3242_s22 + $0x58] sm:$0xff] }
 0x44f   : > { %2846 = vrcp.f32 %v2226_v61  ;;  %v2114_v15 = vmul.f32 2.0, %v2050_v34  ;;  %v1987_v24 = vsub.f32 %v1860_v60, %v1971_v36  ;;  %v2179_v61 = vadd.f32 0.0001, %v2163_v49 }
 0x450   : > { %v2272_v0 = vadd.f32 %v2271_v42, %v2257_v55  ;;  %v1972_v42 = vmul.f32 %v3687_v12, %v3687_v12  ;;  %v400_v7 = vadd.f32 %v4091_v18, %v399_v11  ;;  %v377_v4 = vadd.f32 %v4095_v54, %v376_v14 }
 0x451   : > { %v2130_v5 = vadd.f32 0.0009, %v2114_v15  ;;  %v2195_v50 = vadd.f32 %v4447_v3, %v1987_v24  ;;  %v2035_v41 = vmul.f32 %v3792_v52, %v3683_v27  ;;  %v2069_v36 = vmul.f32 2.0, %v4448_v8  ;;  %v4107_v15 = vld [vmem:[%s3235_s28 + $0x58] sm:$0xff] }
 0x452   : > { %v2070_v55 = vmul.f32 2.0, %v3697_v43  ;;  %v401_v1 = vadd.f32 %v4103_v31, %v400_v7  ;;  %v378_v24 = vadd.f32 %v4107_v15, %v377_v4  ;;  %v2071_v58 = vmul.f32 2.0, %v3701_v22 }
 0x453   : > { %v2146_v23 = vmul.f32 %v2130_v5, %v2098_v59  ;;  %v2211_v34 = vadd.f32 0.0009, %v2195_v50  ;;  %v2072_v27 = vmul.f32 2.0, %v3707_v44  ;;  %v4449_v5 = vld [vmem:[#allocation25_spill] sm:$0xff]  ;;  %v4114_v50 = vld [vmem:[%s3242_s22 + $0x60] sm:$0xff] }
 0x454   : > { %v1940_v60 = vpop.f32.mrf.mxu3  ;;  %v2164_v3 = vadd.f32 %v4449_v5, %v1972_v42  ;;  %v402_v7 = vadd.f32 %v4114_v50, %v401_v1  ;;  %v379_v4 = vadd.f32 %v4118_v32, %v378_v24  ;;  %v2099_v2 = vadd.f32 0.0001, %v2083_v29 }
 0x455   : > { %v2847_v49 = vpop.eup %2846  ;;  %v2227_v52 = vmul.f32 %v2211_v34, %v2179_v61  ;;  %v2051_v11 = vsub.f32 %v1940_v60, %v2035_v41  ;;  %v4450_v34 = vld [vmem:[#allocation15_spill] sm:$0xff]  ;;  %v4123_v60 = vld [vmem:[%s3242_s22 + $0x68] sm:$0xff]  ;;  %v4452_v29 = vsub.f32 %v4451_v17, %v4449_v5 }
 0x456   : > { %v2258_v14 = vmul.f32 %v2847_v49, %v2146_v23  ;;  %v1862_v59 = vpop.f32.mrf.mxu1  ;;  %v2084_v41 = vmul.f32 %v2068_v53, %v4450_v34  ;;  %v403_v49 = vadd.f32 %v4123_v60, %v402_v7  ;;  %v380_v1 = vadd.f32 %v4127_v6, %v379_v4  ;;  %v4453_v53 = vld [vmem:[#allocation20_spill] sm:$0xff] }
 0x457   : > { %2848 = vrcp.f32 %v2227_v52  ;;  %v2115_v9 = vmul.f32 2.0, %v2051_v11  ;;  %v1988_v61 = vsub.f32 %v1862_v59, %v1972_v42  ;;  %v2036_v42 = vmul.f32 %v4450_v34, %v3687_v12  ;;  %v4454_v52 = vld [vmem:[#allocation26_spill] sm:$0xff]  ;;  %v4139_v59 = vld [vmem:[%s3242_s22 + $0x70] sm:$0xff] }
 0x458   : > { %v2273_v23 = vadd.f32 %v2272_v0, %v2258_v14  ;;  %v349_v0 = vadd.f32 %v4453_v53, %v4022_v26  ;;  %v2085_v11 = vmul.f32 %v2069_v36, %v4454_v52  ;;  %v2180_v14 = vadd.f32 0.0001, %v2164_v3  ;;  %v4152_v3 = vld [vmem:[%s3242_s22 + $0x78] sm:$0xff]  ;;  %v4455_v53 = vld [vmem:[#allocation17_spill] sm:$0xff] }
 0x459   : > { %v2131_v35 = vadd.f32 0.0009, %v2115_v9  ;;  %v2196_v24 = vadd.f32 %v4452_v29, %v1988_v61  ;;  %v404_v7 = vadd.f32 %v4139_v59, %v403_v49  ;;  %v4143_v9 = vld [vmem:[%s3235_s28 + $0x70] sm:$0xff]  ;;  %v336_v12 = vmul.f32 %v4046_v39, %v3925_v21  ;;  %v4156_v29 = vld [vmem:[%s3235_s28 + $0x78] sm:$0xff]  ;;  %s3033_s28 = scalar_lea.hbm %s4332_s3, 16 }
 0x45a   : > { %v381_v17 = vadd.f32 %v4143_v9, %v380_v1  ;;  %v350_v61 = vadd.f32 %v349_v0, %v4034_v13  ;;  %v2100_v26 = vadd.f32 0.0001, %v2084_v41  ;;  %v2037_v36 = vmul.f32 %v4454_v52, %v4448_v8  ;;  %p3035_p10 = scmp.lt.s32.totalorder %s3033_s28, %s3029_s21 }
 0x45b   : > { %v2147_v5 = vmul.f32 %v2131_v35, %v2099_v2  ;;  %v2212_v4 = vadd.f32 0.0009, %v2196_v24  ;;  %v405_v49 = vadd.f32 %v4152_v3, %v404_v7  ;;  %v337_v21 = vmul.f32 %v4071_v63, %v3994_v37 }
 0x45c   : > { %v1942_v34 = vpop.f32.mrf.mxu3  ;;  %v382_v1 = vadd.f32 %v4156_v29, %v381_v17  ;;  %v351_v13 = vadd.f32 %v350_v61, %v336_v12  ;;  %v2101_v41 = vadd.f32 0.0001, %v2085_v11  ;;  %v2086_v0 = vmul.f32 %v2070_v55, %v4455_v53  ;;  %p3036_p2 = por %p3035_p10, %p3034_p9 }
 0x45d   : > { %v2849_v35 = vpop.eup %2848  ;;  %v2228_v2 = vmul.f32 %v2212_v4, %v2180_v14  ;;  %v2052_v24 = vsub.f32 %v1942_v34, %v2036_v42  ;;  %406 = vadd.xlane.f32.xlu1 %v405_v49  ;;  %2850 = vlog2.f32 %v4095_v54  ;;  %v338_v52 = vmul.f32 %v4079_v33, %v4004_v47 }
 0x45e   : > { %v2259_v28 = vmul.f32 %v2849_v35, %v2147_v5  ;;  %383 = vadd.xlane.f32.xlu0 %v382_v1  ;;  %v352_v7 = vadd.f32 %v351_v13, %v337_v21  ;;  %v2087_v42 = vmul.f32 %v2071_v58, %v3829_v56  ;;  %v2088_v14 = vmul.f32 %v2072_v27, %v3838_v51  ;;  %v4457_v27 = vld [vmem:[#allocation19_spill] sm:$0xff]  ;;  %p3037_p11 = pnand %p3036_p2, %p3032_p8 }
 0x45f   : > { %2852 = vrcp.f32 %v2228_v2  ;;  %v2116_v8 = vmul.f32 2.0, %v2052_v24  ;;  %v4170_v55 = vmul.f32 %v4455_v53, %v3697_v43  ;;  %v339_v17 = vmul.f32 %v4095_v54, %v4091_v18 }
 0x460   : > { %v2274_v37 = vadd.f32 %v2273_v23, %v2259_v28  ;;  %2854 = vlog2.f32 %v4107_v15  ;;  %v353_v5 = vadd.f32 %v352_v7, %v338_v52  ;;  %v4175_v47 = vadd.f32 0.0001, %v2086_v0 }
 0x461   : > { %v2132_v11 = vadd.f32 0.0009, %v2116_v8  ;;  %2856 = vrcp.f32 %v3826_v46  ;;  %v4179_v58 = vmul.f32 %v3829_v56, %v3701_v22  ;;  %v4456_v28 = vsub.f32 0.0, %v4008_v10  ;;  %v4458_v46 = vld [vmem:[#allocation27_spill] sm:$0xff] }
 0x462   : > { %v340_v43 = vmul.f32 %v4107_v15, %v4103_v31  ;;  %v354_v12 = vadd.f32 %v353_v5, %v339_v17  ;;  %2858 = vlog2.f32 %v4118_v32  ;;  %v4190_v34 = vadd.f32 0.0001, %v2087_v42 }
 0x463   : > { %v4184_v23 = vadd.f32 %v4457_v27, %v4456_v28  ;;  %v2148_v4 = vmul.f32 %v2132_v11, %v2100_v26  ;;  %v2851_v61 = vpop.eup %2850  ;;  %2860 = vrcp.f32 %v4458_v46  ;;  %v4192_v49 = vadd.f32 0.0001, %v2088_v14 }
 0x464   : > { %v1945_v22 = vpop.f32.mrf.mxu3  ;;  %v4196_v56 = vmul.f32 %v3838_v51, %v3707_v44  ;;  %2862 = vrcp.f32 %v3844_v40  ;;  %v341_v1 = vmul.f32 %v4118_v32, %v4114_v50  ;;  %v355_v35 = vadd.f32 %v354_v12, %v340_v43 }
 0x465   : > { %v2853_v10 = vpop.eup %2852  ;;  %v2053_v26 = vsub.f32 %v1945_v22, %v2037_v36  ;;  %v452_v21 = vmul.f32 0.6931472, %v4024_v57  ;;  %v454_v13 = vmul.f32 0.6931472, %v4027_v45  ;;  %2864 = vlog2.f32 %v4127_v6 }
 0x466   : > { %v2855_v2 = vpop.eup %2854  ;;  %v2260_v24 = vmul.f32 %v2853_v10, %v2148_v4  ;;  %v342_v44 = vmul.f32 %v4127_v6, %v4123_v60  ;;  %v356_v51 = vadd.f32 %v355_v35, %v341_v1  ;;  %v456_v0 = vmul.f32 0.6931472, %v2851_v61 }
 0x467   : > { %v2117_v53 = vmul.f32 2.0, %v2053_v26  ;;  %v2857_v40 = vpop.eup %2856  ;;  %2866 = vrcp.f32 %v3853_v20  ;;  %v525_v8 = vsub.f32 1.0, %v4095_v54  ;;  %v526_v52 = vsub.f32 1.0, %v4107_v15 }
 0x468   : > { %v2275_v36 = vadd.f32 %v2274_v37, %v2260_v24  ;;  %v2859_v7 = vpop.eup %2858  ;;  %v343_v45 = vmul.f32 %v4143_v9, %v4139_v59  ;;  %v357_v42 = vadd.f32 %v356_v51, %v342_v44  ;;  %v458_v14 = vmul.f32 0.6931472, %v2855_v2 }
 0x469   : > { %v2133_v57 = vadd.f32 0.0009, %v2117_v53  ;;  %v2861_v11 = vpop.eup %2860  ;;  %2868 = vlog2.f32 %v4143_v9  ;;  %v475_v17 = vmax.f32 %v452_v21, -100.0  ;;  %v476_v5 = vmax.f32 %v454_v13, -100.0 }
 0x46a   : > { %v527_v28 = vsub.f32 1.0, %v4118_v32  ;;  %v4213_v20 = vpop.eup %2862  ;;  %v344_v54 = vmul.f32 %v4156_v29, %v4152_v3  ;;  %v358_v15 = vadd.f32 %v357_v42, %v343_v45  ;;  %v477_v27 = vmax.f32 %v456_v0, -100.0 }
 0x46b   : > { %v2149_v37 = vmul.f32 %v2133_v57, %v2101_v41  ;;  %v2865_v4 = vpop.eup %2864  ;;  %v460_v12 = vmul.f32 0.6931472, %v2859_v7  ;;  %v528_v61 = vsub.f32 1.0, %v4127_v6  ;;  %v529_v46 = vsub.f32 1.0, %v4143_v9 }
 0x46c   : > { %v1947_v43 = vpop.f32.mrf.mxu3  ;;  %v548_v22 = vmul.f32 0.6931472, %v4039_v48  ;;  %v359_v26 = vadd.f32 %v358_v15, %v344_v54  ;;  %v478_v1 = vmax.f32 %v458_v14, -100.0  ;;  %2870 = vlog2.f32 %v4156_v29 }
 0x46d   : > { %v2261_v10 = vmul.f32 %v2857_v40, %v2149_v37  ;;  %v2054_v32 = vsub.f32 %v1947_v43, %v4170_v55  ;;  %v4221_v41 = vpop.eup %2866  ;;  %v491_v35 = vmul.f32 %v4071_v63, %v475_v17  ;;  %v492_v2 = vmul.f32 %v4079_v33, %v476_v5 }
 0x46e   : > { %v550_v24 = vmul.f32 0.6931472, %v4057_v38  ;;  %360 = vadd.xlane.f32.xlu2 %v359_v26  ;;  %v462_v9 = vmul.f32 0.6931472, %v2865_v4  ;;  %v4228_v48 = vmul.f32 %v4091_v18, %v477_v27  ;;  %v479_v13 = vmax.f32 %v460_v12, -100.0 }
 0x46f   : > { %v2276_v6 = vadd.f32 %v2275_v36, %v2261_v10  ;;  %v2118_v21 = vmul.f32 2.0, %v2054_v32  ;;  %v2869_v55 = vpop.eup %2868  ;;  %v508_v53 = vsub.f32 1.0, %v4079_v33  ;;  %v509_v44 = vsub.f32 1.0, %v4091_v18 }
 0x470   : > { %2872 = vlog2.f32 %v525_v8  ;;  %v4233_v0 = vmul.f32 %v4103_v31, %v478_v1  ;;  %v510_v38 = vsub.f32 1.0, %v4103_v31  ;;  %v511_v40 = vsub.f32 1.0, %v4114_v50 }
 0x471   : > { %v2134_v51 = vadd.f32 0.0009, %v2118_v21  ;;  %v530_v36 = vsub.f32 1.0, %v4156_v29  ;;  %2874 = vlog2.f32 %v526_v52  ;;  %v571_v7 = vmax.f32 %v548_v22, -100.0 }
 0x472   : > { %v572_v57 = vmax.f32 %v550_v24, -100.0  ;;  %v4239_v42 = vmul.f32 0.6931472, %v2869_v55  ;;  %v480_v33 = vmax.f32 %v462_v9, -100.0  ;;  %2876 = vlog2.f32 %v527_v28  ;;  %v2871_v18 = vpop.eup %2870 }
 0x473   : > { %v2150_v45 = vmul.f32 %v2134_v51, %v4175_v47  ;;  %v4242_v14 = vmul.f32 %v4114_v50, %v479_v13  ;;  %2878 = vlog2.f32 %v528_v61  ;;  %v4459_v31 = vsub.f32 1.0, %v4046_v39 }
 0x474   : > { %v1950_v8 = vpop.f32.mrf.mxu3  ;;  %v4460_v17 = vmax.f32 %v3972_v30, -100.0  ;;  %v601_v52 = vadd.f32 %v4062_v19, %v4043_v25  ;;  %v512_v37 = vsub.f32 1.0, %v4123_v60  ;;  %2880 = vlog2.f32 %v529_v46 }
 0x475   : > { %v2262_v5 = vmul.f32 %v2861_v11, %v2150_v45  ;;  %v2055_v47 = vsub.f32 %v1950_v8, %v4179_v58  ;;  %2882 = vlog2.f32 %v530_v36  ;;  %v4461_v54 = vsub.f32 1.0, %v4071_v63  ;;  %v4462_v11 = vld [vmem:[#allocation35_spill] sm:$0xff] }
 0x476   : > { %v586_v29 = vmul.f32 %v4460_v17, %v4459_v31  ;;  %v2873_v28 = vpop.eup %2872  ;;  %v588_v27 = vmul.f32 %v572_v57, %v508_v53  ;;  %v616_v39 = vsub.f32 0.0, %v4029_v16  ;;  %v466_v43 = vmul.f32 0.6931472, %v2871_v18 }
 0x477   : > { %v587_v15 = vmul.f32 %v571_v7, %v4461_v54  ;;  %v2277_v4 = vadd.f32 %v2276_v6, %v2262_v5  ;;  %v2119_v30 = vmul.f32 2.0, %v2055_v47  ;;  %v552_v12 = vmul.f32 0.6931472, %v2873_v28  ;;  %v2875_v61 = vpop.eup %2874 }
 0x478   : > { %v481_v25 = vmax.f32 %v4239_v42, -100.0  ;;  %v602_v19 = vadd.f32 %v586_v29, %v4051_v62  ;;  %v617_v58 = vsub.f32 0.0, %v601_v52  ;;  %v4463_v46 = vsub.f32 0.0, %v4462_v11  ;;  %v2877_v10 = vpop.eup %2876 }
 0x479   : > { %v2135_v63 = vadd.f32 0.0009, %v2119_v30  ;;  %v496_v32 = vmul.f32 %v4123_v60, %v480_v33  ;;  %v554_v26 = vmul.f32 0.6931472, %v2875_v61  ;;  %v573_v16 = vmax.f32 %v552_v12, -100.0  ;;  %v2879_v1 = vpop.eup %2878 }
 0x47a   : > { %v630_v22 = vadd.f32 %v4184_v23, %v4463_v46  ;;  %v556_v24 = vmul.f32 0.6931472, %v2877_v10  ;;  %v603_v6 = vadd.f32 %v587_v15, %v491_v35  ;;  %v604_v21 = vadd.f32 %v588_v27, %v492_v2  ;;  %v2881_v55 = vpop.eup %2880 }
 0x47b   : > { %v2151_v13 = vmul.f32 %v2135_v63, %v4190_v34  ;;  %v558_v62 = vmul.f32 0.6931472, %v2879_v1  ;;  %v574_v53 = vmax.f32 %v554_v26, -100.0  ;;  %v589_v51 = vmul.f32 %v573_v16, %v509_v44  ;;  %v2883_v36 = vpop.eup %2882 }
 0x47c   : > { %v631_v9 = vadd.f32 %v630_v22, %v616_v39  ;;  %v1952_v7 = vpop.f32.mrf.mxu3  ;;  %v560_v23 = vmul.f32 0.6931472, %v2881_v55  ;;  %v575_v57 = vmax.f32 %v556_v24, -100.0  ;;  %v618_v45 = vsub.f32 0.0, %v602_v19  ;;  %v4464_v39 = vld [vmem:[#allocation13_spill] sm:$0xff] }
 0x47d   : > { %v2263_v60 = vmul.f32 %v4213_v20, %v2151_v13  ;;  %v2056_v33 = vsub.f32 %v1952_v7, %v4196_v56  ;;  %v562_v18 = vmul.f32 0.6931472, %v2883_v36  ;;  %v576_v35 = vmax.f32 %v558_v62, -100.0 }
 0x47e   : > { %v632_v42 = vadd.f32 %v631_v9, %v617_v58  ;;  %v513_v2 = vsub.f32 1.0, %v4139_v59  ;;  %v577_v8 = vmax.f32 %v560_v23, -100.0  ;;  %v590_v31 = vmul.f32 %v574_v53, %v510_v38 }
 0x47f   : > { %v619_v34 = vsub.f32 0.0, %v603_v6  ;;  %v2278_v17 = vadd.f32 %v2277_v4, %v2263_v60  ;;  %v2120_v29 = vmul.f32 2.0, %v2056_v33  ;;  %v591_v44 = vmul.f32 %v575_v57, %v511_v40  ;;  %v4465_v4 = vld [vmem:[#allocation18_spill] sm:$0xff]  ;;  %v4469_v60 = vld [vmem:[#allocation31_spill] sm:$0xff] }
 0x480   : > { %v605_v52 = vadd.f32 %v589_v51, %v4228_v48  ;;  %v482_v5 = vmax.f32 %v466_v43, -100.0  ;;  %v514_v47 = vsub.f32 1.0, %v4152_v3  ;;  %v578_v20 = vmax.f32 %v562_v18, -100.0 }
 0x481   : > { %v592_v28 = vmul.f32 %v576_v35, %v512_v37  ;;  %v2136_v56 = vadd.f32 0.0009, %v2120_v29  ;;  %v606_v54 = vadd.f32 %v590_v31, %v4233_v0  ;;  %v620_v15 = vsub.f32 0.0, %v604_v21 }
 0x482   : > { %v633_v27 = vadd.f32 %v632_v42, %v618_v45  ;;  %v2073_v38 = vmul.f32 2.0, %v4464_v39  ;;  %v2041_v30 = vmul.f32 %v4465_v4, %v4464_v39  ;;  %v497_v50 = vmul.f32 %v4139_v59, %v481_v25  ;;  %v4466_v59 = vld [vmem:[#allocation29_spill] sm:$0xff] }
 0x483   : > { %v593_v40 = vmul.f32 %v577_v8, %v513_v2  ;;  %v2152_v48 = vmul.f32 %v2136_v56, %v4192_v49  ;;  %v607_v43 = vadd.f32 %v591_v44, %v4242_v14  ;;  %v621_v12 = vsub.f32 0.0, %v605_v52  ;;  %v4471_v44 = vld [vmem:[#allocation30_spill] sm:$0xff] }
 0x484   : > { %v634_v61 = vadd.f32 %v633_v27, %v619_v34  ;;  %v2089_v37 = vmul.f32 %v2073_v38, %v4465_v4  ;;  %v1955_v19 = vpop.f32.mrf.mxu3  ;;  %v498_v0 = vmul.f32 %v4152_v3, %v482_v5  ;;  %v594_v58 = vmul.f32 %v578_v20, %v514_v47  ;;  %v4467_v3 = vld [vmem:[#allocation23_spill] sm:$0xff]  ;;  %v4470_v34 = vld [vmem:[#allocation14_spill] sm:$0xff]  ;;  %v4473_v4 = vld [vmem:[#allocation24_spill] sm:$0xff] }
 0x485   : > { %v608_v11 = vadd.f32 %v592_v28, %v496_v32  ;;  %v2264_v46 = vmul.f32 %v4221_v41, %v2152_v48  ;;  %v2057_v22 = vsub.f32 %v1955_v19, %v2041_v30  ;;  %v622_v10 = vsub.f32 0.0, %v606_v54  ;;  %v4468_v41 = vld [vmem:[#allocation28_spill] sm:$0xff]  ;;  %v4472_v54 = vld [vmem:[#allocation33_spill] sm:$0xff] }
 0x486   : > { %v635_v63 = vadd.f32 %v634_v61, %v620_v15  ;;  %2884 = vrcp.f32 %v4466_v59  ;;  %v609_v25 = vadd.f32 %v593_v40, %v497_v50  ;;  %v623_v14 = vsub.f32 0.0, %v607_v43  ;;  %v4474_v40 = vld [vmem:[#allocation32_spill] sm:$0xff] }
 0x487   : > { %v2279_v49 = vadd.f32 %v2278_v17, %v2264_v46  ;;  %v2121_v26 = vmul.f32 2.0, %v2057_v22  ;;  %v2105_v1 = vadd.f32 0.0001, %v2089_v37  ;;  %v610_v6 = vadd.f32 %v594_v58, %v498_v0  ;;  %v4475_v0 = vld [vmem:[#allocation34_spill] sm:$0xff] }
 0x488   : > { %v636_v16 = vadd.f32 %v635_v63, %v621_v12  ;;  %v624_v21 = vsub.f32 0.0, %v608_v11  ;;  %v2074_v55 = vmul.f32 2.0, %v4467_v3  ;;  %v2042_v13 = vmul.f32 %v4468_v41, %v4467_v3 }
 0x489   : > { %v2137_v24 = vadd.f32 0.0009, %v2121_v26  ;;  %v625_v62 = vsub.f32 0.0, %v609_v25  ;;  %v626_v45 = vsub.f32 0.0, %v610_v6  ;;  %2886 = vrcp.f32 %v4469_v60 }
 0x48a   : > { %v637_v9 = vadd.f32 %v636_v16, %v622_v10  ;;  %v2090_v36 = vmul.f32 %v2074_v55, %v4468_v41  ;;  %v2075_v17 = vmul.f32 2.0, %v4470_v34  ;;  %v2043_v52 = vmul.f32 %v4471_v44, %v4470_v34 }
 0x48b   : > { %v2153_v32 = vmul.f32 %v2137_v24, %v2105_v1  ;;  %2888 = vrcp.f32 %v4472_v54  ;;  %v2076_v30 = vmul.f32 2.0, %v4473_v4  ;;  %v2044_v48 = vmul.f32 %v4474_v40, %v4473_v4 }
 0x48c   : > { %v638_v53 = vadd.f32 %v637_v9, %v623_v14  ;;  %v2885_v51 = vpop.eup %2884  ;;  %v1957_v7 = vpop.f32.mrf.mxu3  ;;  %v2106_v2 = vadd.f32 0.0001, %v2090_v36  ;;  %v2091_v20 = vmul.f32 %v2075_v17, %v4471_v44  ;;  %2890 = vrcp.f32 %v4475_v0 }
 0x48d   : > { %v2265_v23 = vmul.f32 %v2885_v51, %v2153_v32  ;;  %v2058_v57 = vsub.f32 %v1957_v7, %v2042_v13  ;;  %v2092_v61 = vmul.f32 %v2076_v30, %v4474_v40 }
 0x48e   : > { %v639_v42 = vadd.f32 %v638_v53, %v624_v21  ;;  %v2107_v39 = vadd.f32 0.0001, %v2091_v20 }
 0x48f   : > { %v2122_v33 = vmul.f32 2.0, %v2058_v57  ;;  %v2280_v35 = vadd.f32 %v2279_v49, %v2265_v23  ;;  %v2887_v5 = vpop.eup %2886  ;;  %v2108_v46 = vadd.f32 0.0001, %v2092_v61 }
 0x490   : > { %v640_v18 = vadd.f32 %v639_v42, %v625_v62 }
 0x491   : > { %v2138_v8 = vadd.f32 0.0009, %v2122_v33  ;;  %v2889_v43 = vpop.eup %2888 }
 0x492   : > { %v641_v31 = vadd.f32 %v640_v18, %v626_v45  ;;  %v2891_v63 = vpop.eup %2890 }
 0x493   : > { %v2154_v29 = vmul.f32 %v2138_v8, %v2106_v2 }
 0x494   : > { %642 = vadd.xlane.f32.xlu1 %v641_v31  ;;  %v1960_v47 = vpop.f32.mrf.mxu3 }
 0x495   : > { %v2266_v28 = vmul.f32 %v2887_v5, %v2154_v29  ;;  %v2059_v56 = vsub.f32 %v1960_v47, %v2043_v52 }
 0x497   : > { %v2123_v15 = vmul.f32 2.0, %v2059_v56  ;;  %v2281_v27 = vadd.f32 %v2280_v35, %v2266_v28 }
 0x499   : > { %v2139_v38 = vadd.f32 0.0009, %v2123_v15 }
 0x49b   : > { %v2155_v50 = vmul.f32 %v2139_v38, %v2107_v39 }
 0x49c   : > { %v1962_v12 = vpop.f32.mrf.mxu3 }
 0x49d   : > { %v2060_v37 = vsub.f32 %v1962_v12, %v2044_v48  ;;  %v2267_v19 = vmul.f32 %v2889_v43, %v2155_v50  ;;  %v2293_v43 = vlaneseq }
 0x49f   : > { %v2124_v58 = vmul.f32 2.0, %v2060_v37  ;;  %v2282_v11 = vadd.f32 %v2281_v27, %v2267_v19  ;;  %v2294_v12 = vand.u32 127, %v2293_v43 }
 0x4a1   : > { %v2140_v22 = vadd.f32 0.0009, %v2124_v58  ;;  %vm2297_vm4 = vcmp.eq.s32.totalorder %v2294_v12, 2  ;;  %vm2296_vm5 = vcmp.eq.s32.totalorder %v2294_v12, 1  ;;  %vm2295_vm6 = vcmp.eq.s32.totalorder %v2294_v12, 0 }
 0x4a3   : > { %v2156_v10 = vmul.f32 %v2140_v22, %v2108_v46 }
 0x4a5   : > { %v2268_v59 = vmul.f32 %v2891_v63, %v2156_v10 }
 0x4a7   : > { %v2283_v25 = vadd.f32 %v2282_v11, %v2268_v59 }
 0x4a9   : > { %2284 = vadd.xlane.f32.xlu1 %v2283_v25 }
 0x4d0   : > { %v407_v49 = vpop.xlane.xlu1 %406 }
 0x4d1   : > { %v384_v26 = vpop.xlane.xlu0 %383  ;;  %v408_v14 = vrot.slane %v407_v49, 4 }
 0x4d2   : > { %v385_v16 = vrot.slane %v384_v26, 4 }
 0x4d3   : > { %v409_v1 = vadd.f32 %v408_v14, %v407_v49 }
 0x4d4   : > { %v386_v24 = vadd.f32 %v385_v16, %v384_v26 }
 0x4d5   : > { %v410_v6 = vrot.slane %v409_v1, 2 }
 0x4d6   : > { %v387_v21 = vrot.slane %v386_v24, 2 }
 0x4d7   : > { %v411_v9 = vadd.f32 %v410_v6, %v409_v1 }
 0x4d8   : > { %v388_v3 = vadd.f32 %v387_v21, %v386_v24 }
 0x4d9   : > { %v412_v55 = vrot.slane %v411_v9, 1 }
 0x4da   : > { %v389_v32 = vrot.slane %v388_v3, 1 }
 0x4db   : > { %v413_v41 = vadd.f32 %v412_v55, %v411_v9 }
 0x4dc   : > { %v390_v13 = vadd.f32 %v389_v32, %v388_v3 }
 0x4de   : > { %v416_v62 = vadd.f32 %v413_v41, %v390_v13 }
 0x4e0   : > { %v417_v53 = vadd.f32 1.0, %v416_v62 }
 0x4e1   : > { %v361_v51 = vpop.xlane.xlu2 %360 }
 0x4e2   : > { %2892 = vrcp.f32 %v417_v53  ;;  %v362_v36 = vrot.slane %v361_v51, 4  ;;  %vm423_vm0 = vweird.f32 %v417_v53  ;;  %v427_v18 = vand.u32 2147483647, %v417_v53 }
 0x4e3   : > { %v429_v35 = vand.u32 2147483648, %v417_v53 }
 0x4e4   : > { %v363_v7 = vadd.f32 %v362_v36, %v361_v51  ;;  %vm428_vm3 = vcmp.eq.f32.partialorder %v427_v18, 8.507059e+37 }
 0x4e5   : > { %v430_v31 = vor.u32 1.1754944e-38, %v429_v35 }
 0x4e6   : > { %v364_v23 = vrot.slane %v363_v7, 2 }
 0x4e8   : > { %v2893_v57 = vpop.eup %2892  ;;  %v365_v45 = vadd.f32 %v364_v23, %v363_v7 }
 0x4e9   : > { %v419_v42 = vmul.f32 %v2893_v57, %v417_v53  ;;  %vm424_vm1 = vweird.f32 %v2893_v57 }
 0x4ea   : > { %v366_v60 = vrot.slane %v365_v45, 1  ;;  %vm425_vm2 = vmor %vm423_vm0, %vm424_vm1 }
 0x4eb   : > { %v420_v33 = vsub.f32 1.0, %v419_v42 }
 0x4ec   : > { %v367_v2 = vadd.f32 %v366_v60, %v365_v45 }
 0x4ed   : > { %v421_v8 = vmul.f32 %v2893_v57, %v420_v33 }
 0x4ee   : > { %v414_v34 = vadd.f32 1.0, %v367_v2 }
 0x4ef   : > { %v422_v17 = vadd.f32 %v2893_v57, %v421_v8 }
 0x4f0   : > { %v415_v29 = vmul.f32 2.0, %v414_v34 }
 0x4f1   : > { %v426_v44 = vsel %vm425_vm2, %v2893_v57, %v422_v17 }
 0x4f2   : > { %v431_v52 = vsel %vm428_vm3, %v430_v31, %v426_v44 }
 0x4f3   : > { %v432_v5 = vmul.f32 %v431_v52, %v415_v29 }
 0x4f5   : > { %2500 = vpush %v432_v5 }
 0x507   : > { %v643_v47 = vpop.xlane.xlu1 %642 }
 0x508   : > { %v644_v20 = vrot.slane %v643_v47, 4 }
 0x50a   : > { %v645_v28 = vadd.f32 %v644_v20, %v643_v47 }
 0x50c   : > { %v646_v56 = vrot.slane %v645_v28, 2 }
 0x50e   : > { %v647_v54 = vadd.f32 %v646_v56, %v645_v28 }
 0x510   : > { %v648_v15 = vrot.slane %v647_v54, 1 }
 0x512   : > { %v649_v27 = vadd.f32 %v648_v15, %v647_v54 }
 0x514   : > { %2502 = vpush %v649_v27 }
 0x51c   : > { %v2285_v39 = vpop.xlane.xlu1 %2284 }
 0x51d   : > { %v2286_v38 = vrot.slane %v2285_v39, 4 }
 0x51f   : > { %v2287_v4 = vadd.f32 %v2286_v38, %v2285_v39 }
 0x521   : > { %v2288_v30 = vrot.slane %v2287_v4, 2 }
 0x523   : > { %v2289_v50 = vadd.f32 %v2288_v30, %v2287_v4 }
 0x525   : > { %v2290_v40 = vrot.slane %v2289_v50, 1 }
 0x526   : > { %s2501_s7 = spop %2500 }
 0x527   : > { %v2291_v48 = vadd.f32 %v2290_v40, %v2289_v50  ;;  %v2298_v61 = vstv %s2501_s7 }
 0x528   : > { %v2299_v37 = vsel %vm2297_vm4, %v2298_v61, 0.0 }
 0x529   : > { %2504 = vpush %v2291_v48 }
 0x545   : > { %s2503_s30 = spop %2502 }
 0x546   : > { %v2302_v0 = vstv %s2503_s30 }
 0x55a   : > { %s2505_s24 = spop %2504 }
 0x55b   : > { %v2300_v19 = vstv %s2505_s24 }
 0x55c   : > { %v2301_v58 = vsel %vm2296_vm5, %v2300_v19, %v2299_v37 }
 0x55d   : > { %v2303_v11 = vsel %vm2295_vm6, %v2302_v0, %v2301_v58 }
 0x55e   : > { %2304 = vst [vmem:[%s248_s20] sm:$0xff] %v2303_v11 }
 0x55f   : > { %3040 = shalt.err (!%p3037_p11)
}
 0x560   : > { %2514 = dma.vmem_to_hbm [thread:$0]  (%p3181_p7), %s2319_s29, 128, %s2321_s11, %s2306_s16  }
 0x561 PF: > { %s2332_s2 = sand.u32 1, %s3075_s12   ;;  %p4476_p12 = scmp.ge.s32.totalorder %s3087_s15, 2 }
 0x562   : > { %s2333_s22 = scalar_lea.sflag [#allocation4], %s2332_s2 }
 0x563   : > { %p2528_p13 = pnand %p4476_p12, %p3149_p6 }
 0x565   : > { %p2529_p0 = pneg %p2528_p13 }
 0x567   : > { %3070 = dma.done.wait (%p2529_p0), %s2333_s22, 128  }
 0x568   : > { %3072 = vsyncadd (%p2529_p0), %s2333_s22, 4294967168  ;;  %p19_p3 = scmp.ge.s32.totalorder %s3167_s26, 4   ;;  %s4477_s12 = smov %s3079_s13 }
 0x569   : > { %s4478_s13 = smov %s3083_s14  ;;  %s4479_s14 = smov %s3177_s4 }
 0x56a   : > { %s4480_s15 = smov %s3167_s26  ;;  %21 = sbr.rel (!%p19_p3) target bundleno = 10 (0xa), region = 94 }
 0x56f   :  { %2339 = vsyncpa [#allocation3], 1 }
 0x570   :  { %2341 = vsyncpa [#allocation3 + $0x1], 1 }
 0x571   :  { %2342 = vsyncpa [#allocation6], 1 }
 0x572   :  { %2344 = vsyncpa [#allocation6 + $0x1], 1 }
 0x573   :  { %2345 = vsyncpa [#allocation4], 1 }
 0x574   :  { %2347 = vsyncpa [#allocation4 + $0x1], 1 }

</bundles_post_ra>
